<compile_context>
chip_gen: v7x
topology: tpu7x:2x2x1
jax: 0.10.0
libtpu: 0.0.40
codegen_flags: <defaults>
</compile_context>

<pallas_src>
import math
import functools

import jax
import jax.numpy as jnp
from jax import lax
from jax.experimental import pallas as pl
from jax.experimental.pallas import tpu as pltpu


# ----------------------------------------------------------------------------
# Fused kernel: whole CrossTransformer forward in one invocation
# ----------------------------------------------------------------------------

def _fused_cross_transformer_kernel(B, S, H,
                                    x1_ref, x2_ref,
                                    wqkvb_ref,   # (3, D+1, 3D): [Wq|Wk|Wv ; b_qkv]
                                    wob_ref,     # (3, D+1, D) : [Wo ; b_o]
                                    gate_ref,    # (D+1, 2D)   : [gate_w ; gate_b]
                                    down_ref,    # (2D+1, D)   : [down_w ; down_b]
                                    ln_ref,      # (10, D): sl1(g,b) sl2(g,b) fus(g,b) enc(g,b) mlp(g,b)
                                    o_ref):
    D = x1_ref.shape[-1]
    Dh = D // H
    scale = 1.0 / math.sqrt(Dh)
    f32 = jnp.float32

    ln_p = ln_ref[...].astype(f32)            # (10, D), loaded once

    def ln_nn(x, row, eps=1e-5):
        # nn.LayerNorm semantics: biased variance, eps inside the sqrt.
        g = ln_p[row:row + 1, :]
        b = ln_p[row + 1:row + 2, :]
        mean = jnp.mean(x, axis=-1, keepdims=True)
        var = jnp.mean((x - mean) ** 2, axis=-1, keepdims=True)
        return (x - mean) * lax.rsqrt(var + eps) * g + b

    def ln_std(x, g, b, eps=1e-6):
        # Custom LayerNormalization: unbiased (D-1) std, eps added to the std.
        mean = jnp.mean(x, axis=-1, keepdims=True)
        var = jnp.sum((x - mean) ** 2, axis=-1, keepdims=True) * (1.0 / (D - 1))
        return g * ((x - mean) / (jnp.sqrt(var) + eps)) + b

    def mha(q_rows, kv_rows, idx, Sq, Skv):
        # q_rows: (B*Sq, D); kv_rows: (B*Skv, D) or None for self-attention.
        wqkvb = wqkvb_ref[idx]                # (D+1, 3D)
        wob = wob_ref[idx]                    # (D+1, D)
        wqkv = wqkvb[:D, :]
        bqkv = wqkvb[D:D + 1, :]

        nq = B * Sq
        if kv_rows is None:
            # Self-attention: one (B*Skv, D) x (D, 3D) dot yields Q, K and V.
            P = jnp.dot(q_rows, wqkv, preferred_element_type=f32) + bqkv
            Pq = Pkv = P
        else:
            # Fused Q + K|V projection: stack query rows on top of key/value rows.
            X = jnp.concatenate([q_rows, kv_rows], axis=0)
            P = jnp.dot(X, wqkv, preferred_element_type=f32) + bqkv
            Pq = P[:nq, :]
            Pkv = P[nq:, :]

        # 1/sqrt(Dh) folded into Q (smaller array than the score matrix).
        q3 = (Pq[:, :D] * scale).reshape(B, Sq, D)
        k3 = Pkv[:, D:2 * D].reshape(B, Skv, D)
        v3 = Pkv[:, 2 * D:].reshape(B, Skv, D)

        # Heads as static lane slices; loop unrolled at trace time.
        heads = []
        for h in range(H):
            sl = slice(h * Dh, (h + 1) * Dh)
            s = jnp.einsum('bqd,bkd->bqk', q3[:, :, sl], k3[:, :, sl],
                           preferred_element_type=f32)
            s = s - jnp.max(s, axis=-1, keepdims=True)
            p = jnp.exp(s)
            p = p * pl.reciprocal(jnp.sum(p, axis=-1, keepdims=True), approx=True)
            # TODO(synk): attention dropout omitted (inference semantics).
            heads.append(jnp.einsum('bqk,bkd->bqd', p, v3[:, :, sl],
                                    preferred_element_type=f32))
        o = jnp.concatenate(heads, axis=-1).reshape(B * Sq, D)

        return jnp.dot(o, wob[:D, :], preferred_element_type=f32) + wob[D:D + 1, :]

    x1 = x1_ref[...].astype(f32)              # (B*S, D)
    x2 = x2_ref[...].astype(f32)              # (B*S, D)

    # ---------------- EncoderLayer ----------------
    # sublayer1: srb1 + mha1(q=sl1norm(srb1), kv=sl1norm(srb2)); then shared encoder norm.
    out1 = ln_nn(x1 + mha(ln_nn(x1, 0), ln_nn(x2, 0), 0, S, S), 6)
    # sublayer2: srb2 + mha2(q=sl2norm(srb2), kv=sl2norm(srb1)); then shared encoder norm.
    out2 = ln_nn(x2 + mha(ln_nn(x2, 2), ln_nn(x1, 2), 1, S, S), 6)

    # fusion: per-batch concat along the sequence dim, self-attention, shared encoder norm.
    S2 = 2 * S
    fusion = jnp.concatenate(
        [out1.reshape(B, S, D), out2.reshape(B, S, D)], axis=1).reshape(B * S2, D)
    fn = ln_nn(fusion, 4)
    # TODO(synk): for large D/S tile this fusion attention flash-style and set
    # pltpu.CompilerParams(vmem_limit_bytes=...) (v7x has 64 MiB VMEM).
    fused = ln_nn(fusion + mha(fn, None, 2, S2, S2), 6)

    # ---------------- TransformerMLP (single shared LayerNormalization) ----------------
    g_w = gate_ref[:D, :]
    g_b = gate_ref[D:D + 1, :]
    d_w = down_ref[:2 * D, :]
    d_b = down_ref[2 * D:2 * D + 1, :]
    mg = ln_p[8:9, :]
    mb = ln_p[9:10, :]

    gate = jnp.dot(ln_std(fused, mg, mb), g_w, preferred_element_type=f32) + g_b
    gate = jnp.maximum(gate, 0.0)
    down = jnp.dot(gate, d_w, preferred_element_type=f32) + d_b
    # TODO(synk): residual/MLP dropout omitted (inference semantics).
    out = ln_std(down + fused, mg, mb)

    o_ref[...] = out.astype(o_ref.dtype)


# ----------------------------------------------------------------------------
# Wrapper: parameter packing + pallas_call
# ----------------------------------------------------------------------------

def cross_transformer_forward(params, input1, input2, num_heads):
    B, S, D = input1.shape
    S2 = 2 * S
    enc, mlp = params['enc'], params['mlp']

    def mha_slabs(p):
        wqkv = jnp.concatenate([p['wq'], p['wk'], p['wv']], axis=1)        # (D, 3D)
        bqkv = jnp.concatenate([p['bq'], p['bk'], p['bv']]).reshape(1, 3 * D)
        wqkvb = jnp.concatenate([wqkv, bqkv], axis=0)                      # (D+1, 3D)
        wob = jnp.concatenate([p['wo'], p['bo'].reshape(1, D)], axis=0)    # (D+1, D)
        return wqkvb, wob

    slabs = [mha_slabs(enc[k]) for k in ('mha1', 'mha2', 'fus_mha')]
    wqkvb_all = jnp.stack([s[0] for s in slabs], axis=0)                   # (3, D+1, 3D)
    wob_all = jnp.stack([s[1] for s in slabs], axis=0)                     # (3, D+1, D)

    ln_slab = jnp.stack([
        enc['sl1_norm']['gamma'], enc['sl1_norm']['beta'],
        enc['sl2_norm']['gamma'], enc['sl2_norm']['beta'],
        enc['fus_norm']['gamma'], enc['fus_norm']['beta'],
        enc['el_norm']['gamma'], enc['el_norm']['beta'],
        mlp['ln']['gamma'], mlp['ln']['beta'],
    ], axis=0)                                                             # (10, D)

    gate_slab = jnp.concatenate(
        [mlp['gate_w'], mlp['gate_b'].reshape(1, 2 * D)], axis=0)          # (D+1, 2D)
    down_slab = jnp.concatenate(
        [mlp['down_w'], mlp['down_b'].reshape(1, D)], axis=0)              # (2D+1, D)

    # Fold batch into matmul rows (single kernel invocation, no grid).
    x1 = input1.reshape(B * S, D)
    x2 = input2.reshape(B * S, D)

    operands = (x1, x2, wqkvb_all, wob_all, gate_slab, down_slab, ln_slab)
    vmem_spec = pl.BlockSpec(memory_space=pltpu.MemorySpace.VMEM)

    kernel = functools.partial(_fused_cross_transformer_kernel, B, S, num_heads)
    out = pl.pallas_call(
        kernel,
        out_shape=jax.ShapeDtypeStruct((B * S2, D), input1.dtype),
        in_specs=[vmem_spec] * len(operands),
        out_specs=vmem_spec,
    )(*operands)
    return out.reshape(B, S2, D)


# ----------------------------------------------------------------------------
# Deterministic parameter init (xavier-uniform for matrices, like init_params)
# ----------------------------------------------------------------------------

def _xavier(key, shape):
    fan_in, fan_out = shape
    limit = math.sqrt(6.0 / (fan_in + fan_out))
    return jax.random.uniform(key, shape, jnp.float32, -limit, limit)


def _init_mha(key, D):
    ks = jax.random.split(key, 4)
    return dict(
        wq=_xavier(ks[0], (D, D)), bq=jnp.zeros((D,), jnp.float32),
        wk=_xavier(ks[1], (D, D)), bk=jnp.zeros((D,), jnp.float32),
        wv=_xavier(ks[2], (D, D)), bv=jnp.zeros((D,), jnp.float32),
        wo=_xavier(ks[3], (D, D)), bo=jnp.zeros((D,), jnp.float32),
    )


def _init_ln(D):
    return dict(gamma=jnp.ones((D,), jnp.float32), beta=jnp.zeros((D,), jnp.float32))


def init_params(key, D):
    ks = jax.random.split(key, 5)
    enc = dict(
        mha1=_init_mha(ks[0], D),
        mha2=_init_mha(ks[1], D),
        fus_mha=_init_mha(ks[2], D),
        sl1_norm=_init_ln(D),
        sl2_norm=_init_ln(D),
        fus_norm=_init_ln(D),
        el_norm=_init_ln(D),
    )
    mlp = dict(
        gate_w=_xavier(ks[3], (D, 2 * D)), gate_b=jnp.zeros((2 * D,), jnp.float32),
        down_w=_xavier(ks[4], (2 * D, D)), down_b=jnp.zeros((D,), jnp.float32),
        ln=_init_ln(D),
    )
    return dict(enc=enc, mlp=mlp)


# ----------------------------------------------------------------------------
# Main
# ----------------------------------------------------------------------------

if __name__ == "__main__":
    B, S, D, H = 2, 8, 32, 4  # batch, seq, model_dimension, number_of_heads

    key = jax.random.PRNGKey(0)
    kp, k1, k2 = jax.random.split(key, 3)

    params = init_params(kp, D)
    input1 = jax.random.normal(k1, (B, S, D), jnp.float32)
    input2 = jax.random.normal(k2, (B, S, D), jnp.float32)

    fwd = jax.jit(functools.partial(cross_transformer_forward, num_heads=H))
    out = fwd(params, input1, input2)
    out = jax.block_until_ready(out)

    assert out.shape == (B, 2 * S, D), out.shape
    assert bool(jnp.all(jnp.isfinite(out)))
    print("KERNEL_OK")
</pallas_src>

<mosaic_0001>
module attributes {stable_mosaic.version = 11 : i64} {
  func.func @_fused_cross_transformer_kernel(%arg0: memref<16x32xf32, #tpu.memory_space<vmem>>, %arg1: memref<16x32xf32, #tpu.memory_space<vmem>>, %arg2: memref<3x33x96xf32, #tpu.memory_space<vmem>>, %arg3: memref<3x33x32xf32, #tpu.memory_space<vmem>>, %arg4: memref<33x64xf32, #tpu.memory_space<vmem>>, %arg5: memref<65x32xf32, #tpu.memory_space<vmem>>, %arg6: memref<10x32xf32, #tpu.memory_space<vmem>>, %arg7: memref<32x32xf32, #tpu.memory_space<vmem>>) attributes {dimension_semantics = [], scalar_prefetch = 0 : i64, scratch_operands = 0 : i64, tpu.core_type = #tpu.core_type<tc>} {
    %c0 = arith.constant 0 : index
    %c0_0 = arith.constant 0 : index
    %0 = vector.load %arg6[%c0, %c0_0] : memref<10x32xf32, #tpu.memory_space<vmem>>, vector<10x32xf32>
    %c0_1 = arith.constant 0 : index
    %c0_2 = arith.constant 0 : index
    %1 = vector.load %arg0[%c0_1, %c0_2] : memref<16x32xf32, #tpu.memory_space<vmem>>, vector<16x32xf32>
    %c0_3 = arith.constant 0 : index
    %c0_4 = arith.constant 0 : index
    %2 = vector.load %arg1[%c0_3, %c0_4] : memref<16x32xf32, #tpu.memory_space<vmem>>, vector<16x32xf32>
    %3 = vector.extract_strided_slice %0 {offsets = [0, 0], sizes = [1, 32], strides = [1, 1]} : vector<10x32xf32> to vector<1x32xf32>
    %4 = vector.extract_strided_slice %0 {offsets = [1, 0], sizes = [1, 32], strides = [1, 1]} : vector<10x32xf32> to vector<1x32xf32>
    %cst = arith.constant dense<0.000000e+00> : vector<16xf32>
    %5 = vector.multi_reduction <add>, %1, %cst [1] : vector<16x32xf32> to vector<16xf32>
    %6 = vector.shape_cast %5 : vector<16xf32> to vector<16x1xf32>
    %cst_5 = arith.constant 3.200000e+01 : f32
    %7 = vector.broadcast %cst_5 : f32 to vector<16x1xf32>
    %8 = arith.divf %6, %7 : vector<16x1xf32>
    %9 = vector.broadcast %8 : vector<16x1xf32> to vector<16x32xf32>
    %10 = arith.subf %1, %9 : vector<16x32xf32>
    %11 = arith.mulf %10, %10 : vector<16x32xf32>
    %cst_6 = arith.constant dense<0.000000e+00> : vector<16xf32>
    %12 = vector.multi_reduction <add>, %11, %cst_6 [1] : vector<16x32xf32> to vector<16xf32>
    %13 = vector.shape_cast %12 : vector<16xf32> to vector<16x1xf32>
    %cst_7 = arith.constant 3.200000e+01 : f32
    %14 = vector.broadcast %cst_7 : f32 to vector<16x1xf32>
    %15 = arith.divf %13, %14 : vector<16x1xf32>
    %16 = vector.broadcast %8 : vector<16x1xf32> to vector<16x32xf32>
    %17 = arith.subf %1, %16 : vector<16x32xf32>
    %cst_8 = arith.constant 9.99999974E-6 : f32
    %18 = vector.broadcast %cst_8 : f32 to vector<16x1xf32>
    %19 = arith.addf %15, %18 : vector<16x1xf32>
    %20 = math.rsqrt %19 : vector<16x1xf32>
    %21 = vector.broadcast %20 : vector<16x1xf32> to vector<16x32xf32>
    %22 = arith.mulf %17, %21 : vector<16x32xf32>
    %23 = vector.broadcast %3 : vector<1x32xf32> to vector<16x32xf32>
    %24 = arith.mulf %22, %23 : vector<16x32xf32>
    %25 = vector.broadcast %4 : vector<1x32xf32> to vector<16x32xf32>
    %26 = arith.addf %24, %25 : vector<16x32xf32>
    %27 = vector.extract_strided_slice %0 {offsets = [0, 0], sizes = [1, 32], strides = [1, 1]} : vector<10x32xf32> to vector<1x32xf32>
    %28 = vector.extract_strided_slice %0 {offsets = [1, 0], sizes = [1, 32], strides = [1, 1]} : vector<10x32xf32> to vector<1x32xf32>
    %cst_9 = arith.constant dense<0.000000e+00> : vector<16xf32>
    %29 = vector.multi_reduction <add>, %2, %cst_9 [1] : vector<16x32xf32> to vector<16xf32>
    %30 = vector.shape_cast %29 : vector<16xf32> to vector<16x1xf32>
    %cst_10 = arith.constant 3.200000e+01 : f32
    %31 = vector.broadcast %cst_10 : f32 to vector<16x1xf32>
    %32 = arith.divf %30, %31 : vector<16x1xf32>
    %33 = vector.broadcast %32 : vector<16x1xf32> to vector<16x32xf32>
    %34 = arith.subf %2, %33 : vector<16x32xf32>
    %35 = arith.mulf %34, %34 : vector<16x32xf32>
    %cst_11 = arith.constant dense<0.000000e+00> : vector<16xf32>
    %36 = vector.multi_reduction <add>, %35, %cst_11 [1] : vector<16x32xf32> to vector<16xf32>
    %37 = vector.shape_cast %36 : vector<16xf32> to vector<16x1xf32>
    %cst_12 = arith.constant 3.200000e+01 : f32
    %38 = vector.broadcast %cst_12 : f32 to vector<16x1xf32>
    %39 = arith.divf %37, %38 : vector<16x1xf32>
    %40 = vector.broadcast %32 : vector<16x1xf32> to vector<16x32xf32>
    %41 = arith.subf %2, %40 : vector<16x32xf32>
    %cst_13 = arith.constant 9.99999974E-6 : f32
    %42 = vector.broadcast %cst_13 : f32 to vector<16x1xf32>
    %43 = arith.addf %39, %42 : vector<16x1xf32>
    %44 = math.rsqrt %43 : vector<16x1xf32>
    %45 = vector.broadcast %44 : vector<16x1xf32> to vector<16x32xf32>
    %46 = arith.mulf %41, %45 : vector<16x32xf32>
    %47 = vector.broadcast %27 : vector<1x32xf32> to vector<16x32xf32>
    %48 = arith.mulf %46, %47 : vector<16x32xf32>
    %49 = vector.broadcast %28 : vector<1x32xf32> to vector<16x32xf32>
    %50 = arith.addf %48, %49 : vector<16x32xf32>
    %c0_14 = arith.constant 0 : index
    %c0_15 = arith.constant 0 : index
    %c0_16 = arith.constant 0 : index
    %51 = vector.load %arg2[%c0_14, %c0_15, %c0_16] : memref<3x33x96xf32, #tpu.memory_space<vmem>>, vector<1x33x96xf32>
    %52 = vector.shape_cast %51 : vector<1x33x96xf32> to vector<33x96xf32>
    %c0_17 = arith.constant 0 : index
    %c0_18 = arith.constant 0 : index
    %c0_19 = arith.constant 0 : index
    %53 = vector.load %arg3[%c0_17, %c0_18, %c0_19] : memref<3x33x32xf32, #tpu.memory_space<vmem>>, vector<1x33x32xf32>
    %54 = vector.shape_cast %53 : vector<1x33x32xf32> to vector<33x32xf32>
    %55 = vector.extract_strided_slice %52 {offsets = [0, 0], sizes = [32, 96], strides = [1, 1]} : vector<33x96xf32> to vector<32x96xf32>
    %56 = vector.extract_strided_slice %52 {offsets = [32, 0], sizes = [1, 96], strides = [1, 1]} : vector<33x96xf32> to vector<1x96xf32>
    %57 = tpu.concatenate %26, %50 in 0 : vector<16x32xf32>, vector<16x32xf32> -> vector<32x32xf32>
    %cst_20 = arith.constant dense<0.000000e+00> : vector<32x96xf32>
    %58 = tpu.matmul %57, %55, %cst_20 {dimension_numbers = #tpu.dot_dimension_numbers<[1], [0], [0], [1], [0, 0, 1, 1], [], []>} : vector<32x32xf32>, vector<32x96xf32>, vector<32x96xf32> -> vector<32x96xf32>
    %59 = vector.broadcast %56 : vector<1x96xf32> to vector<32x96xf32>
    %60 = arith.addf %58, %59 : vector<32x96xf32>
    %61 = vector.extract_strided_slice %60 {offsets = [0, 0], sizes = [16, 96], strides = [1, 1]} : vector<32x96xf32> to vector<16x96xf32>
    %62 = vector.extract_strided_slice %60 {offsets = [16, 0], sizes = [16, 96], strides = [1, 1]} : vector<32x96xf32> to vector<16x96xf32>
    %63 = vector.extract_strided_slice %61 {offsets = [0, 0], sizes = [16, 32], strides = [1, 1]} : vector<16x96xf32> to vector<16x32xf32>
    %cst_21 = arith.constant 0.353553385 : f32
    %64 = vector.broadcast %cst_21 : f32 to vector<16x32xf32>
    %65 = arith.mulf %63, %64 : vector<16x32xf32>
    %66 = vector.shape_cast %65 : vector<16x32xf32> to vector<2x8x32xf32>
    %67 = vector.extract_strided_slice %62 {offsets = [0, 32], sizes = [16, 32], strides = [1, 1]} : vector<16x96xf32> to vector<16x32xf32>
    %68 = vector.shape_cast %67 : vector<16x32xf32> to vector<2x8x32xf32>
    %69 = vector.extract_strided_slice %62 {offsets = [0, 64], sizes = [16, 32], strides = [1, 1]} : vector<16x96xf32> to vector<16x32xf32>
    %70 = vector.shape_cast %69 : vector<16x32xf32> to vector<2x8x32xf32>
    %71 = vector.extract_strided_slice %66 {offsets = [0, 0, 0], sizes = [2, 8, 8], strides = [1, 1, 1]} : vector<2x8x32xf32> to vector<2x8x8xf32>
    %72 = vector.extract_strided_slice %68 {offsets = [0, 0, 0], sizes = [2, 8, 8], strides = [1, 1, 1]} : vector<2x8x32xf32> to vector<2x8x8xf32>
    "tpu.trace_start"() <{level = 10 : i32, message = "bqd,bkd->bqk"}> : () -> ()
    %cst_22 = arith.constant dense<0.000000e+00> : vector<2x8x8xf32>
    %73 = tpu.matmul %71, %72, %cst_22 {dimension_numbers = #tpu.dot_dimension_numbers<[2], [2], [1], [1], [0, 0, 0, 1, 1, 1], [0], [0]>} : vector<2x8x8xf32>, vector<2x8x8xf32>, vector<2x8x8xf32> -> vector<2x8x8xf32>
    "tpu.trace_stop"() : () -> ()
    %cst_23 = arith.constant dense<0xFF800000> : vector<2x8xf32>
    %74 = vector.multi_reduction <maximumf>, %73, %cst_23 [2] : vector<2x8x8xf32> to vector<2x8xf32>
    %75 = vector.shape_cast %74 : vector<2x8xf32> to vector<2x8x1xf32>
    %76 = vector.broadcast %75 : vector<2x8x1xf32> to vector<2x8x8xf32>
    %77 = arith.subf %73, %76 : vector<2x8x8xf32>
    %78 = math.exp %77 : vector<2x8x8xf32>
    %cst_24 = arith.constant dense<0.000000e+00> : vector<2x8xf32>
    %79 = vector.multi_reduction <add>, %78, %cst_24 [2] : vector<2x8x8xf32> to vector<2x8xf32>
    %80 = vector.shape_cast %79 : vector<2x8xf32> to vector<2x8x1xf32>
    %81 = tpu.reciprocal %80 {approx = true} : vector<2x8x1xf32> -> vector<2x8x1xf32>
    %82 = vector.broadcast %81 : vector<2x8x1xf32> to vector<2x8x8xf32>
    %83 = arith.mulf %78, %82 : vector<2x8x8xf32>
    %84 = vector.extract_strided_slice %70 {offsets = [0, 0, 0], sizes = [2, 8, 8], strides = [1, 1, 1]} : vector<2x8x32xf32> to vector<2x8x8xf32>
    "tpu.trace_start"() <{level = 10 : i32, message = "bqk,bkd->bqd"}> : () -> ()
    %cst_25 = arith.constant dense<0.000000e+00> : vector<2x8x8xf32>
    %85 = tpu.matmul %83, %84, %cst_25 {dimension_numbers = #tpu.dot_dimension_numbers<[2], [1], [1], [2], [0, 0, 0, 1, 1, 2], [0], [0]>} : vector<2x8x8xf32>, vector<2x8x8xf32>, vector<2x8x8xf32> -> vector<2x8x8xf32>
    "tpu.trace_stop"() : () -> ()
    %86 = vector.extract_strided_slice %66 {offsets = [0, 0, 8], sizes = [2, 8, 8], strides = [1, 1, 1]} : vector<2x8x32xf32> to vector<2x8x8xf32>
    %87 = vector.extract_strided_slice %68 {offsets = [0, 0, 8], sizes = [2, 8, 8], strides = [1, 1, 1]} : vector<2x8x32xf32> to vector<2x8x8xf32>
    "tpu.trace_start"() <{level = 10 : i32, message = "bqd,bkd->bqk"}> : () -> ()
    %cst_26 = arith.constant dense<0.000000e+00> : vector<2x8x8xf32>
    %88 = tpu.matmul %86, %87, %cst_26 {dimension_numbers = #tpu.dot_dimension_numbers<[2], [2], [1], [1], [0, 0, 0, 1, 1, 1], [0], [0]>} : vector<2x8x8xf32>, vector<2x8x8xf32>, vector<2x8x8xf32> -> vector<2x8x8xf32>
    "tpu.trace_stop"() : () -> ()
    %cst_27 = arith.constant dense<0xFF800000> : vector<2x8xf32>
    %89 = vector.multi_reduction <maximumf>, %88, %cst_27 [2] : vector<2x8x8xf32> to vector<2x8xf32>
    %90 = vector.shape_cast %89 : vector<2x8xf32> to vector<2x8x1xf32>
    %91 = vector.broadcast %90 : vector<2x8x1xf32> to vector<2x8x8xf32>
    %92 = arith.subf %88, %91 : vector<2x8x8xf32>
    %93 = math.exp %92 : vector<2x8x8xf32>
    %cst_28 = arith.constant dense<0.000000e+00> : vector<2x8xf32>
    %94 = vector.multi_reduction <add>, %93, %cst_28 [2] : vector<2x8x8xf32> to vector<2x8xf32>
    %95 = vector.shape_cast %94 : vector<2x8xf32> to vector<2x8x1xf32>
    %96 = tpu.reciprocal %95 {approx = true} : vector<2x8x1xf32> -> vector<2x8x1xf32>
    %97 = vector.broadcast %96 : vector<2x8x1xf32> to vector<2x8x8xf32>
    %98 = arith.mulf %93, %97 : vector<2x8x8xf32>
    %99 = vector.extract_strided_slice %70 {offsets = [0, 0, 8], sizes = [2, 8, 8], strides = [1, 1, 1]} : vector<2x8x32xf32> to vector<2x8x8xf32>
    "tpu.trace_start"() <{level = 10 : i32, message = "bqk,bkd->bqd"}> : () -> ()
    %cst_29 = arith.constant dense<0.000000e+00> : vector<2x8x8xf32>
    %100 = tpu.matmul %98, %99, %cst_29 {dimension_numbers = #tpu.dot_dimension_numbers<[2], [1], [1], [2], [0, 0, 0, 1, 1, 2], [0], [0]>} : vector<2x8x8xf32>, vector<2x8x8xf32>, vector<2x8x8xf32> -> vector<2x8x8xf32>
    "tpu.trace_stop"() : () -> ()
    %101 = vector.extract_strided_slice %66 {offsets = [0, 0, 16], sizes = [2, 8, 8], strides = [1, 1, 1]} : vector<2x8x32xf32> to vector<2x8x8xf32>
    %102 = vector.extract_strided_slice %68 {offsets = [0, 0, 16], sizes = [2, 8, 8], strides = [1, 1, 1]} : vector<2x8x32xf32> to vector<2x8x8xf32>
    "tpu.trace_start"() <{level = 10 : i32, message = "bqd,bkd->bqk"}> : () -> ()
    %cst_30 = arith.constant dense<0.000000e+00> : vector<2x8x8xf32>
    %103 = tpu.matmul %101, %102, %cst_30 {dimension_numbers = #tpu.dot_dimension_numbers<[2], [2], [1], [1], [0, 0, 0, 1, 1, 1], [0], [0]>} : vector<2x8x8xf32>, vector<2x8x8xf32>, vector<2x8x8xf32> -> vector<2x8x8xf32>
    "tpu.trace_stop"() : () -> ()
    %cst_31 = arith.constant dense<0xFF800000> : vector<2x8xf32>
    %104 = vector.multi_reduction <maximumf>, %103, %cst_31 [2] : vector<2x8x8xf32> to vector<2x8xf32>
    %105 = vector.shape_cast %104 : vector<2x8xf32> to vector<2x8x1xf32>
    %106 = vector.broadcast %105 : vector<2x8x1xf32> to vector<2x8x8xf32>
    %107 = arith.subf %103, %106 : vector<2x8x8xf32>
    %108 = math.exp %107 : vector<2x8x8xf32>
    %cst_32 = arith.constant dense<0.000000e+00> : vector<2x8xf32>
    %109 = vector.multi_reduction <add>, %108, %cst_32 [2] : vector<2x8x8xf32> to vector<2x8xf32>
    %110 = vector.shape_cast %109 : vector<2x8xf32> to vector<2x8x1xf32>
    %111 = tpu.reciprocal %110 {approx = true} : vector<2x8x1xf32> -> vector<2x8x1xf32>
    %112 = vector.broadcast %111 : vector<2x8x1xf32> to vector<2x8x8xf32>
    %113 = arith.mulf %108, %112 : vector<2x8x8xf32>
    %114 = vector.extract_strided_slice %70 {offsets = [0, 0, 16], sizes = [2, 8, 8], strides = [1, 1, 1]} : vector<2x8x32xf32> to vector<2x8x8xf32>
    "tpu.trace_start"() <{level = 10 : i32, message = "bqk,bkd->bqd"}> : () -> ()
    %cst_33 = arith.constant dense<0.000000e+00> : vector<2x8x8xf32>
    %115 = tpu.matmul %113, %114, %cst_33 {dimension_numbers = #tpu.dot_dimension_numbers<[2], [1], [1], [2], [0, 0, 0, 1, 1, 2], [0], [0]>} : vector<2x8x8xf32>, vector<2x8x8xf32>, vector<2x8x8xf32> -> vector<2x8x8xf32>
    "tpu.trace_stop"() : () -> ()
    %116 = vector.extract_strided_slice %66 {offsets = [0, 0, 24], sizes = [2, 8, 8], strides = [1, 1, 1]} : vector<2x8x32xf32> to vector<2x8x8xf32>
    %117 = vector.extract_strided_slice %68 {offsets = [0, 0, 24], sizes = [2, 8, 8], strides = [1, 1, 1]} : vector<2x8x32xf32> to vector<2x8x8xf32>
    "tpu.trace_start"() <{level = 10 : i32, message = "bqd,bkd->bqk"}> : () -> ()
    %cst_34 = arith.constant dense<0.000000e+00> : vector<2x8x8xf32>
    %118 = tpu.matmul %116, %117, %cst_34 {dimension_numbers = #tpu.dot_dimension_numbers<[2], [2], [1], [1], [0, 0, 0, 1, 1, 1], [0], [0]>} : vector<2x8x8xf32>, vector<2x8x8xf32>, vector<2x8x8xf32> -> vector<2x8x8xf32>
    "tpu.trace_stop"() : () -> ()
    %cst_35 = arith.constant dense<0xFF800000> : vector<2x8xf32>
    %119 = vector.multi_reduction <maximumf>, %118, %cst_35 [2] : vector<2x8x8xf32> to vector<2x8xf32>
    %120 = vector.shape_cast %119 : vector<2x8xf32> to vector<2x8x1xf32>
    %121 = vector.broadcast %120 : vector<2x8x1xf32> to vector<2x8x8xf32>
    %122 = arith.subf %118, %121 : vector<2x8x8xf32>
    %123 = math.exp %122 : vector<2x8x8xf32>
    %cst_36 = arith.constant dense<0.000000e+00> : vector<2x8xf32>
    %124 = vector.multi_reduction <add>, %123, %cst_36 [2] : vector<2x8x8xf32> to vector<2x8xf32>
    %125 = vector.shape_cast %124 : vector<2x8xf32> to vector<2x8x1xf32>
    %126 = tpu.reciprocal %125 {approx = true} : vector<2x8x1xf32> -> vector<2x8x1xf32>
    %127 = vector.broadcast %126 : vector<2x8x1xf32> to vector<2x8x8xf32>
    %128 = arith.mulf %123, %127 : vector<2x8x8xf32>
    %129 = vector.extract_strided_slice %70 {offsets = [0, 0, 24], sizes = [2, 8, 8], strides = [1, 1, 1]} : vector<2x8x32xf32> to vector<2x8x8xf32>
    "tpu.trace_start"() <{level = 10 : i32, message = "bqk,bkd->bqd"}> : () -> ()
    %cst_37 = arith.constant dense<0.000000e+00> : vector<2x8x8xf32>
    %130 = tpu.matmul %128, %129, %cst_37 {dimension_numbers = #tpu.dot_dimension_numbers<[2], [1], [1], [2], [0, 0, 0, 1, 1, 2], [0], [0]>} : vector<2x8x8xf32>, vector<2x8x8xf32>, vector<2x8x8xf32> -> vector<2x8x8xf32>
    "tpu.trace_stop"() : () -> ()
    %131 = tpu.concatenate %85, %100, %115, %130 in 2 : vector<2x8x8xf32>, vector<2x8x8xf32>, vector<2x8x8xf32>, vector<2x8x8xf32> -> vector<2x8x32xf32>
    %132 = vector.shape_cast %131 : vector<2x8x32xf32> to vector<16x32xf32>
    %133 = vector.extract_strided_slice %54 {offsets = [0, 0], sizes = [32, 32], strides = [1, 1]} : vector<33x32xf32> to vector<32x32xf32>
    %cst_38 = arith.constant dense<0.000000e+00> : vector<16x32xf32>
    %134 = tpu.matmul %132, %133, %cst_38 {dimension_numbers = #tpu.dot_dimension_numbers<[1], [0], [0], [1], [0, 0, 1, 1], [], []>} : vector<16x32xf32>, vector<32x32xf32>, vector<16x32xf32> -> vector<16x32xf32>
    %135 = vector.extract_strided_slice %54 {offsets = [32, 0], sizes = [1, 32], strides = [1, 1]} : vector<33x32xf32> to vector<1x32xf32>
    %136 = vector.broadcast %135 : vector<1x32xf32> to vector<16x32xf32>
    %137 = arith.addf %134, %136 : vector<16x32xf32>
    %138 = arith.addf %1, %137 : vector<16x32xf32>
    %139 = vector.extract_strided_slice %0 {offsets = [6, 0], sizes = [1, 32], strides = [1, 1]} : vector<10x32xf32> to vector<1x32xf32>
    %140 = vector.extract_strided_slice %0 {offsets = [7, 0], sizes = [1, 32], strides = [1, 1]} : vector<10x32xf32> to vector<1x32xf32>
    %cst_39 = arith.constant dense<0.000000e+00> : vector<16xf32>
    %141 = vector.multi_reduction <add>, %138, %cst_39 [1] : vector<16x32xf32> to vector<16xf32>
    %142 = vector.shape_cast %141 : vector<16xf32> to vector<16x1xf32>
    %cst_40 = arith.constant 3.200000e+01 : f32
    %143 = vector.broadcast %cst_40 : f32 to vector<16x1xf32>
    %144 = arith.divf %142, %143 : vector<16x1xf32>
    %145 = vector.broadcast %144 : vector<16x1xf32> to vector<16x32xf32>
    %146 = arith.subf %138, %145 : vector<16x32xf32>
    %147 = arith.mulf %146, %146 : vector<16x32xf32>
    %cst_41 = arith.constant dense<0.000000e+00> : vector<16xf32>
    %148 = vector.multi_reduction <add>, %147, %cst_41 [1] : vector<16x32xf32> to vector<16xf32>
    %149 = vector.shape_cast %148 : vector<16xf32> to vector<16x1xf32>
    %cst_42 = arith.constant 3.200000e+01 : f32
    %150 = vector.broadcast %cst_42 : f32 to vector<16x1xf32>
    %151 = arith.divf %149, %150 : vector<16x1xf32>
    %152 = vector.broadcast %144 : vector<16x1xf32> to vector<16x32xf32>
    %153 = arith.subf %138, %152 : vector<16x32xf32>
    %cst_43 = arith.constant 9.99999974E-6 : f32
    %154 = vector.broadcast %cst_43 : f32 to vector<16x1xf32>
    %155 = arith.addf %151, %154 : vector<16x1xf32>
    %156 = math.rsqrt %155 : vector<16x1xf32>
    %157 = vector.broadcast %156 : vector<16x1xf32> to vector<16x32xf32>
    %158 = arith.mulf %153, %157 : vector<16x32xf32>
    %159 = vector.broadcast %139 : vector<1x32xf32> to vector<16x32xf32>
    %160 = arith.mulf %158, %159 : vector<16x32xf32>
    %161 = vector.broadcast %140 : vector<1x32xf32> to vector<16x32xf32>
    %162 = arith.addf %160, %161 : vector<16x32xf32>
    %163 = vector.extract_strided_slice %0 {offsets = [2, 0], sizes = [1, 32], strides = [1, 1]} : vector<10x32xf32> to vector<1x32xf32>
    %164 = vector.extract_strided_slice %0 {offsets = [3, 0], sizes = [1, 32], strides = [1, 1]} : vector<10x32xf32> to vector<1x32xf32>
    %cst_44 = arith.constant dense<0.000000e+00> : vector<16xf32>
    %165 = vector.multi_reduction <add>, %2, %cst_44 [1] : vector<16x32xf32> to vector<16xf32>
    %166 = vector.shape_cast %165 : vector<16xf32> to vector<16x1xf32>
    %cst_45 = arith.constant 3.200000e+01 : f32
    %167 = vector.broadcast %cst_45 : f32 to vector<16x1xf32>
    %168 = arith.divf %166, %167 : vector<16x1xf32>
    %169 = vector.broadcast %168 : vector<16x1xf32> to vector<16x32xf32>
    %170 = arith.subf %2, %169 : vector<16x32xf32>
    %171 = arith.mulf %170, %170 : vector<16x32xf32>
    %cst_46 = arith.constant dense<0.000000e+00> : vector<16xf32>
    %172 = vector.multi_reduction <add>, %171, %cst_46 [1] : vector<16x32xf32> to vector<16xf32>
    %173 = vector.shape_cast %172 : vector<16xf32> to vector<16x1xf32>
    %cst_47 = arith.constant 3.200000e+01 : f32
    %174 = vector.broadcast %cst_47 : f32 to vector<16x1xf32>
    %175 = arith.divf %173, %174 : vector<16x1xf32>
    %176 = vector.broadcast %168 : vector<16x1xf32> to vector<16x32xf32>
    %177 = arith.subf %2, %176 : vector<16x32xf32>
    %cst_48 = arith.constant 9.99999974E-6 : f32
    %178 = vector.broadcast %cst_48 : f32 to vector<16x1xf32>
    %179 = arith.addf %175, %178 : vector<16x1xf32>
    %180 = math.rsqrt %179 : vector<16x1xf32>
    %181 = vector.broadcast %180 : vector<16x1xf32> to vector<16x32xf32>
    %182 = arith.mulf %177, %181 : vector<16x32xf32>
    %183 = vector.broadcast %163 : vector<1x32xf32> to vector<16x32xf32>
    %184 = arith.mulf %182, %183 : vector<16x32xf32>
    %185 = vector.broadcast %164 : vector<1x32xf32> to vector<16x32xf32>
    %186 = arith.addf %184, %185 : vector<16x32xf32>
    %187 = vector.extract_strided_slice %0 {offsets = [2, 0], sizes = [1, 32], strides = [1, 1]} : vector<10x32xf32> to vector<1x32xf32>
    %188 = vector.extract_strided_slice %0 {offsets = [3, 0], sizes = [1, 32], strides = [1, 1]} : vector<10x32xf32> to vector<1x32xf32>
    %cst_49 = arith.constant dense<0.000000e+00> : vector<16xf32>
    %189 = vector.multi_reduction <add>, %1, %cst_49 [1] : vector<16x32xf32> to vector<16xf32>
    %190 = vector.shape_cast %189 : vector<16xf32> to vector<16x1xf32>
    %cst_50 = arith.constant 3.200000e+01 : f32
    %191 = vector.broadcast %cst_50 : f32 to vector<16x1xf32>
    %192 = arith.divf %190, %191 : vector<16x1xf32>
    %193 = vector.broadcast %192 : vector<16x1xf32> to vector<16x32xf32>
    %194 = arith.subf %1, %193 : vector<16x32xf32>
    %195 = arith.mulf %194, %194 : vector<16x32xf32>
    %cst_51 = arith.constant dense<0.000000e+00> : vector<16xf32>
    %196 = vector.multi_reduction <add>, %195, %cst_51 [1] : vector<16x32xf32> to vector<16xf32>
    %197 = vector.shape_cast %196 : vector<16xf32> to vector<16x1xf32>
    %cst_52 = arith.constant 3.200000e+01 : f32
    %198 = vector.broadcast %cst_52 : f32 to vector<16x1xf32>
    %199 = arith.divf %197, %198 : vector<16x1xf32>
    %200 = vector.broadcast %192 : vector<16x1xf32> to vector<16x32xf32>
    %201 = arith.subf %1, %200 : vector<16x32xf32>
    %cst_53 = arith.constant 9.99999974E-6 : f32
    %202 = vector.broadcast %cst_53 : f32 to vector<16x1xf32>
    %203 = arith.addf %199, %202 : vector<16x1xf32>
    %204 = math.rsqrt %203 : vector<16x1xf32>
    %205 = vector.broadcast %204 : vector<16x1xf32> to vector<16x32xf32>
    %206 = arith.mulf %201, %205 : vector<16x32xf32>
    %207 = vector.broadcast %187 : vector<1x32xf32> to vector<16x32xf32>
    %208 = arith.mulf %206, %207 : vector<16x32xf32>
    %209 = vector.broadcast %188 : vector<1x32xf32> to vector<16x32xf32>
    %210 = arith.addf %208, %209 : vector<16x32xf32>
    %c1 = arith.constant 1 : index
    %c0_54 = arith.constant 0 : index
    %c0_55 = arith.constant 0 : index
    %211 = vector.load %arg2[%c1, %c0_54, %c0_55] : memref<3x33x96xf32, #tpu.memory_space<vmem>>, vector<1x33x96xf32>
    %212 = vector.shape_cast %211 : vector<1x33x96xf32> to vector<33x96xf32>
    %c1_56 = arith.constant 1 : index
    %c0_57 = arith.constant 0 : index
    %c0_58 = arith.constant 0 : index
    %213 = vector.load %arg3[%c1_56, %c0_57, %c0_58] : memref<3x33x32xf32, #tpu.memory_space<vmem>>, vector<1x33x32xf32>
    %214 = vector.shape_cast %213 : vector<1x33x32xf32> to vector<33x32xf32>
    %215 = vector.extract_strided_slice %212 {offsets = [0, 0], sizes = [32, 96], strides = [1, 1]} : vector<33x96xf32> to vector<32x96xf32>
    %216 = vector.extract_strided_slice %212 {offsets = [32, 0], sizes = [1, 96], strides = [1, 1]} : vector<33x96xf32> to vector<1x96xf32>
    %217 = tpu.concatenate %186, %210 in 0 : vector<16x32xf32>, vector<16x32xf32> -> vector<32x32xf32>
    %cst_59 = arith.constant dense<0.000000e+00> : vector<32x96xf32>
    %218 = tpu.matmul %217, %215, %cst_59 {dimension_numbers = #tpu.dot_dimension_numbers<[1], [0], [0], [1], [0, 0, 1, 1], [], []>} : vector<32x32xf32>, vector<32x96xf32>, vector<32x96xf32> -> vector<32x96xf32>
    %219 = vector.broadcast %216 : vector<1x96xf32> to vector<32x96xf32>
    %220 = arith.addf %218, %219 : vector<32x96xf32>
    %221 = vector.extract_strided_slice %220 {offsets = [0, 0], sizes = [16, 96], strides = [1, 1]} : vector<32x96xf32> to vector<16x96xf32>
    %222 = vector.extract_strided_slice %220 {offsets = [16, 0], sizes = [16, 96], strides = [1, 1]} : vector<32x96xf32> to vector<16x96xf32>
    %223 = vector.extract_strided_slice %221 {offsets = [0, 0], sizes = [16, 32], strides = [1, 1]} : vector<16x96xf32> to vector<16x32xf32>
    %cst_60 = arith.constant 0.353553385 : f32
    %224 = vector.broadcast %cst_60 : f32 to vector<16x32xf32>
    %225 = arith.mulf %223, %224 : vector<16x32xf32>
    %226 = vector.shape_cast %225 : vector<16x32xf32> to vector<2x8x32xf32>
    %227 = vector.extract_strided_slice %222 {offsets = [0, 32], sizes = [16, 32], strides = [1, 1]} : vector<16x96xf32> to vector<16x32xf32>
    %228 = vector.shape_cast %227 : vector<16x32xf32> to vector<2x8x32xf32>
    %229 = vector.extract_strided_slice %222 {offsets = [0, 64], sizes = [16, 32], strides = [1, 1]} : vector<16x96xf32> to vector<16x32xf32>
    %230 = vector.shape_cast %229 : vector<16x32xf32> to vector<2x8x32xf32>
    %231 = vector.extract_strided_slice %226 {offsets = [0, 0, 0], sizes = [2, 8, 8], strides = [1, 1, 1]} : vector<2x8x32xf32> to vector<2x8x8xf32>
    %232 = vector.extract_strided_slice %228 {offsets = [0, 0, 0], sizes = [2, 8, 8], strides = [1, 1, 1]} : vector<2x8x32xf32> to vector<2x8x8xf32>
    "tpu.trace_start"() <{level = 10 : i32, message = "bqd,bkd->bqk"}> : () -> ()
    %cst_61 = arith.constant dense<0.000000e+00> : vector<2x8x8xf32>
    %233 = tpu.matmul %231, %232, %cst_61 {dimension_numbers = #tpu.dot_dimension_numbers<[2], [2], [1], [1], [0, 0, 0, 1, 1, 1], [0], [0]>} : vector<2x8x8xf32>, vector<2x8x8xf32>, vector<2x8x8xf32> -> vector<2x8x8xf32>
    "tpu.trace_stop"() : () -> ()
    %cst_62 = arith.constant dense<0xFF800000> : vector<2x8xf32>
    %234 = vector.multi_reduction <maximumf>, %233, %cst_62 [2] : vector<2x8x8xf32> to vector<2x8xf32>
    %235 = vector.shape_cast %234 : vector<2x8xf32> to vector<2x8x1xf32>
    %236 = vector.broadcast %235 : vector<2x8x1xf32> to vector<2x8x8xf32>
    %237 = arith.subf %233, %236 : vector<2x8x8xf32>
    %238 = math.exp %237 : vector<2x8x8xf32>
    %cst_63 = arith.constant dense<0.000000e+00> : vector<2x8xf32>
    %239 = vector.multi_reduction <add>, %238, %cst_63 [2] : vector<2x8x8xf32> to vector<2x8xf32>
    %240 = vector.shape_cast %239 : vector<2x8xf32> to vector<2x8x1xf32>
    %241 = tpu.reciprocal %240 {approx = true} : vector<2x8x1xf32> -> vector<2x8x1xf32>
    %242 = vector.broadcast %241 : vector<2x8x1xf32> to vector<2x8x8xf32>
    %243 = arith.mulf %238, %242 : vector<2x8x8xf32>
    %244 = vector.extract_strided_slice %230 {offsets = [0, 0, 0], sizes = [2, 8, 8], strides = [1, 1, 1]} : vector<2x8x32xf32> to vector<2x8x8xf32>
    "tpu.trace_start"() <{level = 10 : i32, message = "bqk,bkd->bqd"}> : () -> ()
    %cst_64 = arith.constant dense<0.000000e+00> : vector<2x8x8xf32>
    %245 = tpu.matmul %243, %244, %cst_64 {dimension_numbers = #tpu.dot_dimension_numbers<[2], [1], [1], [2], [0, 0, 0, 1, 1, 2], [0], [0]>} : vector<2x8x8xf32>, vector<2x8x8xf32>, vector<2x8x8xf32> -> vector<2x8x8xf32>
    "tpu.trace_stop"() : () -> ()
    %246 = vector.extract_strided_slice %226 {offsets = [0, 0, 8], sizes = [2, 8, 8], strides = [1, 1, 1]} : vector<2x8x32xf32> to vector<2x8x8xf32>
    %247 = vector.extract_strided_slice %228 {offsets = [0, 0, 8], sizes = [2, 8, 8], strides = [1, 1, 1]} : vector<2x8x32xf32> to vector<2x8x8xf32>
    "tpu.trace_start"() <{level = 10 : i32, message = "bqd,bkd->bqk"}> : () -> ()
    %cst_65 = arith.constant dense<0.000000e+00> : vector<2x8x8xf32>
    %248 = tpu.matmul %246, %247, %cst_65 {dimension_numbers = #tpu.dot_dimension_numbers<[2], [2], [1], [1], [0, 0, 0, 1, 1, 1], [0], [0]>} : vector<2x8x8xf32>, vector<2x8x8xf32>, vector<2x8x8xf32> -> vector<2x8x8xf32>
    "tpu.trace_stop"() : () -> ()
    %cst_66 = arith.constant dense<0xFF800000> : vector<2x8xf32>
    %249 = vector.multi_reduction <maximumf>, %248, %cst_66 [2] : vector<2x8x8xf32> to vector<2x8xf32>
    %250 = vector.shape_cast %249 : vector<2x8xf32> to vector<2x8x1xf32>
    %251 = vector.broadcast %250 : vector<2x8x1xf32> to vector<2x8x8xf32>
    %252 = arith.subf %248, %251 : vector<2x8x8xf32>
    %253 = math.exp %252 : vector<2x8x8xf32>
    %cst_67 = arith.constant dense<0.000000e+00> : vector<2x8xf32>
    %254 = vector.multi_reduction <add>, %253, %cst_67 [2] : vector<2x8x8xf32> to vector<2x8xf32>
    %255 = vector.shape_cast %254 : vector<2x8xf32> to vector<2x8x1xf32>
    %256 = tpu.reciprocal %255 {approx = true} : vector<2x8x1xf32> -> vector<2x8x1xf32>
    %257 = vector.broadcast %256 : vector<2x8x1xf32> to vector<2x8x8xf32>
    %258 = arith.mulf %253, %257 : vector<2x8x8xf32>
    %259 = vector.extract_strided_slice %230 {offsets = [0, 0, 8], sizes = [2, 8, 8], strides = [1, 1, 1]} : vector<2x8x32xf32> to vector<2x8x8xf32>
    "tpu.trace_start"() <{level = 10 : i32, message = "bqk,bkd->bqd"}> : () -> ()
    %cst_68 = arith.constant dense<0.000000e+00> : vector<2x8x8xf32>
    %260 = tpu.matmul %258, %259, %cst_68 {dimension_numbers = #tpu.dot_dimension_numbers<[2], [1], [1], [2], [0, 0, 0, 1, 1, 2], [0], [0]>} : vector<2x8x8xf32>, vector<2x8x8xf32>, vector<2x8x8xf32> -> vector<2x8x8xf32>
    "tpu.trace_stop"() : () -> ()
    %261 = vector.extract_strided_slice %226 {offsets = [0, 0, 16], sizes = [2, 8, 8], strides = [1, 1, 1]} : vector<2x8x32xf32> to vector<2x8x8xf32>
    %262 = vector.extract_strided_slice %228 {offsets = [0, 0, 16], sizes = [2, 8, 8], strides = [1, 1, 1]} : vector<2x8x32xf32> to vector<2x8x8xf32>
    "tpu.trace_start"() <{level = 10 : i32, message = "bqd,bkd->bqk"}> : () -> ()
    %cst_69 = arith.constant dense<0.000000e+00> : vector<2x8x8xf32>
    %263 = tpu.matmul %261, %262, %cst_69 {dimension_numbers = #tpu.dot_dimension_numbers<[2], [2], [1], [1], [0, 0, 0, 1, 1, 1], [0], [0]>} : vector<2x8x8xf32>, vector<2x8x8xf32>, vector<2x8x8xf32> -> vector<2x8x8xf32>
    "tpu.trace_stop"() : () -> ()
    %cst_70 = arith.constant dense<0xFF800000> : vector<2x8xf32>
    %264 = vector.multi_reduction <maximumf>, %263, %cst_70 [2] : vector<2x8x8xf32> to vector<2x8xf32>
    %265 = vector.shape_cast %264 : vector<2x8xf32> to vector<2x8x1xf32>
    %266 = vector.broadcast %265 : vector<2x8x1xf32> to vector<2x8x8xf32>
    %267 = arith.subf %263, %266 : vector<2x8x8xf32>
    %268 = math.exp %267 : vector<2x8x8xf32>
    %cst_71 = arith.constant dense<0.000000e+00> : vector<2x8xf32>
    %269 = vector.multi_reduction <add>, %268, %cst_71 [2] : vector<2x8x8xf32> to vector<2x8xf32>
    %270 = vector.shape_cast %269 : vector<2x8xf32> to vector<2x8x1xf32>
    %271 = tpu.reciprocal %270 {approx = true} : vector<2x8x1xf32> -> vector<2x8x1xf32>
    %272 = vector.broadcast %271 : vector<2x8x1xf32> to vector<2x8x8xf32>
    %273 = arith.mulf %268, %272 : vector<2x8x8xf32>
    %274 = vector.extract_strided_slice %230 {offsets = [0, 0, 16], sizes = [2, 8, 8], strides = [1, 1, 1]} : vector<2x8x32xf32> to vector<2x8x8xf32>
    "tpu.trace_start"() <{level = 10 : i32, message = "bqk,bkd->bqd"}> : () -> ()
    %cst_72 = arith.constant dense<0.000000e+00> : vector<2x8x8xf32>
    %275 = tpu.matmul %273, %274, %cst_72 {dimension_numbers = #tpu.dot_dimension_numbers<[2], [1], [1], [2], [0, 0, 0, 1, 1, 2], [0], [0]>} : vector<2x8x8xf32>, vector<2x8x8xf32>, vector<2x8x8xf32> -> vector<2x8x8xf32>
    "tpu.trace_stop"() : () -> ()
    %276 = vector.extract_strided_slice %226 {offsets = [0, 0, 24], sizes = [2, 8, 8], strides = [1, 1, 1]} : vector<2x8x32xf32> to vector<2x8x8xf32>
    %277 = vector.extract_strided_slice %228 {offsets = [0, 0, 24], sizes = [2, 8, 8], strides = [1, 1, 1]} : vector<2x8x32xf32> to vector<2x8x8xf32>
    "tpu.trace_start"() <{level = 10 : i32, message = "bqd,bkd->bqk"}> : () -> ()
    %cst_73 = arith.constant dense<0.000000e+00> : vector<2x8x8xf32>
    %278 = tpu.matmul %276, %277, %cst_73 {dimension_numbers = #tpu.dot_dimension_numbers<[2], [2], [1], [1], [0, 0, 0, 1, 1, 1], [0], [0]>} : vector<2x8x8xf32>, vector<2x8x8xf32>, vector<2x8x8xf32> -> vector<2x8x8xf32>
    "tpu.trace_stop"() : () -> ()
    %cst_74 = arith.constant dense<0xFF800000> : vector<2x8xf32>
    %279 = vector.multi_reduction <maximumf>, %278, %cst_74 [2] : vector<2x8x8xf32> to vector<2x8xf32>
    %280 = vector.shape_cast %279 : vector<2x8xf32> to vector<2x8x1xf32>
    %281 = vector.broadcast %280 : vector<2x8x1xf32> to vector<2x8x8xf32>
    %282 = arith.subf %278, %281 : vector<2x8x8xf32>
    %283 = math.exp %282 : vector<2x8x8xf32>
    %cst_75 = arith.constant dense<0.000000e+00> : vector<2x8xf32>
    %284 = vector.multi_reduction <add>, %283, %cst_75 [2] : vector<2x8x8xf32> to vector<2x8xf32>
    %285 = vector.shape_cast %284 : vector<2x8xf32> to vector<2x8x1xf32>
    %286 = tpu.reciprocal %285 {approx = true} : vector<2x8x1xf32> -> vector<2x8x1xf32>
    %287 = vector.broadcast %286 : vector<2x8x1xf32> to vector<2x8x8xf32>
    %288 = arith.mulf %283, %287 : vector<2x8x8xf32>
    %289 = vector.extract_strided_slice %230 {offsets = [0, 0, 24], sizes = [2, 8, 8], strides = [1, 1, 1]} : vector<2x8x32xf32> to vector<2x8x8xf32>
    "tpu.trace_start"() <{level = 10 : i32, message = "bqk,bkd->bqd"}> : () -> ()
    %cst_76 = arith.constant dense<0.000000e+00> : vector<2x8x8xf32>
    %290 = tpu.matmul %288, %289, %cst_76 {dimension_numbers = #tpu.dot_dimension_numbers<[2], [1], [1], [2], [0, 0, 0, 1, 1, 2], [0], [0]>} : vector<2x8x8xf32>, vector<2x8x8xf32>, vector<2x8x8xf32> -> vector<2x8x8xf32>
    "tpu.trace_stop"() : () -> ()
    %291 = tpu.concatenate %245, %260, %275, %290 in 2 : vector<2x8x8xf32>, vector<2x8x8xf32>, vector<2x8x8xf32>, vector<2x8x8xf32> -> vector<2x8x32xf32>
    %292 = vector.shape_cast %291 : vector<2x8x32xf32> to vector<16x32xf32>
    %293 = vector.extract_strided_slice %214 {offsets = [0, 0], sizes = [32, 32], strides = [1, 1]} : vector<33x32xf32> to vector<32x32xf32>
    %cst_77 = arith.constant dense<0.000000e+00> : vector<16x32xf32>
    %294 = tpu.matmul %292, %293, %cst_77 {dimension_numbers = #tpu.dot_dimension_numbers<[1], [0], [0], [1], [0, 0, 1, 1], [], []>} : vector<16x32xf32>, vector<32x32xf32>, vector<16x32xf32> -> vector<16x32xf32>
    %295 = vector.extract_strided_slice %214 {offsets = [32, 0], sizes = [1, 32], strides = [1, 1]} : vector<33x32xf32> to vector<1x32xf32>
    %296 = vector.broadcast %295 : vector<1x32xf32> to vector<16x32xf32>
    %297 = arith.addf %294, %296 : vector<16x32xf32>
    %298 = arith.addf %2, %297 : vector<16x32xf32>
    %299 = vector.extract_strided_slice %0 {offsets = [6, 0], sizes = [1, 32], strides = [1, 1]} : vector<10x32xf32> to vector<1x32xf32>
    %300 = vector.extract_strided_slice %0 {offsets = [7, 0], sizes = [1, 32], strides = [1, 1]} : vector<10x32xf32> to vector<1x32xf32>
    %cst_78 = arith.constant dense<0.000000e+00> : vector<16xf32>
    %301 = vector.multi_reduction <add>, %298, %cst_78 [1] : vector<16x32xf32> to vector<16xf32>
    %302 = vector.shape_cast %301 : vector<16xf32> to vector<16x1xf32>
    %cst_79 = arith.constant 3.200000e+01 : f32
    %303 = vector.broadcast %cst_79 : f32 to vector<16x1xf32>
    %304 = arith.divf %302, %303 : vector<16x1xf32>
    %305 = vector.broadcast %304 : vector<16x1xf32> to vector<16x32xf32>
    %306 = arith.subf %298, %305 : vector<16x32xf32>
    %307 = arith.mulf %306, %306 : vector<16x32xf32>
    %cst_80 = arith.constant dense<0.000000e+00> : vector<16xf32>
    %308 = vector.multi_reduction <add>, %307, %cst_80 [1] : vector<16x32xf32> to vector<16xf32>
    %309 = vector.shape_cast %308 : vector<16xf32> to vector<16x1xf32>
    %cst_81 = arith.constant 3.200000e+01 : f32
    %310 = vector.broadcast %cst_81 : f32 to vector<16x1xf32>
    %311 = arith.divf %309, %310 : vector<16x1xf32>
    %312 = vector.broadcast %304 : vector<16x1xf32> to vector<16x32xf32>
    %313 = arith.subf %298, %312 : vector<16x32xf32>
    %cst_82 = arith.constant 9.99999974E-6 : f32
    %314 = vector.broadcast %cst_82 : f32 to vector<16x1xf32>
    %315 = arith.addf %311, %314 : vector<16x1xf32>
    %316 = math.rsqrt %315 : vector<16x1xf32>
    %317 = vector.broadcast %316 : vector<16x1xf32> to vector<16x32xf32>
    %318 = arith.mulf %313, %317 : vector<16x32xf32>
    %319 = vector.broadcast %299 : vector<1x32xf32> to vector<16x32xf32>
    %320 = arith.mulf %318, %319 : vector<16x32xf32>
    %321 = vector.broadcast %300 : vector<1x32xf32> to vector<16x32xf32>
    %322 = arith.addf %320, %321 : vector<16x32xf32>
    %323 = vector.shape_cast %162 : vector<16x32xf32> to vector<2x8x32xf32>
    %324 = vector.shape_cast %322 : vector<16x32xf32> to vector<2x8x32xf32>
    %325 = tpu.concatenate %323, %324 in 1 : vector<2x8x32xf32>, vector<2x8x32xf32> -> vector<2x16x32xf32>
    %326 = vector.shape_cast %325 : vector<2x16x32xf32> to vector<32x32xf32>
    %327 = vector.extract_strided_slice %0 {offsets = [4, 0], sizes = [1, 32], strides = [1, 1]} : vector<10x32xf32> to vector<1x32xf32>
    %328 = vector.extract_strided_slice %0 {offsets = [5, 0], sizes = [1, 32], strides = [1, 1]} : vector<10x32xf32> to vector<1x32xf32>
    %cst_83 = arith.constant dense<0.000000e+00> : vector<32xf32>
    %329 = vector.multi_reduction <add>, %326, %cst_83 [1] : vector<32x32xf32> to vector<32xf32>
    %330 = vector.shape_cast %329 : vector<32xf32> to vector<32x1xf32>
    %cst_84 = arith.constant 3.200000e+01 : f32
    %331 = vector.broadcast %cst_84 : f32 to vector<32x1xf32>
    %332 = arith.divf %330, %331 : vector<32x1xf32>
    %333 = vector.broadcast %332 : vector<32x1xf32> to vector<32x32xf32>
    %334 = arith.subf %326, %333 : vector<32x32xf32>
    %335 = arith.mulf %334, %334 : vector<32x32xf32>
    %cst_85 = arith.constant dense<0.000000e+00> : vector<32xf32>
    %336 = vector.multi_reduction <add>, %335, %cst_85 [1] : vector<32x32xf32> to vector<32xf32>
    %337 = vector.shape_cast %336 : vector<32xf32> to vector<32x1xf32>
    %cst_86 = arith.constant 3.200000e+01 : f32
    %338 = vector.broadcast %cst_86 : f32 to vector<32x1xf32>
    %339 = arith.divf %337, %338 : vector<32x1xf32>
    %340 = vector.broadcast %332 : vector<32x1xf32> to vector<32x32xf32>
    %341 = arith.subf %326, %340 : vector<32x32xf32>
    %cst_87 = arith.constant 9.99999974E-6 : f32
    %342 = vector.broadcast %cst_87 : f32 to vector<32x1xf32>
    %343 = arith.addf %339, %342 : vector<32x1xf32>
    %344 = math.rsqrt %343 : vector<32x1xf32>
    %345 = vector.broadcast %344 : vector<32x1xf32> to vector<32x32xf32>
    %346 = arith.mulf %341, %345 : vector<32x32xf32>
    %347 = vector.broadcast %327 : vector<1x32xf32> to vector<32x32xf32>
    %348 = arith.mulf %346, %347 : vector<32x32xf32>
    %349 = vector.broadcast %328 : vector<1x32xf32> to vector<32x32xf32>
    %350 = arith.addf %348, %349 : vector<32x32xf32>
    %c2 = arith.constant 2 : index
    %c0_88 = arith.constant 0 : index
    %c0_89 = arith.constant 0 : index
    %351 = vector.load %arg2[%c2, %c0_88, %c0_89] : memref<3x33x96xf32, #tpu.memory_space<vmem>>, vector<1x33x96xf32>
    %352 = vector.shape_cast %351 : vector<1x33x96xf32> to vector<33x96xf32>
    %c2_90 = arith.constant 2 : index
    %c0_91 = arith.constant 0 : index
    %c0_92 = arith.constant 0 : index
    %353 = vector.load %arg3[%c2_90, %c0_91, %c0_92] : memref<3x33x32xf32, #tpu.memory_space<vmem>>, vector<1x33x32xf32>
    %354 = vector.shape_cast %353 : vector<1x33x32xf32> to vector<33x32xf32>
    %355 = vector.extract_strided_slice %352 {offsets = [0, 0], sizes = [32, 96], strides = [1, 1]} : vector<33x96xf32> to vector<32x96xf32>
    %356 = vector.extract_strided_slice %352 {offsets = [32, 0], sizes = [1, 96], strides = [1, 1]} : vector<33x96xf32> to vector<1x96xf32>
    %cst_93 = arith.constant dense<0.000000e+00> : vector<32x96xf32>
    %357 = tpu.matmul %350, %355, %cst_93 {dimension_numbers = #tpu.dot_dimension_numbers<[1], [0], [0], [1], [0, 0, 1, 1], [], []>} : vector<32x32xf32>, vector<32x96xf32>, vector<32x96xf32> -> vector<32x96xf32>
    %358 = vector.broadcast %356 : vector<1x96xf32> to vector<32x96xf32>
    %359 = arith.addf %357, %358 : vector<32x96xf32>
    %360 = vector.extract_strided_slice %359 {offsets = [0, 0], sizes = [32, 32], strides = [1, 1]} : vector<32x96xf32> to vector<32x32xf32>
    %cst_94 = arith.constant 0.353553385 : f32
    %361 = vector.broadcast %cst_94 : f32 to vector<32x32xf32>
    %362 = arith.mulf %360, %361 : vector<32x32xf32>
    %363 = vector.shape_cast %362 : vector<32x32xf32> to vector<2x16x32xf32>
    %364 = vector.extract_strided_slice %359 {offsets = [0, 32], sizes = [32, 32], strides = [1, 1]} : vector<32x96xf32> to vector<32x32xf32>
    %365 = vector.shape_cast %364 : vector<32x32xf32> to vector<2x16x32xf32>
    %366 = vector.extract_strided_slice %359 {offsets = [0, 64], sizes = [32, 32], strides = [1, 1]} : vector<32x96xf32> to vector<32x32xf32>
    %367 = vector.shape_cast %366 : vector<32x32xf32> to vector<2x16x32xf32>
    %368 = vector.extract_strided_slice %363 {offsets = [0, 0, 0], sizes = [2, 16, 8], strides = [1, 1, 1]} : vector<2x16x32xf32> to vector<2x16x8xf32>
    %369 = vector.extract_strided_slice %365 {offsets = [0, 0, 0], sizes = [2, 16, 8], strides = [1, 1, 1]} : vector<2x16x32xf32> to vector<2x16x8xf32>
    "tpu.trace_start"() <{level = 10 : i32, message = "bqd,bkd->bqk"}> : () -> ()
    %cst_95 = arith.constant dense<0.000000e+00> : vector<2x16x16xf32>
    %370 = tpu.matmul %368, %369, %cst_95 {dimension_numbers = #tpu.dot_dimension_numbers<[2], [2], [1], [1], [0, 0, 0, 1, 1, 1], [0], [0]>} : vector<2x16x8xf32>, vector<2x16x8xf32>, vector<2x16x16xf32> -> vector<2x16x16xf32>
    "tpu.trace_stop"() : () -> ()
    %cst_96 = arith.constant dense<0xFF800000> : vector<2x16xf32>
    %371 = vector.multi_reduction <maximumf>, %370, %cst_96 [2] : vector<2x16x16xf32> to vector<2x16xf32>
    %372 = vector.shape_cast %371 : vector<2x16xf32> to vector<2x16x1xf32>
    %373 = vector.broadcast %372 : vector<2x16x1xf32> to vector<2x16x16xf32>
    %374 = arith.subf %370, %373 : vector<2x16x16xf32>
    %375 = math.exp %374 : vector<2x16x16xf32>
    %cst_97 = arith.constant dense<0.000000e+00> : vector<2x16xf32>
    %376 = vector.multi_reduction <add>, %375, %cst_97 [2] : vector<2x16x16xf32> to vector<2x16xf32>
    %377 = vector.shape_cast %376 : vector<2x16xf32> to vector<2x16x1xf32>
    %378 = tpu.reciprocal %377 {approx = true} : vector<2x16x1xf32> -> vector<2x16x1xf32>
    %379 = vector.broadcast %378 : vector<2x16x1xf32> to vector<2x16x16xf32>
    %380 = arith.mulf %375, %379 : vector<2x16x16xf32>
    %381 = vector.extract_strided_slice %367 {offsets = [0, 0, 0], sizes = [2, 16, 8], strides = [1, 1, 1]} : vector<2x16x32xf32> to vector<2x16x8xf32>
    "tpu.trace_start"() <{level = 10 : i32, message = "bqk,bkd->bqd"}> : () -> ()
    %cst_98 = arith.constant dense<0.000000e+00> : vector<2x16x8xf32>
    %382 = tpu.matmul %380, %381, %cst_98 {dimension_numbers = #tpu.dot_dimension_numbers<[2], [1], [1], [2], [0, 0, 0, 1, 1, 2], [0], [0]>} : vector<2x16x16xf32>, vector<2x16x8xf32>, vector<2x16x8xf32> -> vector<2x16x8xf32>
    "tpu.trace_stop"() : () -> ()
    %383 = vector.extract_strided_slice %363 {offsets = [0, 0, 8], sizes = [2, 16, 8], strides = [1, 1, 1]} : vector<2x16x32xf32> to vector<2x16x8xf32>
    %384 = vector.extract_strided_slice %365 {offsets = [0, 0, 8], sizes = [2, 16, 8], strides = [1, 1, 1]} : vector<2x16x32xf32> to vector<2x16x8xf32>
    "tpu.trace_start"() <{level = 10 : i32, message = "bqd,bkd->bqk"}> : () -> ()
    %cst_99 = arith.constant dense<0.000000e+00> : vector<2x16x16xf32>
    %385 = tpu.matmul %383, %384, %cst_99 {dimension_numbers = #tpu.dot_dimension_numbers<[2], [2], [1], [1], [0, 0, 0, 1, 1, 1], [0], [0]>} : vector<2x16x8xf32>, vector<2x16x8xf32>, vector<2x16x16xf32> -> vector<2x16x16xf32>
    "tpu.trace_stop"() : () -> ()
    %cst_100 = arith.constant dense<0xFF800000> : vector<2x16xf32>
    %386 = vector.multi_reduction <maximumf>, %385, %cst_100 [2] : vector<2x16x16xf32> to vector<2x16xf32>
    %387 = vector.shape_cast %386 : vector<2x16xf32> to vector<2x16x1xf32>
    %388 = vector.broadcast %387 : vector<2x16x1xf32> to vector<2x16x16xf32>
    %389 = arith.subf %385, %388 : vector<2x16x16xf32>
    %390 = math.exp %389 : vector<2x16x16xf32>
    %cst_101 = arith.constant dense<0.000000e+00> : vector<2x16xf32>
    %391 = vector.multi_reduction <add>, %390, %cst_101 [2] : vector<2x16x16xf32> to vector<2x16xf32>
    %392 = vector.shape_cast %391 : vector<2x16xf32> to vector<2x16x1xf32>
    %393 = tpu.reciprocal %392 {approx = true} : vector<2x16x1xf32> -> vector<2x16x1xf32>
    %394 = vector.broadcast %393 : vector<2x16x1xf32> to vector<2x16x16xf32>
    %395 = arith.mulf %390, %394 : vector<2x16x16xf32>
    %396 = vector.extract_strided_slice %367 {offsets = [0, 0, 8], sizes = [2, 16, 8], strides = [1, 1, 1]} : vector<2x16x32xf32> to vector<2x16x8xf32>
    "tpu.trace_start"() <{level = 10 : i32, message = "bqk,bkd->bqd"}> : () -> ()
    %cst_102 = arith.constant dense<0.000000e+00> : vector<2x16x8xf32>
    %397 = tpu.matmul %395, %396, %cst_102 {dimension_numbers = #tpu.dot_dimension_numbers<[2], [1], [1], [2], [0, 0, 0, 1, 1, 2], [0], [0]>} : vector<2x16x16xf32>, vector<2x16x8xf32>, vector<2x16x8xf32> -> vector<2x16x8xf32>
    "tpu.trace_stop"() : () -> ()
    %398 = vector.extract_strided_slice %363 {offsets = [0, 0, 16], sizes = [2, 16, 8], strides = [1, 1, 1]} : vector<2x16x32xf32> to vector<2x16x8xf32>
    %399 = vector.extract_strided_slice %365 {offsets = [0, 0, 16], sizes = [2, 16, 8], strides = [1, 1, 1]} : vector<2x16x32xf32> to vector<2x16x8xf32>
    "tpu.trace_start"() <{level = 10 : i32, message = "bqd,bkd->bqk"}> : () -> ()
    %cst_103 = arith.constant dense<0.000000e+00> : vector<2x16x16xf32>
    %400 = tpu.matmul %398, %399, %cst_103 {dimension_numbers = #tpu.dot_dimension_numbers<[2], [2], [1], [1], [0, 0, 0, 1, 1, 1], [0], [0]>} : vector<2x16x8xf32>, vector<2x16x8xf32>, vector<2x16x16xf32> -> vector<2x16x16xf32>
    "tpu.trace_stop"() : () -> ()
    %cst_104 = arith.constant dense<0xFF800000> : vector<2x16xf32>
    %401 = vector.multi_reduction <maximumf>, %400, %cst_104 [2] : vector<2x16x16xf32> to vector<2x16xf32>
    %402 = vector.shape_cast %401 : vector<2x16xf32> to vector<2x16x1xf32>
    %403 = vector.broadcast %402 : vector<2x16x1xf32> to vector<2x16x16xf32>
    %404 = arith.subf %400, %403 : vector<2x16x16xf32>
    %405 = math.exp %404 : vector<2x16x16xf32>
    %cst_105 = arith.constant dense<0.000000e+00> : vector<2x16xf32>
    %406 = vector.multi_reduction <add>, %405, %cst_105 [2] : vector<2x16x16xf32> to vector<2x16xf32>
    %407 = vector.shape_cast %406 : vector<2x16xf32> to vector<2x16x1xf32>
    %408 = tpu.reciprocal %407 {approx = true} : vector<2x16x1xf32> -> vector<2x16x1xf32>
    %409 = vector.broadcast %408 : vector<2x16x1xf32> to vector<2x16x16xf32>
    %410 = arith.mulf %405, %409 : vector<2x16x16xf32>
    %411 = vector.extract_strided_slice %367 {offsets = [0, 0, 16], sizes = [2, 16, 8], strides = [1, 1, 1]} : vector<2x16x32xf32> to vector<2x16x8xf32>
    "tpu.trace_start"() <{level = 10 : i32, message = "bqk,bkd->bqd"}> : () -> ()
    %cst_106 = arith.constant dense<0.000000e+00> : vector<2x16x8xf32>
    %412 = tpu.matmul %410, %411, %cst_106 {dimension_numbers = #tpu.dot_dimension_numbers<[2], [1], [1], [2], [0, 0, 0, 1, 1, 2], [0], [0]>} : vector<2x16x16xf32>, vector<2x16x8xf32>, vector<2x16x8xf32> -> vector<2x16x8xf32>
    "tpu.trace_stop"() : () -> ()
    %413 = vector.extract_strided_slice %363 {offsets = [0, 0, 24], sizes = [2, 16, 8], strides = [1, 1, 1]} : vector<2x16x32xf32> to vector<2x16x8xf32>
    %414 = vector.extract_strided_slice %365 {offsets = [0, 0, 24], sizes = [2, 16, 8], strides = [1, 1, 1]} : vector<2x16x32xf32> to vector<2x16x8xf32>
    "tpu.trace_start"() <{level = 10 : i32, message = "bqd,bkd->bqk"}> : () -> ()
    %cst_107 = arith.constant dense<0.000000e+00> : vector<2x16x16xf32>
    %415 = tpu.matmul %413, %414, %cst_107 {dimension_numbers = #tpu.dot_dimension_numbers<[2], [2], [1], [1], [0, 0, 0, 1, 1, 1], [0], [0]>} : vector<2x16x8xf32>, vector<2x16x8xf32>, vector<2x16x16xf32> -> vector<2x16x16xf32>
    "tpu.trace_stop"() : () -> ()
    %cst_108 = arith.constant dense<0xFF800000> : vector<2x16xf32>
    %416 = vector.multi_reduction <maximumf>, %415, %cst_108 [2] : vector<2x16x16xf32> to vector<2x16xf32>
    %417 = vector.shape_cast %416 : vector<2x16xf32> to vector<2x16x1xf32>
    %418 = vector.broadcast %417 : vector<2x16x1xf32> to vector<2x16x16xf32>
    %419 = arith.subf %415, %418 : vector<2x16x16xf32>
    %420 = math.exp %419 : vector<2x16x16xf32>
    %cst_109 = arith.constant dense<0.000000e+00> : vector<2x16xf32>
    %421 = vector.multi_reduction <add>, %420, %cst_109 [2] : vector<2x16x16xf32> to vector<2x16xf32>
    %422 = vector.shape_cast %421 : vector<2x16xf32> to vector<2x16x1xf32>
    %423 = tpu.reciprocal %422 {approx = true} : vector<2x16x1xf32> -> vector<2x16x1xf32>
    %424 = vector.broadcast %423 : vector<2x16x1xf32> to vector<2x16x16xf32>
    %425 = arith.mulf %420, %424 : vector<2x16x16xf32>
    %426 = vector.extract_strided_slice %367 {offsets = [0, 0, 24], sizes = [2, 16, 8], strides = [1, 1, 1]} : vector<2x16x32xf32> to vector<2x16x8xf32>
    "tpu.trace_start"() <{level = 10 : i32, message = "bqk,bkd->bqd"}> : () -> ()
    %cst_110 = arith.constant dense<0.000000e+00> : vector<2x16x8xf32>
    %427 = tpu.matmul %425, %426, %cst_110 {dimension_numbers = #tpu.dot_dimension_numbers<[2], [1], [1], [2], [0, 0, 0, 1, 1, 2], [0], [0]>} : vector<2x16x16xf32>, vector<2x16x8xf32>, vector<2x16x8xf32> -> vector<2x16x8xf32>
    "tpu.trace_stop"() : () -> ()
    %428 = tpu.concatenate %382, %397, %412, %427 in 2 : vector<2x16x8xf32>, vector<2x16x8xf32>, vector<2x16x8xf32>, vector<2x16x8xf32> -> vector<2x16x32xf32>
    %429 = vector.shape_cast %428 : vector<2x16x32xf32> to vector<32x32xf32>
    %430 = vector.extract_strided_slice %354 {offsets = [0, 0], sizes = [32, 32], strides = [1, 1]} : vector<33x32xf32> to vector<32x32xf32>
    %cst_111 = arith.constant dense<0.000000e+00> : vector<32x32xf32>
    %431 = tpu.matmul %429, %430, %cst_111 {dimension_numbers = #tpu.dot_dimension_numbers<[1], [0], [0], [1], [0, 0, 1, 1], [], []>} : vector<32x32xf32>, vector<32x32xf32>, vector<32x32xf32> -> vector<32x32xf32>
    %432 = vector.extract_strided_slice %354 {offsets = [32, 0], sizes = [1, 32], strides = [1, 1]} : vector<33x32xf32> to vector<1x32xf32>
    %433 = vector.broadcast %432 : vector<1x32xf32> to vector<32x32xf32>
    %434 = arith.addf %431, %433 : vector<32x32xf32>
    %435 = arith.addf %326, %434 : vector<32x32xf32>
    %436 = vector.extract_strided_slice %0 {offsets = [6, 0], sizes = [1, 32], strides = [1, 1]} : vector<10x32xf32> to vector<1x32xf32>
    %437 = vector.extract_strided_slice %0 {offsets = [7, 0], sizes = [1, 32], strides = [1, 1]} : vector<10x32xf32> to vector<1x32xf32>
    %cst_112 = arith.constant dense<0.000000e+00> : vector<32xf32>
    %438 = vector.multi_reduction <add>, %435, %cst_112 [1] : vector<32x32xf32> to vector<32xf32>
    %439 = vector.shape_cast %438 : vector<32xf32> to vector<32x1xf32>
    %cst_113 = arith.constant 3.200000e+01 : f32
    %440 = vector.broadcast %cst_113 : f32 to vector<32x1xf32>
    %441 = arith.divf %439, %440 : vector<32x1xf32>
    %442 = vector.broadcast %441 : vector<32x1xf32> to vector<32x32xf32>
    %443 = arith.subf %435, %442 : vector<32x32xf32>
    %444 = arith.mulf %443, %443 : vector<32x32xf32>
    %cst_114 = arith.constant dense<0.000000e+00> : vector<32xf32>
    %445 = vector.multi_reduction <add>, %444, %cst_114 [1] : vector<32x32xf32> to vector<32xf32>
    %446 = vector.shape_cast %445 : vector<32xf32> to vector<32x1xf32>
    %cst_115 = arith.constant 3.200000e+01 : f32
    %447 = vector.broadcast %cst_115 : f32 to vector<32x1xf32>
    %448 = arith.divf %446, %447 : vector<32x1xf32>
    %449 = vector.broadcast %441 : vector<32x1xf32> to vector<32x32xf32>
    %450 = arith.subf %435, %449 : vector<32x32xf32>
    %cst_116 = arith.constant 9.99999974E-6 : f32
    %451 = vector.broadcast %cst_116 : f32 to vector<32x1xf32>
    %452 = arith.addf %448, %451 : vector<32x1xf32>
    %453 = math.rsqrt %452 : vector<32x1xf32>
    %454 = vector.broadcast %453 : vector<32x1xf32> to vector<32x32xf32>
    %455 = arith.mulf %450, %454 : vector<32x32xf32>
    %456 = vector.broadcast %436 : vector<1x32xf32> to vector<32x32xf32>
    %457 = arith.mulf %455, %456 : vector<32x32xf32>
    %458 = vector.broadcast %437 : vector<1x32xf32> to vector<32x32xf32>
    %459 = arith.addf %457, %458 : vector<32x32xf32>
    %c0_117 = arith.constant 0 : index
    %c0_118 = arith.constant 0 : index
    %460 = vector.load %arg4[%c0_117, %c0_118] : memref<33x64xf32, #tpu.memory_space<vmem>>, vector<32x64xf32>
    %c32 = arith.constant 32 : index
    %c0_119 = arith.constant 0 : index
    %461 = vector.load %arg4[%c32, %c0_119] : memref<33x64xf32, #tpu.memory_space<vmem>>, vector<1x64xf32>
    %c0_120 = arith.constant 0 : index
    %c0_121 = arith.constant 0 : index
    %462 = vector.load %arg5[%c0_120, %c0_121] : memref<65x32xf32, #tpu.memory_space<vmem>>, vector<64x32xf32>
    %c64 = arith.constant 64 : index
    %c0_122 = arith.constant 0 : index
    %463 = vector.load %arg5[%c64, %c0_122] : memref<65x32xf32, #tpu.memory_space<vmem>>, vector<1x32xf32>
    %464 = vector.extract_strided_slice %0 {offsets = [8, 0], sizes = [1, 32], strides = [1, 1]} : vector<10x32xf32> to vector<1x32xf32>
    %465 = vector.extract_strided_slice %0 {offsets = [9, 0], sizes = [1, 32], strides = [1, 1]} : vector<10x32xf32> to vector<1x32xf32>
    %cst_123 = arith.constant dense<0.000000e+00> : vector<32xf32>
    %466 = vector.multi_reduction <add>, %459, %cst_123 [1] : vector<32x32xf32> to vector<32xf32>
    %467 = vector.shape_cast %466 : vector<32xf32> to vector<32x1xf32>
    %cst_124 = arith.constant 3.200000e+01 : f32
    %468 = vector.broadcast %cst_124 : f32 to vector<32x1xf32>
    %469 = arith.divf %467, %468 : vector<32x1xf32>
    %470 = vector.broadcast %469 : vector<32x1xf32> to vector<32x32xf32>
    %471 = arith.subf %459, %470 : vector<32x32xf32>
    %472 = arith.mulf %471, %471 : vector<32x32xf32>
    %cst_125 = arith.constant dense<0.000000e+00> : vector<32xf32>
    %473 = vector.multi_reduction <add>, %472, %cst_125 [1] : vector<32x32xf32> to vector<32xf32>
    %474 = vector.shape_cast %473 : vector<32xf32> to vector<32x1xf32>
    %cst_126 = arith.constant 0.0322580636 : f32
    %475 = vector.broadcast %cst_126 : f32 to vector<32x1xf32>
    %476 = arith.mulf %474, %475 : vector<32x1xf32>
    %477 = vector.broadcast %469 : vector<32x1xf32> to vector<32x32xf32>
    %478 = arith.subf %459, %477 : vector<32x32xf32>
    %479 = math.sqrt %476 : vector<32x1xf32>
    %cst_127 = arith.constant 9.99999997E-7 : f32
    %480 = vector.broadcast %cst_127 : f32 to vector<32x1xf32>
    %481 = arith.addf %479, %480 : vector<32x1xf32>
    %482 = vector.broadcast %481 : vector<32x1xf32> to vector<32x32xf32>
    %483 = arith.divf %478, %482 : vector<32x32xf32>
    %484 = vector.broadcast %464 : vector<1x32xf32> to vector<32x32xf32>
    %485 = arith.mulf %484, %483 : vector<32x32xf32>
    %486 = vector.broadcast %465 : vector<1x32xf32> to vector<32x32xf32>
    %487 = arith.addf %485, %486 : vector<32x32xf32>
    %cst_128 = arith.constant dense<0.000000e+00> : vector<32x64xf32>
    %488 = tpu.matmul %487, %460, %cst_128 {dimension_numbers = #tpu.dot_dimension_numbers<[1], [0], [0], [1], [0, 0, 1, 1], [], []>} : vector<32x32xf32>, vector<32x64xf32>, vector<32x64xf32> -> vector<32x64xf32>
    %489 = vector.broadcast %461 : vector<1x64xf32> to vector<32x64xf32>
    %490 = arith.addf %488, %489 : vector<32x64xf32>
    %cst_129 = arith.constant 0.000000e+00 : f32
    %491 = vector.broadcast %cst_129 : f32 to vector<32x64xf32>
    %492 = arith.maximumf %490, %491 : vector<32x64xf32>
    %cst_130 = arith.constant dense<0.000000e+00> : vector<32x32xf32>
    %493 = tpu.matmul %492, %462, %cst_130 {dimension_numbers = #tpu.dot_dimension_numbers<[1], [0], [0], [1], [0, 0, 1, 1], [], []>} : vector<32x64xf32>, vector<64x32xf32>, vector<32x32xf32> -> vector<32x32xf32>
    %494 = vector.broadcast %463 : vector<1x32xf32> to vector<32x32xf32>
    %495 = arith.addf %493, %494 : vector<32x32xf32>
    %496 = arith.addf %495, %459 : vector<32x32xf32>
    %cst_131 = arith.constant dense<0.000000e+00> : vector<32xf32>
    %497 = vector.multi_reduction <add>, %496, %cst_131 [1] : vector<32x32xf32> to vector<32xf32>
    %498 = vector.shape_cast %497 : vector<32xf32> to vector<32x1xf32>
    %cst_132 = arith.constant 3.200000e+01 : f32
    %499 = vector.broadcast %cst_132 : f32 to vector<32x1xf32>
    %500 = arith.divf %498, %499 : vector<32x1xf32>
    %501 = vector.broadcast %500 : vector<32x1xf32> to vector<32x32xf32>
    %502 = arith.subf %496, %501 : vector<32x32xf32>
    %503 = arith.mulf %502, %502 : vector<32x32xf32>
    %cst_133 = arith.constant dense<0.000000e+00> : vector<32xf32>
    %504 = vector.multi_reduction <add>, %503, %cst_133 [1] : vector<32x32xf32> to vector<32xf32>
    %505 = vector.shape_cast %504 : vector<32xf32> to vector<32x1xf32>
    %cst_134 = arith.constant 0.0322580636 : f32
    %506 = vector.broadcast %cst_134 : f32 to vector<32x1xf32>
    %507 = arith.mulf %505, %506 : vector<32x1xf32>
    %508 = vector.broadcast %500 : vector<32x1xf32> to vector<32x32xf32>
    %509 = arith.subf %496, %508 : vector<32x32xf32>
    %510 = math.sqrt %507 : vector<32x1xf32>
    %cst_135 = arith.constant 9.99999997E-7 : f32
    %511 = vector.broadcast %cst_135 : f32 to vector<32x1xf32>
    %512 = arith.addf %510, %511 : vector<32x1xf32>
    %513 = vector.broadcast %512 : vector<32x1xf32> to vector<32x32xf32>
    %514 = arith.divf %509, %513 : vector<32x32xf32>
    %515 = vector.broadcast %464 : vector<1x32xf32> to vector<32x32xf32>
    %516 = arith.mulf %515, %514 : vector<32x32xf32>
    %517 = vector.broadcast %465 : vector<1x32xf32> to vector<32x32xf32>
    %518 = arith.addf %516, %517 : vector<32x32xf32>
    %c0_136 = arith.constant 0 : index
    %c0_137 = arith.constant 0 : index
    %519 = vector.load %arg7[%c0_136, %c0_137] : memref<32x32xf32, #tpu.memory_space<vmem>>, vector<32x32xf32>
    tpu.vector_store %arg7[%c0_136, %c0_137], %518 {strides = array<i32>} : memref<32x32xf32, #tpu.memory_space<vmem>>, vector<32x32xf32>,
    return
  }
}

</mosaic_0001>

<bundles_post_ra>
// kernel: cross_transformer_forward.1
= control target key start
LH: loop header
LB: loop body
LE: loop exit
PB: predicated region body
PF: predicated region fallthrough
CT: control target
= control target key end

     0   :  { %vm33_vm0 = vcmask 261120   ;;  %s7970_s0 = inlined_call_operand.vmem [shape: f32[16,32], index: 0, kind: input, shape index: {}]   ;;  %s7971_s1 = inlined_call_operand.vmem [shape: f32[16,32], index: 1, kind: input, shape index: {}]   ;;  %s7972_s2 = inlined_call_operand.vmem [shape: f32[3,33,96], index: 2, kind: input, shape index: {}]   ;;  %s7973_s3 = inlined_call_operand.vmem [shape: f32[3,33,32], index: 3, kind: input, shape index: {}]   ;;  %s7974_s4 = inlined_call_operand.vmem [shape: f32[33,64], index: 4, kind: input, shape index: {}]   ;;  %s7975_s5 = inlined_call_operand.vmem [shape: f32[65,32], index: 5, kind: input, shape index: {}]   ;;  %s7976_s6 = inlined_call_operand.vmem [shape: f32[10,32], index: 6, kind: input, shape index: {}]   ;;  %s7977_s7 = inlined_call_operand.hbm [shape: f32[32,32], index: 7, kind: output, shape index: {}]  }
   0x1   :  { %v29_v0 = vld [vmem:[%s7970_s0] sm:$0xff]  ;;  %v30_v2 = vld [vmem:[%s7970_s0 + $0x8] sm:$0xff] }
   0x2   :  { %v31_v1 = vld [vmem:[%s7971_s1] sm:$0xff]  ;;  %v34_v3 = vsel %vm33_vm0, %v29_v0, 0.0  ;;  %v32_v5 = vld [vmem:[%s7971_s1 + $0x8] sm:$0xff] }
   0x3   :  { %v73_v4 = vsel %vm33_vm0, %v31_v1, 0.0 }
   0x4   :  { %12 = vsyncpa [#allocation3], 0  ;;  %35 = vadd.xlane.f32.xlu0 %v34_v3  ;;  %74 = vadd.xlane.f32.xlu1 %v73_v4  ;;  %v37_v6 = vsel %vm33_vm0, %v30_v2, 0.0  ;;  %v76_v7 = vsel %vm33_vm0, %v32_v5, 0.0  ;;  %v103_v28 = vld [vmem:[%s7972_s2] sm:$0xff]  ;;  %v104_v29 = vld [vmem:[%s7972_s2 + $0x8] sm:$0xff]  ;;  %v61_v36 = vlaneseq }
   0x5   :  { %v105_v30 = vld [vmem:[%s7972_s2 + $0x10] sm:$0xff]  ;;  %v6461_v31 = vpack.c.bf16 %v104_v29, %v103_v28  ;;  %v106_v32 = vld [vmem:[%s7972_s2 + $0x18] sm:$0xff]  ;;  %v7028_v49 = vld [vmem:[%s7976_s6] sm:$0xff]  ;;  %vm6933_vm1 = vmmov 0   ;;  %s6934_s21 = smov 96   ;;  %vm219_vm2 = vcmask 64512  }
   0x6   :  { %v6465_v33 = vpack.c.bf16 %v106_v32, %v105_v30  ;;  %v7022_v42 = vshrl.u32 %v61_v36, 7  ;;  %s6935_s22 = smov 88   ;;  %s6936_s23 = smov 120   ;;  %vm1566_vm3 = vcmask 195584   ;;  %vm1563_vm4 = vcmask 130048   ;;  %vm7561_vm5 = vmpackc.low %vm219_vm2, %vm219_vm2 }
   0x7   :  { %6462 = vmatprep.subr.bf16.mxu0 %v6461_v31  ;;  %s6937_s24 = smov 64   ;;  %s6938_s25 = smov 80   ;;  %vm5521_vm14 = vcmask 523264  }
   0x8   :  { %38 = vadd.xlane.f32.xlu0 %v37_v6  ;;  %77 = vadd.xlane.f32.xlu1 %v76_v7  ;;  %v63_v47 = vsub.s32 0, %v7022_v42  ;;  %v69_v50 = vsub.s32 1, %v7022_v42  ;;  %v5731_v6 = vld [vmem:[%s7972_s2 + $0x20] ss:$0 sm:$0xff]  ;;  %s6939_s26 = smov 112   ;;  %s6940_s27 = smov 56  }
   0x9   :  { %6464 = vmatpush3.bf16.msra.mxu0 %v6461_v31  ;;  %s6941_s28 = smov 72   ;;  %s6942_s29 = smov 104  }
   0xa   :  { %6466 = vmatprep.subr.bf16.mxu0 %v6465_v33  ;;  %v64_v51 = vrot.slane %v7028_v49, %v63_v47  ;;  %v70_v54 = vrot.slane %v7028_v49, %v69_v50  ;;  %s6943_s30 = smov 48   ;;  %s6944_s8 = smov 40  }
   0xb   :  { %s6945_s9 = smov 8   ;;  %s6946_s10 = smov 16  }
   0xc   :  { %s6947_s17 = smov 24  }
   0xd   :  { %6468 = vmatpush3.bf16.msra.mxu0 %v6465_v33 }
  0x91   :  { %v36_v8 = vpop.xlane.xlu0 %35  ;;  %v75_v9 = vpop.xlane.xlu1 %74 }
  0x92   :  { %v41_v10 = vmul.f32 0.03125, %v36_v8  ;;  %v79_v11 = vmul.f32 0.03125, %v75_v9 }
  0x94   :  { %v43_v12 = vsub.f32 %v29_v0, %v41_v10  ;;  %v81_v13 = vsub.f32 %v31_v1, %v79_v11 }
  0x95   :  { %v39_v14 = vpop.xlane.xlu0 %38  ;;  %v78_v15 = vpop.xlane.xlu1 %77 }
  0x96   :  { %v42_v16 = vmul.f32 0.03125, %v39_v14  ;;  %v80_v17 = vmul.f32 0.03125, %v78_v15  ;;  %v45_v18 = vmul.f32 %v43_v12, %v43_v12  ;;  %v83_v19 = vmul.f32 %v81_v13, %v81_v13 }
  0x98   :  { %v44_v20 = vsub.f32 %v30_v2, %v42_v16  ;;  %v82_v21 = vsub.f32 %v32_v5, %v80_v17  ;;  %v47_v22 = vsel %vm33_vm0, %v45_v18, 0.0  ;;  %v85_v23 = vsel %vm33_vm0, %v83_v19, 0.0 }
  0x99   :  { %48 = vadd.xlane.f32.xlu0 %v47_v22  ;;  %v6932_v5 = vmov 0.0  }
  0x9a   :  { %v46_v24 = vmul.f32 %v44_v20, %v44_v20  ;;  %v84_v25 = vmul.f32 %v82_v21, %v82_v21  ;;  %6089 = vmatprep.subr.mxu1 %v6932_v5  ;;  %6104 = vmatprep.subr.mxu0 %v6932_v5 }
  0x9b   :  { %6091 = vmatprep.mubr.msk.f32.mxu1 %vm6933_vm1, %v6932_v5 }
  0x9c   :  { %v50_v26 = vsel %vm33_vm0, %v46_v24, 0.0  ;;  %v88_v27 = vsel %vm33_vm0, %v84_v25, 0.0 }
  0x9d   :  { %86 = vadd.xlane.f32.xlu0 %v85_v23  ;;  %51 = vadd.xlane.f32.xlu1 %v50_v26 }
  0xa1   :  { %89 = vadd.xlane.f32.xlu1 %v88_v27 }
 0x126   :  { %v49_v34 = vpop.xlane.xlu0 %48 }
 0x127   :  { %v53_v35 = vmul.f32 0.03125, %v49_v34 }
 0x129   :  { %v55_v37 = vadd.f32 1e-05, %v53_v35 }
 0x12a   :  { %v52_v38 = vpop.xlane.xlu1 %51  ;;  %v87_v39 = vpop.xlane.xlu0 %86 }
 0x12b   :  { %6711 = vrsqrt.f32 %v55_v37  ;;  %v54_v40 = vmul.f32 0.03125, %v52_v38  ;;  %v91_v41 = vmul.f32 0.03125, %v87_v39 }
 0x12d   :  { %v56_v43 = vadd.f32 1e-05, %v54_v40  ;;  %v93_v44 = vadd.f32 1e-05, %v91_v41 }
 0x12e   :  { %v90_v45 = vpop.xlane.xlu1 %89 }
 0x12f   :  { %6713 = vrsqrt.f32 %v56_v43  ;;  %v92_v46 = vmul.f32 0.03125, %v90_v45 }
 0x130   :  { %6715 = vrsqrt.f32 %v93_v44 }
 0x131   :  { %v94_v48 = vadd.f32 1e-05, %v92_v46 }
 0x133   :  { %6717 = vrsqrt.f32 %v94_v48 }
 0x135   :  { %v6712_v52 = vpop.eup %6711 }
 0x136   :  { %v7034_v53 = vmul.f32 %v6712_v52, %v43_v12 }
 0x138   :  { %v65_v55 = vmul.f32 %v64_v51, %v7034_v53 }
 0x139   :  { %v6714_v56 = vpop.eup %6713 }
 0x13a   :  { %v6716_v57 = vpop.eup %6715  ;;  %v71_v58 = vadd.f32 %v70_v54, %v65_v55  ;;  %v7040_v59 = vmul.f32 %v6714_v56, %v44_v20 }
 0x13b   :  { %v7042_v60 = vmul.f32 %v6716_v57, %v81_v13 }
 0x13c   :  { %6083 = vmatprep.mubr.msk.f32.mxu0 %vm33_vm0, %v71_v58  ;;  %v66_v61 = vmul.f32 %v64_v51, %v7040_v59 }
 0x13d   :  { %v6718_v62 = vpop.eup %6717  ;;  %v99_v63 = vmul.f32 %v7042_v60, %v64_v51 }
 0x13e   :  { %v72_v0 = vadd.f32 %v70_v54, %v66_v61  ;;  %v7047_v1 = vmul.f32 %v6718_v62, %v82_v21 }
 0x13f   :  { %v101_v2 = vadd.f32 %v99_v63, %v70_v54 }
 0x140   :  { %6084 = vmatmul.mubr.msk.f32.vlgmr.msra.gmra.mrb[0].mxu0 %vm33_vm0, %v72_v0  ;;  %v100_v3 = vmul.f32 %v7047_v1, %v64_v51 }
 0x141   :  { %6086 = vmatprep.mubr.msk.f32.mxu0 %vm33_vm0, %v101_v2 }
 0x142   :  { %v102_v4 = vadd.f32 %v100_v3, %v70_v54 }
 0x144   :  { %6087 = vmatmul.mubr.msk.f32.gmra.mrb[2].mxu0 %vm33_vm0, %v102_v4 }
 0x145   :  { %6106 = vmatprep.mubr.msk.f32.mxu0 %vm6933_vm1, %v6932_v5 }
 0x213   :  { %v6085_v7 = vpop.f32.mrb[0].mxu0 }
 0x214   :  { %v201_v8 = vadd.f32 %v6085_v7, %v5731_v6  ;;  %v195_v9 = vpop.f32.mrb[1].mxu0 }
 0x215   :  { %v196_v10 = vadd.f32 %v5731_v6, %v195_v9 }
 0x216   :  { %v7079_v18 = vmul.f32 0.35355338, %v201_v8 }
 0x217   :  { %v6088_v11 = vpop.f32.mrb[2].mxu0  ;;  %v7071_v16 = vmul.f32 0.35355338, %v196_v10 }
 0x218   :  { %v7062_v12 = vadd.f32 %v6088_v11, %v5731_v6  ;;  %v205_v13 = vpop.f32.mrb[3].mxu0 }
 0x219   :  { %v7064_v14 = vadd.f32 %v5731_v6, %v205_v13 }
 0x21a   :  { %296 = vrot.lane.b32.xlu1 %v7062_v12, %s6934_s21 }
 0x21b   :  { %217 = vrot.lane.b32.xlu0 %v7064_v14, %s6934_s21 }
 0x28c   :  { %v297_v17 = vpop.permute.xlu1 %296 }
 0x28d   :  { %v218_v15 = vpop.permute.xlu0 %217 }
 0x28e   :  { %6090 = vmatpush3.xpose.msk.msra.mxu1 %vm219_vm2, %v218_v15 }
 0x28f   :  { %6094 = vmatprep.subr.mxu1 %v6932_v5 }
 0x291   :  { %6092 = vmatmul.mubr.msk.f32.vlgmr.msra.gmra.mrb[0].mxu1 %vm219_vm2, %v7071_v16 }
 0x292   :  { %6095 = vmatpush3.xpose.msk.msra.mxu1 %vm219_vm2, %v297_v17  ;;  %6096 = vmatprep.mubr.msk.f32.mxu1 %vm6933_vm1, %v6932_v5 }
 0x293   :  { %6099 = vmatprep.subr.mxu1 %v6932_v5 }
 0x295   :  { %6097 = vmatmul.mubr.msk.f32.vlgmr.msra.gmra.mrb[2].mxu1 %vm219_vm2, %v7079_v18 }
 0x296   :  { %6101 = vmatprep.mubr.msk.f32.mxu1 %vm6933_vm1, %v6932_v5 }
 0x364   :  { %v291_v19 = vpop.f32.mrb[0].mxu1 }
 0x365   :  { %v6093_v20 = vpop.f32.mrb[1].mxu1  ;;  %v373_v21 = vsel %vm219_vm2, %v291_v19, -inf }
 0x366   :  { %374 = vmax.xlane.f32.xlu0 %v373_v21 }
 0x368   :  { %v369_v22 = vpop.f32.mrb[2].mxu1 }
 0x369   :  { %v6098_v23 = vpop.f32.mrb[3].mxu1  ;;  %v376_v24 = vsel %vm219_vm2, %v369_v22, -inf }
 0x36a   :  { %377 = vmax.xlane.f32.xlu1 %v376_v24 }
 0x3f3   :  { %v375_v25 = vpop.xlane.xlu0 %374 }
 0x3f4   :  { %v379_v26 = vsub.f32 %v291_v19, %v375_v25 }
 0x3f6   :  { %v381_v27 = vmul.f32 1.442695, %v379_v26 }
 0x3f7   :  { %v378_v28 = vpop.xlane.xlu1 %377 }
 0x3f8   :  { %6719 = vpow2.f32 %v381_v27  ;;  %v380_v29 = vsub.f32 %v369_v22, %v378_v28 }
 0x3fa   :  { %v383_v30 = vmul.f32 1.442695, %v380_v29 }
 0x3fc   :  { %6721 = vpow2.f32 %v383_v30 }
 0x402   :  { %v6720_v31 = vpop.eup %6719 }
 0x403   :  { %v385_v32 = vsel %vm219_vm2, %v6720_v31, 0.0 }
 0x404   :  { %386 = vadd.xlane.f32.xlu1 %v385_v32 }
 0x406   :  { %v6722_v33 = vpop.eup %6721 }
 0x407   :  { %v388_v34 = vsel %vm219_vm2, %v6722_v33, 0.0 }
 0x408   :  { %389 = vadd.xlane.f32.xlu0 %v388_v34 }
 0x415   :  { %627 = vrot.lane.b32.xlu1 %v7062_v12, %s6935_s22 }
 0x419   :  { %625 = vrot.lane.b32.xlu1 %v7079_v18, %s6936_s23 }
 0x41d   :  { %395 = vrot.lane.b32.xlu1 %v7064_v14, %s6937_s24 }
 0x41e   :  { %471 = vrot.lane.b32.xlu0 %v7062_v12, %s6937_s24 }
 0x421   :  { %547 = vrot.lane.b32.xlu1 %v7071_v16, %s6936_s23 }
 0x422   :  { %549 = vrot.lane.b32.xlu0 %v7064_v14, %s6935_s22 }
 0x491   :  { %v387_v35 = vpop.xlane.xlu1 %386 }
 0x492   :  { %6723 = vrcp.f32 %v387_v35 }
 0x495   :  { %v390_v36 = vpop.xlane.xlu0 %389  ;;  %v628_v37 = vpop.permute.xlu1 %627 }
 0x496   :  { %6725 = vrcp.f32 %v390_v36 }
 0x499   :  { %v472_v38 = vpop.permute.xlu0 %471  ;;  %v626_v39 = vpop.permute.xlu1 %625 }
 0x49a   :  { %6105 = vmatpush3.msra.mxu0 %v472_v38 }
 0x49b   :  { %6114 = vmatprep.subr.mxu0 %v6932_v5 }
 0x49c   :  { %v6724_v40 = vpop.eup %6723 }
 0x49d   :  { %v396_v41 = vpop.permute.xlu1 %395  ;;  %v393_v43 = vmul.f32 %v6724_v40, %v6720_v31  ;;  %v550_v46 = vpop.permute.xlu0 %549 }
 0x49e   :  { %6100 = vmatpush3.msra.mxu1 %v396_v41 }
 0x49f   :  { %6102 = vmatmul.mubr.msk.f32.vlgmr.msra.gmra.mrb[4].mxu1 %vm219_vm2, %v393_v43  ;;  %6109 = vmatprep.subr.mxu1 %v6932_v5 }
 0x4a0   :  { %v6726_v44 = vpop.eup %6725  ;;  %6111 = vmatprep.mubr.msk.f32.mxu1 %vm6933_vm1, %v6932_v5 }
 0x4a1   :  { %v394_v45 = vmul.f32 %v6726_v44, %v6722_v33  ;;  %v548_v48 = vpop.permute.xlu1 %547 }
 0x4a3   :  { %6107 = vmatmul.mubr.msk.f32.vlgmr.msra.gmra.mrb[4].mxu0 %vm219_vm2, %v394_v45 }
 0x4a4   :  { %6115 = vmatpush3.xpose.msk.msra.mxu0 %vm219_vm2, %v628_v37  ;;  %6116 = vmatprep.mubr.msk.f32.mxu0 %vm6933_vm1, %v6932_v5 }
 0x4a5   :  { %6110 = vmatpush3.xpose.msk.msra.mxu1 %vm219_vm2, %v550_v46  ;;  %6124 = vmatprep.subr.mxu0 %v6932_v5 }
 0x4a6   :  { %6119 = vmatprep.subr.mxu1 %v6932_v5 }
 0x4a7   :  { %6117 = vmatmul.mubr.msk.f32.vlgmr.msra.gmra.mrb[6].mxu0 %vm219_vm2, %v626_v39 }
 0x4a8   :  { %6112 = vmatmul.mubr.msk.f32.vlgmr.msra.gmra.mrb[6].mxu1 %vm219_vm2, %v548_v48  ;;  %6126 = vmatprep.mubr.msk.f32.mxu0 %vm6933_vm1, %v6932_v5 }
 0x4a9   :  { %6121 = vmatprep.mubr.msk.f32.mxu1 %vm6933_vm1, %v6932_v5 }
 0x572   :  { %v7120_v51 = vpop.f32.mrb[4].mxu1 }
 0x573   :  { %v6103_v52 = vpop.f32.mrb[5].mxu1 }
 0x576   :  { %v7122_v54 = vpop.f32.mrb[4].mxu0 }
 0x577   :  { %v6108_v55 = vpop.f32.mrb[5].mxu0 }
 0x57a   :  { %v699_v56 = vpop.f32.mrb[6].mxu0 }
 0x57b   :  { %v621_v57 = vpop.f32.mrb[6].mxu1  ;;  %v6118_v58 = vpop.f32.mrb[7].mxu0  ;;  %v706_v61 = vsel %vm219_vm2, %v699_v56, -inf }
 0x57c   :  { %707 = vmax.xlane.f32.xlu0 %v706_v61  ;;  %v6113_v62 = vpop.f32.mrb[7].mxu1  ;;  %v703_v63 = vsel %vm219_vm2, %v621_v57, -inf }
 0x57d   :  { %704 = vmax.xlane.f32.xlu1 %v703_v63 }
 0x58e   :  { %957 = vrot.lane.b32.xlu1 %v7062_v12, %s6938_s25 }
 0x592   :  { %955 = vrot.lane.b32.xlu1 %v7079_v18, %s6939_s26 }
 0x596   :  { %725 = vrot.lane.b32.xlu1 %v7064_v14, %s6940_s27 }
 0x59a   :  { %877 = vrot.lane.b32.xlu1 %v7071_v16, %s6939_s26 }
 0x609   :  { %v708_v0 = vpop.xlane.xlu0 %707 }
 0x60a   :  { %v710_v2 = vsub.f32 %v699_v56, %v708_v0  ;;  %v705_v3 = vpop.xlane.xlu1 %704 }
 0x60b   :  { %v709_v4 = vsub.f32 %v621_v57, %v705_v3 }
 0x60c   :  { %v713_v6 = vmul.f32 1.442695, %v710_v2 }
 0x60d   :  { %v711_v7 = vmul.f32 1.442695, %v709_v4 }
 0x60e   :  { %v958_v8 = vpop.permute.xlu1 %957 }
 0x60f   :  { %6727 = vpow2.f32 %v711_v7 }
 0x610   :  { %6729 = vpow2.f32 %v713_v6 }
 0x612   :  { %v956_v9 = vpop.permute.xlu1 %955 }
 0x616   :  { %v726_v10 = vpop.permute.xlu1 %725 }
 0x617   :  { %6120 = vmatpush3.msra.mxu1 %v726_v10 }
 0x618   :  { %6129 = vmatprep.subr.mxu1 %v6932_v5 }
 0x619   :  { %v6728_v11 = vpop.eup %6727 }
 0x61a   :  { %v715_v13 = vsel %vm219_vm2, %v6728_v11, 0.0  ;;  %v6730_v15 = vpop.eup %6729  ;;  %v878_v27 = vpop.permute.xlu1 %877 }
 0x61b   :  { %716 = vadd.xlane.f32.xlu0 %v715_v13  ;;  %v718_v17 = vsel %vm219_vm2, %v6730_v15, 0.0 }
 0x61f   :  { %719 = vadd.xlane.f32.xlu0 %v718_v17 }
 0x635   :  { %801 = vrot.lane.b32.xlu0 %v7062_v12, %s6940_s27 }
 0x639   :  { %879 = vrot.lane.b32.xlu0 %v7064_v14, %s6938_s25 }
 0x6a8   :  { %v717_v19 = vpop.xlane.xlu0 %716 }
 0x6a9   :  { %6731 = vrcp.f32 %v717_v19 }
 0x6ac   :  { %v720_v20 = vpop.xlane.xlu0 %719 }
 0x6ad   :  { %6733 = vrcp.f32 %v720_v20 }
 0x6b0   :  { %v802_v21 = vpop.permute.xlu0 %801 }
 0x6b1   :  { %6125 = vmatpush3.msra.mxu0 %v802_v21 }
 0x6b2   :  { %6134 = vmatprep.subr.mxu0 %v6932_v5 }
 0x6b3   :  { %v6732_v22 = vpop.eup %6731 }
 0x6b4   :  { %v880_v23 = vpop.permute.xlu0 %879  ;;  %v723_v24 = vmul.f32 %v6732_v22, %v6728_v11 }
 0x6b6   :  { %6122 = vmatmul.mubr.msk.f32.vlgmr.msra.gmra.mrb[8].mxu1 %vm219_vm2, %v723_v24 }
 0x6b7   :  { %v6734_v25 = vpop.eup %6733  ;;  %6130 = vmatpush3.xpose.msk.msra.mxu1 %vm219_vm2, %v880_v23  ;;  %6131 = vmatprep.mubr.msk.f32.mxu1 %vm6933_vm1, %v6932_v5 }
 0x6b8   :  { %v724_v26 = vmul.f32 %v6734_v25, %v6730_v15  ;;  %6139 = vmatprep.subr.mxu1 %v6932_v5 }
 0x6ba   :  { %6127 = vmatmul.mubr.msk.f32.vlgmr.msra.gmra.mrb[8].mxu0 %vm219_vm2, %v724_v26  ;;  %6132 = vmatmul.mubr.msk.f32.vlgmr.msra.gmra.mrb[10].mxu1 %vm219_vm2, %v878_v27 }
 0x6bb   :  { %6135 = vmatpush3.xpose.msk.msra.mxu0 %vm219_vm2, %v958_v8  ;;  %6136 = vmatprep.mubr.msk.f32.mxu0 %vm6933_vm1, %v6932_v5 }
 0x6bc   :  { %6144 = vmatprep.subr.mxu0 %v6932_v5  ;;  %6141 = vmatprep.mubr.msk.f32.mxu1 %vm6933_vm1, %v6932_v5 }
 0x6be   :  { %6137 = vmatmul.mubr.msk.f32.vlgmr.msra.gmra.mrb[10].mxu0 %vm219_vm2, %v956_v9 }
 0x6bf   :  { %6146 = vmatprep.mubr.msk.f32.mxu0 %vm6933_vm1, %v6932_v5 }
 0x789   :  { %v7158_v28 = vpop.f32.mrb[8].mxu1 }
 0x78a   :  { %v6123_v29 = vpop.f32.mrb[9].mxu1 }
 0x78d   :  { %v7160_v30 = vpop.f32.mrb[8].mxu0  ;;  %v951_v31 = vpop.f32.mrb[10].mxu1 }
 0x78e   :  { %v6128_v32 = vpop.f32.mrb[9].mxu0  ;;  %v6133_v33 = vpop.f32.mrb[11].mxu1  ;;  %v1033_v34 = vsel %vm219_vm2, %v951_v31, -inf }
 0x78f   :  { %1034 = vmax.xlane.f32.xlu1 %v1033_v34  ;;  %v1696_v34 = vsub.s32 2, %v7022_v42 }
 0x791   :  { %v1029_v35 = vpop.f32.mrb[10].mxu0 }
 0x792   :  { %v6138_v36 = vpop.f32.mrb[11].mxu0  ;;  %v1036_v37 = vsel %vm219_vm2, %v1029_v35, -inf }
 0x793   :  { %1037 = vmax.xlane.f32.xlu0 %v1036_v37  ;;  %v1697_v36 = vrot.slane %v7028_v49, %v1696_v34  ;;  %v1702_v37 = vsub.s32 3, %v7022_v42 }
 0x7a0   :  { %1287 = vrot.lane.b32.xlu1 %v7062_v12, %s6941_s28 }
 0x7a4   :  { %1285 = vrot.lane.b32.xlu1 %v7079_v18, %s6942_s29 }
 0x7a8   :  { %1055 = vrot.lane.b32.xlu1 %v7064_v14, %s6943_s30 }
 0x7ac   :  { %1207 = vrot.lane.b32.xlu1 %v7071_v16, %s6942_s29 }
 0x81c   :  { %v1035_v38 = vpop.xlane.xlu1 %1034 }
 0x81d   :  { %v1039_v39 = vsub.f32 %v951_v31, %v1035_v38  ;;  %v5764_v31 = vld [vmem:[%s7972_s2 + $0x30] sm:$0xff] }
 0x81f   :  { %v1041_v40 = vmul.f32 1.442695, %v1039_v39  ;;  %v1698_v39 = vmul.f32 %v1697_v36, %v7042_v60  ;;  %v1699_v60 = vmul.f32 %v1697_v36, %v7047_v1 }
 0x820   :  { %v1038_v41 = vpop.xlane.xlu0 %1037  ;;  %v1288_v43 = vpop.permute.xlu1 %1287 }
 0x821   :  { %6735 = vpow2.f32 %v1041_v40  ;;  %v1040_v44 = vsub.f32 %v1029_v35, %v1038_v41  ;;  %v5765_v40 = vld [vmem:[%s7972_s2 + $0x38] sm:$0xff]  ;;  %v5766_v41 = vld [vmem:[%s7972_s2 + $0x40] sm:$0xff] }
 0x823   :  { %v1043_v45 = vmul.f32 1.442695, %v1040_v44  ;;  %v1703_v44 = vrot.slane %v7028_v49, %v1702_v37 }
 0x824   :  { %v1286_v46 = vpop.permute.xlu1 %1285 }
 0x825   :  { %6737 = vpow2.f32 %v1043_v45 }
 0x828   :  { %v1056_v48 = vpop.permute.xlu1 %1055 }
 0x829   :  { %6140 = vmatpush3.msra.mxu1 %v1056_v48  ;;  %v1704_v48 = vadd.f32 %v1703_v44, %v1698_v39 }
 0x82a   :  { %6149 = vmatprep.subr.mxu1 %v6932_v5 }
 0x82b   :  { %v6736_v18 = vpop.eup %6735 }
 0x82c   :  { %v1045_v52 = vsel %vm219_vm2, %v6736_v18, 0.0  ;;  %v1208_v3 = vpop.permute.xlu1 %1207 }
 0x82d   :  { %1046 = vadd.xlane.f32.xlu0 %v1045_v52  ;;  %v1705_v52 = vadd.f32 %v1703_v44, %v1699_v60 }
 0x82f   :  { %v6738_v55 = vpop.eup %6737 }
 0x830   :  { %v1048_v16 = vsel %vm219_vm2, %v6738_v55, 0.0 }
 0x831   :  { %1049 = vadd.xlane.f32.xlu0 %v1048_v16 }
 0x847   :  { %1131 = vrot.lane.b32.xlu0 %v7062_v12, %s6943_s30 }
 0x84b   :  { %1209 = vrot.lane.b32.xlu0 %v7064_v14, %s6941_s28 }
 0x8ba   :  { %v1047_v56 = vpop.xlane.xlu0 %1046 }
 0x8bb   :  { %6739 = vrcp.f32 %v1047_v56  ;;  %v110_v56 = vld [vmem:[%s7973_s3 + $0x10] sm:$0xff] }
 0x8be   :  { %v1050_v57 = vpop.xlane.xlu0 %1049 }
 0x8bf   :  { %6741 = vrcp.f32 %v1050_v57  ;;  %v111_v57 = vld [vmem:[%s7973_s3 + $0x18] sm:$0xff] }
 0x8c2   :  { %v1132_v58 = vpop.permute.xlu0 %1131 }
 0x8c3   :  { %6145 = vmatpush3.msra.mxu0 %v1132_v58  ;;  %v6473_v58 = vpack.c.bf16 %v111_v57, %v110_v56 }
 0x8c4   :  { %6154 = vmatprep.subr.mxu0 %v6932_v5 }
 0x8c5   :  { %v6740_v61 = vpop.eup %6739 }
 0x8c6   :  { %v1210_v62 = vpop.permute.xlu0 %1209  ;;  %v1053_v63 = vmul.f32 %v6740_v61, %v6736_v18  ;;  %v1706_v18 = vmul.f32 %v1697_v36, %v7034_v53  ;;  %v108_v53 = vld [vmem:[%s7973_s3] sm:$0xff] }
 0x8c8   :  { %6142 = vmatmul.mubr.msk.f32.vlgmr.msra.gmra.mrb[12].mxu1 %vm219_vm2, %v1053_v63  ;;  %v1708_v49 = vadd.f32 %v1706_v18, %v1703_v44 }
 0x8c9   :  { %v6742_v0 = vpop.eup %6741  ;;  %6150 = vmatpush3.xpose.msk.msra.mxu1 %vm219_vm2, %v1210_v62  ;;  %6151 = vmatprep.mubr.msk.f32.mxu1 %vm6933_vm1, %v6932_v5 }
 0x8ca   :  { %v1054_v2 = vmul.f32 %v6742_v0, %v6738_v55  ;;  %6159 = vmatprep.subr.mxu1 %v6932_v5  ;;  %v1707_v55 = vmul.f32 %v1697_v36, %v7040_v59  ;;  %v109_v59 = vld [vmem:[%s7973_s3 + $0x8] sm:$0xff] }
 0x8cb   :  { %v6469_v1 = vpack.c.bf16 %v109_v59, %v108_v53 }
 0x8cc   :  { %6147 = vmatmul.mubr.msk.f32.vlgmr.msra.gmra.mrb[12].mxu0 %vm219_vm2, %v1054_v2  ;;  %6152 = vmatmul.mubr.msk.f32.vlgmr.msra.gmra.mrb[14].mxu1 %vm219_vm2, %v1208_v3  ;;  %v1709_v16 = vadd.f32 %v1707_v55, %v1703_v44  ;;  %v5773_v2 = vld [vmem:[%s7972_s2 + $0x48] ss:$0 sm:$0xff] }
 0x8cd   :  { %6155 = vmatpush3.xpose.msk.msra.mxu0 %vm219_vm2, %v1288_v43  ;;  %6156 = vmatprep.mubr.msk.f32.mxu0 %vm6933_vm1, %v6932_v5 }
 0x8ce   :  { %6164 = vmatprep.subr.mxu0 %v6932_v5  ;;  %6161 = vmatprep.mubr.msk.f32.mxu1 %vm6933_vm1, %v6932_v5 }
 0x8d0   :  { %6157 = vmatmul.mubr.msk.f32.vlgmr.msra.gmra.mrb[14].mxu0 %vm219_vm2, %v1286_v46  ;;  %v6481_v46 = vpack.c.bf16 %v5766_v41, %v5765_v40 }
 0x8d1   :  { %6166 = vmatprep.mubr.msk.f32.mxu0 %vm6933_vm1, %v6932_v5 }
 0x99b   :  { %v1127_v4 = vpop.f32.mrb[12].mxu1 }
 0x99c   :  { %v6143_v6 = vpop.f32.mrb[13].mxu1 }
 0x99f   :  { %v1203_v7 = vpop.f32.mrb[12].mxu0  ;;  %v1281_v8 = vpop.f32.mrb[14].mxu1 }
 0x9a0   :  { %v6148_v9 = vpop.f32.mrb[13].mxu0  ;;  %v6153_v10 = vpop.f32.mrb[15].mxu1  ;;  %v1363_v11 = vsel %vm219_vm2, %v1281_v8, -inf }
 0x9a1   :  { %1364 = vmax.xlane.f32.xlu1 %v1363_v11 }
 0x9a3   :  { %v1359_v13 = vpop.f32.mrb[14].mxu0 }
 0x9a4   :  { %v6158_v15 = vpop.f32.mrb[15].mxu0  ;;  %v1366_v17 = vsel %vm219_vm2, %v1359_v13, -inf }
 0x9a5   :  { %1367 = vmax.xlane.f32.xlu0 %v1366_v17 }
 0x9b2   :  { %1385 = vrot.lane.b32.xlu1 %v7064_v14, %s6944_s8 }
 0x9b6   :  { %1539 = vrot.lane.b32.xlu1 %v7158_v28, %s6945_s9 }
 0x9ba   :  { %1541 = vrot.lane.b32.xlu1 %v7160_v30, %s6945_s9  ;;  %v5763_v30 = vld [vmem:[%s7972_s2 + $0x28] sm:$0xff] }
 0x9bb   :  { %v6477_v33 = vpack.c.bf16 %v5764_v31, %v5763_v30 }
 0x9be   :  { %1549 = vrot.lane.b32.xlu1 %v1203_v7, %s6946_s10 }
 0xa2e   :  { %v1365_v19 = vpop.xlane.xlu1 %1364 }
 0xa2f   :  { %v1369_v20 = vsub.f32 %v1281_v8, %v1365_v19 }
 0xa31   :  { %v1371_v21 = vmul.f32 1.442695, %v1369_v20 }
 0xa32   :  { %v1368_v22 = vpop.xlane.xlu0 %1367  ;;  %v1386_v23 = vpop.permute.xlu1 %1385 }
 0xa33   :  { %6743 = vpow2.f32 %v1371_v21  ;;  %v1370_v24 = vsub.f32 %v1359_v13, %v1368_v22  ;;  %6160 = vmatpush3.msra.mxu1 %v1386_v23 }
 0xa34   :  { %6470 = vmatprep.subr.bf16.mxu1 %v6469_v1 }
 0xa35   :  { %v1373_v25 = vmul.f32 1.442695, %v1370_v24 }
 0xa36   :  { %v1540_v13 = vpop.permute.xlu1 %1539 }
 0xa37   :  { %6745 = vpow2.f32 %v1373_v25  ;;  %v1561_v19 = vsel %vm219_vm2, %v7120_v51, %v1540_v13 }
 0xa3a   :  { %v1542_v15 = vpop.permute.xlu1 %1541 }
 0xa3b   :  { %v1562_v24 = vsel %vm219_vm2, %v7122_v54, %v1542_v15 }
 0xa3d   :  { %v6744_v14 = vpop.eup %6743 }
 0xa3e   :  { %v1375_v26 = vsel %vm219_vm2, %v6744_v14, 0.0  ;;  %v1550_v20 = vpop.permute.xlu1 %1549 }
 0xa3f   :  { %1376 = vadd.xlane.f32.xlu0 %v1375_v26  ;;  %v1565_v25 = vsel %vm1563_vm4, %v1562_v24, %v1550_v20 }
 0xa41   :  { %v6746_v27 = vpop.eup %6745 }
 0xa42   :  { %v1378_v28 = vsel %vm219_vm2, %v6746_v27, 0.0 }
 0xa43   :  { %1379 = vadd.xlane.f32.xlu0 %v1378_v28 }
 0xa59   :  { %1461 = vrot.lane.b32.xlu0 %v7062_v12, %s6944_s8 }
 0xa5d   :  { %1547 = vrot.lane.b32.xlu0 %v1127_v4, %s6946_s10 }
 0xacc   :  { %v1377_v29 = vpop.xlane.xlu0 %1376 }
 0xacd   :  { %6747 = vrcp.f32 %v1377_v29 }
 0xad0   :  { %v1380_v32 = vpop.xlane.xlu0 %1379 }
 0xad1   :  { %6749 = vrcp.f32 %v1380_v32 }
 0xad4   :  { %v1462_v35 = vpop.permute.xlu0 %1461 }
 0xad5   :  { %6165 = vmatpush3.msra.mxu0 %v1462_v35 }
 0xad6   :  { %6478 = vmatprep.subr.bf16.mxu0 %v6477_v33 }
 0xad7   :  { %v6748_v12 = vpop.eup %6747 }
 0xad8   :  { %v1383_v38 = vmul.f32 %v6748_v12, %v6744_v14  ;;  %v1548_v17 = vpop.permute.xlu0 %1547 }
 0xad9   :  { %v1564_v21 = vsel %vm1563_vm4, %v1561_v19, %v1548_v17 }
 0xada   :  { %6162 = vmatmul.mubr.msk.f32.vlgmr.msra.gmra.mrb[16].mxu1 %vm219_vm2, %v1383_v38 }
 0xadb   :  { %v6750_v43 = vpop.eup %6749  ;;  %6472 = vmatpush3.bf16.msra.mxu1 %v6469_v1 }
 0xadc   :  { %v1384_v45 = vmul.f32 %v6750_v43, %v6746_v27  ;;  %6474 = vmatprep.subr.bf16.mxu1 %v6473_v58 }
 0xade   :  { %6167 = vmatmul.mubr.msk.f32.vlgmr.msra.gmra.mrb[16].mxu0 %vm219_vm2, %v1384_v45 }
 0xadf   :  { %6480 = vmatpush3.bf16.msra.mxu0 %v6477_v33  ;;  %6188 = vmatprep.mubr.msk.f32.mxu0 %vm33_vm0, %v1704_v48 }
 0xae0   :  { %6482 = vmatprep.subr.bf16.mxu0 %v6481_v46  ;;  %6476 = vmatpush3.bf16.msra.mxu1 %v6473_v58 }
 0xae1   :  { %6194 = vmatprep.subr.mxu1 %v6932_v5 }
 0xae3   :  { %6484 = vmatpush3.bf16.msra.mxu0 %v6481_v46 }
 0xae4   :  { %6204 = vmatprep.subr.mxu0 %v6932_v5 }
 0xae6   :  { %6189 = vmatmul.mubr.msk.f32.vlgmr.msra.gmra.mrb[18].mxu0 %vm33_vm0, %v1705_v52 }
 0xae7   :  { %6191 = vmatprep.mubr.msk.f32.mxu0 %vm33_vm0, %v1708_v49 }
 0xaea   :  { %6192 = vmatmul.mubr.msk.f32.gmra.mrb[20].mxu0 %vm33_vm0, %v1709_v16 }
 0xaeb   :  { %6206 = vmatprep.mubr.msk.f32.mxu0 %vm6933_vm1, %v6932_v5 }
 0xbad   :  { %v1457_v61 = vpop.f32.mrb[16].mxu1 }
 0xbae   :  { %1555 = vrot.lane.b32.xlu0 %v1457_v61, %s6947_s17  ;;  %v6163_v62 = vpop.f32.mrb[17].mxu1 }
 0xbb1   :  { %v1533_v63 = vpop.f32.mrb[16].mxu0 }
 0xbb2   :  { %1557 = vrot.lane.b32.xlu1 %v1533_v63, %s6947_s17  ;;  %v6168_v0 = vpop.f32.mrb[17].mxu0 }
 0xbb9   :  { %v6190_v3 = vpop.f32.mrb[18].mxu0 }
 0xbba   :  { %v1810_v4 = vadd.f32 %v6190_v3, %v5773_v2  ;;  %v1804_v6 = vpop.f32.mrb[19].mxu0 }
 0xbbb   :  { %v1805_v7 = vadd.f32 %v5773_v2, %v1804_v6 }
 0xbbc   :  { %v7286_v54 = vmul.f32 0.35355338, %v1810_v4 }
 0xbbd   :  { %v6193_v8 = vpop.f32.mrb[20].mxu0  ;;  %v7278_v27 = vmul.f32 0.35355338, %v1805_v7 }
 0xbbe   :  { %v7257_v9 = vadd.f32 %v6193_v8, %v5773_v2  ;;  %v1814_v10 = vpop.f32.mrb[21].mxu0 }
 0xbbf   :  { %v7259_v11 = vadd.f32 %v5773_v2, %v1814_v10 }
 0xbc0   :  { %1904 = vrot.lane.b32.xlu1 %v7257_v9, %s6934_s21 }
 0xbc1   :  { %1826 = vrot.lane.b32.xlu0 %v7259_v11, %s6934_s21 }
 0xc20   :  { %v1556_v22 = vpop.permute.xlu0 %1555 }
 0xc21   :  { %v1567_v23 = vsel %vm1566_vm3, %v1564_v21, %v1556_v22 }
 0xc22   :  { %6177 = vmatprep.mubr.msk.f32.mxu1 %vm33_vm0, %v1567_v23 }
 0xc24   :  { %v1558_v14 = vpop.permute.xlu1 %1557 }
 0xc25   :  { %v1568_v26 = vsel %vm1566_vm3, %v1565_v25, %v1558_v14 }
 0xc26   :  { %6178 = vmatmul.mubr.msk.f32.vlgmr.msra.gmra.mrb[18].mxu1 %vm33_vm0, %v1568_v26 }
 0xc27   :  { %6196 = vmatprep.mubr.msk.f32.mxu1 %vm6933_vm1, %v6932_v5 }
 0xc32   :  { %v1905_v28 = vpop.permute.xlu1 %1904 }
 0xc33   :  { %v1827_v51 = vpop.permute.xlu0 %1826 }
 0xc34   :  { %6195 = vmatpush3.xpose.msk.msra.mxu1 %vm219_vm2, %v1827_v51 }
 0xc35   :  { %6199 = vmatprep.subr.mxu1 %v6932_v5 }
 0xc37   :  { %6197 = vmatmul.mubr.msk.f32.vlgmr.msra.gmra.mrb[20].mxu1 %vm219_vm2, %v7278_v27 }
 0xc38   :  { %6200 = vmatpush3.xpose.msk.msra.mxu1 %vm219_vm2, %v1905_v28  ;;  %6201 = vmatprep.mubr.msk.f32.mxu1 %vm6933_vm1, %v6932_v5 }
 0xc39   :  { %6209 = vmatprep.subr.mxu1 %v6932_v5 }
 0xc3b   :  { %6202 = vmatmul.mubr.msk.f32.vlgmr.msra.gmra.mrb[22].mxu1 %vm219_vm2, %v7286_v54 }
 0xc3c   :  { %6211 = vmatprep.mubr.msk.f32.mxu1 %vm6933_vm1, %v6932_v5 }
 0xcf9   :  { %v7293_v29 = vpop.f32.mrb[18].mxu1 }
 0xcfa   :  { %v7295_v30 = vpop.f32.mrb[19].mxu1 }
 0xd0a   :  { %v1899_v31 = vpop.f32.mrb[20].mxu1 }
 0xd0b   :  { %v6198_v32 = vpop.f32.mrb[21].mxu1  ;;  %v1981_v33 = vsel %vm219_vm2, %v1899_v31, -inf }
 0xd0c   :  { %1982 = vmax.xlane.f32.xlu0 %v1981_v33 }
 0xd0e   :  { %v1977_v34 = vpop.f32.mrb[22].mxu1 }
 0xd0f   :  { %v6203_v35 = vpop.f32.mrb[23].mxu1  ;;  %v1984_v12 = vsel %vm219_vm2, %v1977_v34, -inf }
 0xd10   :  { %1985 = vmax.xlane.f32.xlu1 %v1984_v12 }
 0xd21   :  { %2079 = vrot.lane.b32.xlu1 %v7257_v9, %s6937_s24 }
 0xd22   :  { %2003 = vrot.lane.b32.xlu0 %v7259_v11, %s6937_s24 }
 0xd25   :  { %2157 = vrot.lane.b32.xlu1 %v7259_v11, %s6935_s22 }
 0xd29   :  { %2235 = vrot.lane.b32.xlu1 %v7257_v9, %s6935_s22 }
 0xd2d   :  { %2233 = vrot.lane.b32.xlu1 %v7286_v54, %s6936_s23 }
 0xd99   :  { %v1983_v36 = vpop.xlane.xlu0 %1982 }
 0xd9a   :  { %v1987_v37 = vsub.f32 %v1899_v31, %v1983_v36 }
 0xd9c   :  { %v1989_v38 = vmul.f32 1.442695, %v1987_v37 }
 0xd9d   :  { %v2004_v39 = vpop.permute.xlu0 %2003  ;;  %v1986_v40 = vpop.xlane.xlu1 %1985 }
 0xd9e   :  { %6751 = vpow2.f32 %v1989_v38  ;;  %v1988_v41 = vsub.f32 %v1977_v34, %v1986_v40  ;;  %6205 = vmatpush3.msra.mxu0 %v2004_v39 }
 0xd9f   :  { %6214 = vmatprep.subr.mxu0 %v6932_v5 }
 0xda0   :  { %v1991_v43 = vmul.f32 1.442695, %v1988_v41 }
 0xda1   :  { %v2080_v44 = vpop.permute.xlu1 %2079 }
 0xda2   :  { %6753 = vpow2.f32 %v1991_v43  ;;  %6210 = vmatpush3.msra.mxu1 %v2080_v44 }
 0xda3   :  { %6219 = vmatprep.subr.mxu1 %v6932_v5 }
 0xda5   :  { %v2158_v55 = vpop.permute.xlu1 %2157 }
 0xda8   :  { %v6752_v45 = vpop.eup %6751 }
 0xda9   :  { %v1993_v46 = vsel %vm219_vm2, %v6752_v45, 0.0  ;;  %v2236_v59 = vpop.permute.xlu1 %2235 }
 0xdaa   :  { %1994 = vadd.xlane.f32.xlu0 %v1993_v46 }
 0xdac   :  { %v6754_v48 = vpop.eup %6753 }
 0xdad   :  { %v1996_v60 = vsel %vm219_vm2, %v6754_v48, 0.0  ;;  %v2234_v57 = vpop.permute.xlu1 %2233 }
 0xdae   :  { %1997 = vadd.xlane.f32.xlu0 %v1996_v60 }
 0xdc4   :  { %2155 = vrot.lane.b32.xlu0 %v7278_v27, %s6936_s23 }
 0xe37   :  { %v1995_v18 = vpop.xlane.xlu0 %1994 }
 0xe38   :  { %6755 = vrcp.f32 %v1995_v18 }
 0xe3b   :  { %v1998_v52 = vpop.xlane.xlu0 %1997 }
 0xe3c   :  { %6757 = vrcp.f32 %v1998_v52 }
 0xe3f   :  { %v2156_v56 = vpop.permute.xlu0 %2155 }
 0xe42   :  { %v6756_v49 = vpop.eup %6755 }
 0xe43   :  { %v2001_v16 = vmul.f32 %v6756_v49, %v6752_v45 }
 0xe45   :  { %6207 = vmatmul.mubr.msk.f32.vlgmr.msra.gmra.mrb[22].mxu0 %vm219_vm2, %v2001_v16 }
 0xe46   :  { %v6758_v53 = vpop.eup %6757  ;;  %6215 = vmatpush3.xpose.msk.msra.mxu0 %vm219_vm2, %v2158_v55  ;;  %6216 = vmatprep.mubr.msk.f32.mxu0 %vm6933_vm1, %v6932_v5 }
 0xe47   :  { %v2002_v1 = vmul.f32 %v6758_v53, %v6754_v48  ;;  %6224 = vmatprep.subr.mxu0 %v6932_v5 }
 0xe49   :  { %6212 = vmatmul.mubr.msk.f32.vlgmr.msra.gmra.mrb[24].mxu1 %vm219_vm2, %v2002_v1  ;;  %6217 = vmatmul.mubr.msk.f32.vlgmr.msra.gmra.mrb[24].mxu0 %vm219_vm2, %v2156_v56 }
 0xe4a   :  { %6220 = vmatpush3.xpose.msk.msra.mxu1 %vm219_vm2, %v2236_v59  ;;  %6221 = vmatprep.mubr.msk.f32.mxu1 %vm6933_vm1, %v6932_v5 }
 0xe4b   :  { %6229 = vmatprep.subr.mxu1 %v6932_v5  ;;  %6226 = vmatprep.mubr.msk.f32.mxu0 %vm6933_vm1, %v6932_v5 }
 0xe4d   :  { %6222 = vmatmul.mubr.msk.f32.vlgmr.msra.gmra.mrb[26].mxu1 %vm219_vm2, %v2234_v57 }
 0xe4e   :  { %6231 = vmatprep.mubr.msk.f32.mxu1 %vm6933_vm1, %v6932_v5 }
 0xf18   :  { %v7331_v58 = vpop.f32.mrb[22].mxu0 }
 0xf19   :  { %v6208_v61 = vpop.f32.mrb[23].mxu0 }
 0xf1c   :  { %v7333_v62 = vpop.f32.mrb[24].mxu1  ;;  %v2229_v63 = vpop.f32.mrb[24].mxu0 }
 0xf1d   :  { %v6213_v0 = vpop.f32.mrb[25].mxu1  ;;  %v6218_v2 = vpop.f32.mrb[25].mxu0  ;;  %v2311_v3 = vsel %vm219_vm2, %v2229_v63, -inf }
 0xf1e   :  { %2312 = vmax.xlane.f32.xlu0 %v2311_v3 }
 0xf20   :  { %v2307_v4 = vpop.f32.mrb[26].mxu1 }
 0xf21   :  { %v6223_v6 = vpop.f32.mrb[27].mxu1  ;;  %v2314_v7 = vsel %vm219_vm2, %v2307_v4, -inf }
 0xf22   :  { %2315 = vmax.xlane.f32.xlu1 %v2314_v7 }
 0xf33   :  { %2409 = vrot.lane.b32.xlu1 %v7257_v9, %s6940_s27 }
 0xf34   :  { %2333 = vrot.lane.b32.xlu0 %v7259_v11, %s6940_s27 }
 0xf37   :  { %2487 = vrot.lane.b32.xlu1 %v7259_v11, %s6938_s25 }
 0xf3b   :  { %2565 = vrot.lane.b32.xlu1 %v7257_v9, %s6938_s25 }
 0xf3f   :  { %2563 = vrot.lane.b32.xlu1 %v7286_v54, %s6939_s26 }
 0xfab   :  { %v2313_v8 = vpop.xlane.xlu0 %2312 }
 0xfac   :  { %v2317_v10 = vsub.f32 %v2229_v63, %v2313_v8 }
 0xfae   :  { %v2319_v13 = vmul.f32 1.442695, %v2317_v10 }
 0xfaf   :  { %v2334_v15 = vpop.permute.xlu0 %2333  ;;  %v2316_v17 = vpop.xlane.xlu1 %2315 }
 0xfb0   :  { %6759 = vpow2.f32 %v2319_v13  ;;  %v2318_v19 = vsub.f32 %v2307_v4, %v2316_v17  ;;  %6225 = vmatpush3.msra.mxu0 %v2334_v15 }
 0xfb1   :  { %6234 = vmatprep.subr.mxu0 %v6932_v5 }
 0xfb2   :  { %v2321_v20 = vmul.f32 1.442695, %v2318_v19 }
 0xfb3   :  { %v2410_v21 = vpop.permute.xlu1 %2409 }
 0xfb4   :  { %6761 = vpow2.f32 %v2321_v20  ;;  %6230 = vmatpush3.msra.mxu1 %v2410_v21 }
 0xfb5   :  { %6239 = vmatprep.subr.mxu1 %v6932_v5 }
 0xfb7   :  { %v2488_v51 = vpop.permute.xlu1 %2487 }
 0xfba   :  { %v6760_v22 = vpop.eup %6759 }
 0xfbb   :  { %v2323_v23 = vsel %vm219_vm2, %v6760_v22, 0.0  ;;  %v2566_v33 = vpop.permute.xlu1 %2565 }
 0xfbc   :  { %2324 = vadd.xlane.f32.xlu0 %v2323_v23 }
 0xfbe   :  { %v6762_v24 = vpop.eup %6761 }
 0xfbf   :  { %v2326_v25 = vsel %vm219_vm2, %v6762_v24, 0.0  ;;  %v2564_v12 = vpop.permute.xlu1 %2563 }
 0xfc0   :  { %2327 = vadd.xlane.f32.xlu0 %v2326_v25 }
 0xfd6   :  { %2485 = vrot.lane.b32.xlu0 %v7278_v27, %s6939_s26 }
0x1049   :  { %v2325_v14 = vpop.xlane.xlu0 %2324 }
0x104a   :  { %6763 = vrcp.f32 %v2325_v14 }
0x104d   :  { %v2328_v26 = vpop.xlane.xlu0 %2327 }
0x104e   :  { %6765 = vrcp.f32 %v2328_v26 }
0x1051   :  { %v2486_v35 = vpop.permute.xlu0 %2485 }
0x1054   :  { %v6764_v28 = vpop.eup %6763 }
0x1055   :  { %v2331_v31 = vmul.f32 %v6764_v28, %v6760_v22 }
0x1057   :  { %6227 = vmatmul.mubr.msk.f32.vlgmr.msra.gmra.mrb[26].mxu0 %vm219_vm2, %v2331_v31 }
0x1058   :  { %v6766_v32 = vpop.eup %6765  ;;  %6235 = vmatpush3.xpose.msk.msra.mxu0 %vm219_vm2, %v2488_v51  ;;  %6236 = vmatprep.mubr.msk.f32.mxu0 %vm6933_vm1, %v6932_v5 }
0x1059   :  { %v2332_v34 = vmul.f32 %v6766_v32, %v6762_v24  ;;  %6244 = vmatprep.subr.mxu0 %v6932_v5 }
0x105b   :  { %6232 = vmatmul.mubr.msk.f32.vlgmr.msra.gmra.mrb[28].mxu1 %vm219_vm2, %v2332_v34  ;;  %6237 = vmatmul.mubr.msk.f32.vlgmr.msra.gmra.mrb[28].mxu0 %vm219_vm2, %v2486_v35 }
0x105c   :  { %6240 = vmatpush3.xpose.msk.msra.mxu1 %vm219_vm2, %v2566_v33  ;;  %6241 = vmatprep.mubr.msk.f32.mxu1 %vm6933_vm1, %v6932_v5 }
0x105d   :  { %6249 = vmatprep.subr.mxu1 %v6932_v5  ;;  %6246 = vmatprep.mubr.msk.f32.mxu0 %vm6933_vm1, %v6932_v5 }
0x105f   :  { %6242 = vmatmul.mubr.msk.f32.vlgmr.msra.gmra.mrb[30].mxu1 %vm219_vm2, %v2564_v12 }
0x1060   :  { %6251 = vmatprep.mubr.msk.f32.mxu1 %vm6933_vm1, %v6932_v5 }
0x112a   :  { %v7369_v36 = vpop.f32.mrb[26].mxu0 }
0x112b   :  { %v6228_v37 = vpop.f32.mrb[27].mxu0 }
0x112e   :  { %v7371_v38 = vpop.f32.mrb[28].mxu1  ;;  %v2559_v39 = vpop.f32.mrb[28].mxu0 }
0x112f   :  { %v6233_v40 = vpop.f32.mrb[29].mxu1  ;;  %v6238_v41 = vpop.f32.mrb[29].mxu0  ;;  %v2641_v43 = vsel %vm219_vm2, %v2559_v39, -inf }
0x1130   :  { %2642 = vmax.xlane.f32.xlu0 %v2641_v43  ;;  %v5769_v40 = vld [vmem:[%s7973_s3 + $0x30] sm:$0xff]  ;;  %v5770_v43 = vld [vmem:[%s7973_s3 + $0x38] sm:$0xff] }
0x1132   :  { %v2637_v44 = vpop.f32.mrb[30].mxu1 }
0x1133   :  { %v6243_v45 = vpop.f32.mrb[31].mxu1  ;;  %v2644_v46 = vsel %vm219_vm2, %v2637_v44, -inf }
0x1134   :  { %2645 = vmax.xlane.f32.xlu1 %v2644_v46 }
0x1145   :  { %2739 = vrot.lane.b32.xlu1 %v7257_v9, %s6943_s30 }
0x1146   :  { %2663 = vrot.lane.b32.xlu0 %v7259_v11, %s6943_s30 }
0x1149   :  { %2817 = vrot.lane.b32.xlu1 %v7259_v11, %s6941_s28 }
0x114d   :  { %2895 = vrot.lane.b32.xlu1 %v7257_v9, %s6941_s28 }
0x1151   :  { %2893 = vrot.lane.b32.xlu1 %v7286_v54, %s6942_s29 }
0x11bd   :  { %v2643_v48 = vpop.xlane.xlu0 %2642 }
0x11be   :  { %v2647_v60 = vsub.f32 %v2559_v39, %v2643_v48 }
0x11c0   :  { %v2649_v18 = vmul.f32 1.442695, %v2647_v60 }
0x11c1   :  { %v2664_v52 = vpop.permute.xlu0 %2663  ;;  %v2646_v55 = vpop.xlane.xlu1 %2645 }
0x11c2   :  { %6767 = vpow2.f32 %v2649_v18  ;;  %v2648_v49 = vsub.f32 %v2637_v44, %v2646_v55  ;;  %6245 = vmatpush3.msra.mxu0 %v2664_v52  ;;  %v5771_v44 = vld [vmem:[%s7973_s3 + $0x40] sm:$0xff] }
0x11c3   :  { %6254 = vmatprep.subr.mxu0 %v6932_v5  ;;  %v6489_v45 = vpack.c.bf16 %v5771_v44, %v5770_v43  ;;  %v5760_v52 = vld [vmem:[%s7973_s3 + $0x20] ss:$0 sm:$0xff] }
0x11c4   :  { %v2651_v16 = vmul.f32 1.442695, %v2648_v49  ;;  %v1646_v55 = vadd.f32 %v5760_v52, %v7295_v30  ;;  %v1651_v49 = vadd.f32 %v7293_v29, %v5760_v52 }
0x11c5   :  { %v2740_v53 = vpop.permute.xlu1 %2739 }
0x11c6   :  { %6769 = vpow2.f32 %v2651_v16  ;;  %6250 = vmatpush3.msra.mxu1 %v2740_v53  ;;  %v6903_v16 = vld [vmem:[%s7970_s0] sm:$0xff] }
0x11c7   :  { %6259 = vmatprep.subr.mxu1 %v6932_v5  ;;  %v1654_v53 = vadd.f32 %v6903_v16, %v1646_v55 }
0x11c9   :  { %v2818_v63 = vpop.permute.xlu1 %2817 }
0x11cc   :  { %v6768_v59 = vpop.eup %6767 }
0x11cd   :  { %v2653_v1 = vsel %vm219_vm2, %v6768_v59, 0.0  ;;  %v2896_v4 = vpop.permute.xlu1 %2895 }
0x11ce   :  { %2654 = vadd.xlane.f32.xlu0 %v2653_v1  ;;  %v6904_v1 = vld [vmem:[%s7970_s0 + $0x8] sm:$0xff] }
0x11d0   :  { %v6770_v54 = vpop.eup %6769 }
0x11d1   :  { %v2656_v56 = vsel %vm219_vm2, %v6770_v54, 0.0  ;;  %v2894_v7 = vpop.permute.xlu1 %2893 }
0x11d2   :  { %2657 = vadd.xlane.f32.xlu0 %v2656_v56 }
0x11e8   :  { %2815 = vrot.lane.b32.xlu0 %v7278_v27, %s6942_s29 }
0x125b   :  { %v2655_v57 = vpop.xlane.xlu0 %2654 }
0x125c   :  { %6771 = vrcp.f32 %v2655_v57 }
0x125f   :  { %v2658_v61 = vpop.xlane.xlu0 %2657 }
0x1260   :  { %6773 = vrcp.f32 %v2658_v61 }
0x1263   :  { %v2816_v27 = vpop.permute.xlu0 %2815 }
0x1266   :  { %v6772_v0 = vpop.eup %6771 }
0x1267   :  { %v2661_v2 = vmul.f32 %v6772_v0, %v6768_v59  ;;  %v1656_v59 = vsel %vm33_vm0, %v1654_v53, 0.0 }
0x1269   :  { %6247 = vmatmul.mubr.msk.f32.vlgmr.msra.gmra.mrb[30].mxu0 %vm219_vm2, %v2661_v2 }
0x126a   :  { %v6774_v3 = vpop.eup %6773  ;;  %6255 = vmatpush3.xpose.msk.msra.mxu0 %vm219_vm2, %v2818_v63  ;;  %6256 = vmatprep.mubr.msk.f32.mxu0 %vm6933_vm1, %v6932_v5 }
0x126b   :  { %v2662_v6 = vmul.f32 %v6774_v3, %v6770_v54  ;;  %6264 = vmatprep.subr.mxu0 %v6932_v5  ;;  %v1655_v54 = vadd.f32 %v6904_v1, %v1651_v49 }
0x126d   :  { %6252 = vmatmul.mubr.msk.f32.vlgmr.msra.gmra.mrb[32].mxu1 %vm219_vm2, %v2662_v6  ;;  %6257 = vmatmul.mubr.msk.f32.vlgmr.msra.gmra.mrb[32].mxu0 %vm219_vm2, %v2816_v27  ;;  %v1659_v56 = vsel %vm33_vm0, %v1655_v54, 0.0 }
0x126e   :  { %6260 = vmatpush3.xpose.msk.msra.mxu1 %vm219_vm2, %v2896_v4  ;;  %6261 = vmatprep.mubr.msk.f32.mxu1 %vm6933_vm1, %v6932_v5 }
0x126f   :  { %6269 = vmatprep.subr.mxu1 %v6932_v5  ;;  %6266 = vmatprep.mubr.msk.f32.mxu0 %vm6933_vm1, %v6932_v5 }
0x1271   :  { %6262 = vmatmul.mubr.msk.f32.vlgmr.msra.gmra.mrb[34].mxu1 %vm219_vm2, %v2894_v7 }
0x1272   :  { %6271 = vmatprep.mubr.msk.f32.mxu1 %vm6933_vm1, %v6932_v5 }
0x133c   :  { %v2735_v8 = vpop.f32.mrb[30].mxu0 }
0x133d   :  { %v6248_v10 = vpop.f32.mrb[31].mxu0 }
0x1340   :  { %v2811_v13 = vpop.f32.mrb[32].mxu1  ;;  %v2889_v15 = vpop.f32.mrb[32].mxu0 }
0x1341   :  { %v6253_v17 = vpop.f32.mrb[33].mxu1  ;;  %v6258_v19 = vpop.f32.mrb[33].mxu0  ;;  %v2971_v20 = vsel %vm219_vm2, %v2889_v15, -inf }
0x1342   :  { %2972 = vmax.xlane.f32.xlu0 %v2971_v20 }
0x1344   :  { %v2967_v21 = vpop.f32.mrb[34].mxu1 }
0x1345   :  { %v6263_v22 = vpop.f32.mrb[35].mxu1  ;;  %v2974_v23 = vsel %vm219_vm2, %v2967_v21, -inf }
0x1346   :  { %2975 = vmax.xlane.f32.xlu1 %v2974_v23  ;;  %v6905_v22 = vld [vmem:[%s7971_s1 + $0x8] sm:$0xff] }
0x1357   :  { %3069 = vrot.lane.b32.xlu1 %v7257_v9, %s6944_s8 }
0x135b   :  { %3147 = vrot.lane.b32.xlu1 %v7369_v36, %s6945_s9 }
0x135f   :  { %3149 = vrot.lane.b32.xlu1 %v7371_v38, %s6945_s9 }
0x1363   :  { %3157 = vrot.lane.b32.xlu1 %v2811_v13, %s6946_s10  ;;  %v5802_v13 = vld [vmem:[%s7973_s3 + $0x48] ss:$0 sm:$0xff] }
0x13cf   :  { %v2973_v5 = vpop.xlane.xlu0 %2972 }
0x13d0   :  { %v2977_v24 = vsub.f32 %v2889_v15, %v2973_v5  ;;  %v6906_v5 = vld [vmem:[%s7971_s1] sm:$0xff] }
0x13d2   :  { %v2979_v25 = vmul.f32 1.442695, %v2977_v24 }
0x13d3   :  { %v2976_v14 = vpop.xlane.xlu1 %2975 }
0x13d4   :  { %6775 = vpow2.f32 %v2979_v25  ;;  %v2978_v26 = vsub.f32 %v2967_v21, %v2976_v14 }
0x13d6   :  { %v2981_v51 = vmul.f32 1.442695, %v2978_v26 }
0x13d7   :  { %v3070_v28 = vpop.permute.xlu1 %3069 }
0x13d8   :  { %6777 = vpow2.f32 %v2981_v51  ;;  %6270 = vmatpush3.msra.mxu1 %v3070_v28 }
0x13db   :  { %v3148_v57 = vpop.permute.xlu1 %3147 }
0x13dc   :  { %v3169_v29 = vsel %vm219_vm2, %v7331_v58, %v3148_v57 }
0x13de   :  { %v6776_v31 = vpop.eup %6775 }
0x13df   :  { %v2983_v9 = vsel %vm219_vm2, %v6776_v31, 0.0  ;;  %v3150_v30 = vpop.permute.xlu1 %3149 }
0x13e0   :  { %2984 = vadd.xlane.f32.xlu0 %v2983_v9  ;;  %v3170_v4 = vsel %vm219_vm2, %v7333_v62, %v3150_v30 }
0x13e2   :  { %v6778_v32 = vpop.eup %6777 }
0x13e3   :  { %v2986_v33 = vsel %vm219_vm2, %v6778_v32, 0.0  ;;  %v3158_v63 = vpop.permute.xlu1 %3157 }
0x13e4   :  { %2987 = vadd.xlane.f32.xlu0 %v2986_v33  ;;  %v3172_v6 = vsel %vm1563_vm4, %v3170_v4, %v3158_v63 }
0x13fa   :  { %2993 = vrot.lane.b32.xlu0 %v7259_v11, %s6944_s8  ;;  %v5768_v11 = vld [vmem:[%s7973_s3 + $0x28] sm:$0xff] }
0x13fb   :  { %v6485_v41 = vpack.c.bf16 %v5769_v40, %v5768_v11 }
0x13fd   :  { %6486 = vmatprep.subr.bf16.mxu1 %v6485_v41 }
0x13fe   :  { %3155 = vrot.lane.b32.xlu0 %v2735_v8, %s6946_s10 }
0x146d   :  { %v2985_v34 = vpop.xlane.xlu0 %2984 }
0x146e   :  { %6779 = vrcp.f32 %v2985_v34 }
0x1471   :  { %v2988_v35 = vpop.xlane.xlu0 %2987 }
0x1472   :  { %6781 = vrcp.f32 %v2988_v35 }
0x1475   :  { %v2994_v12 = vpop.permute.xlu0 %2993 }
0x1476   :  { %6265 = vmatpush3.msra.mxu0 %v2994_v12 }
0x1478   :  { %v6780_v36 = vpop.eup %6779 }
0x1479   :  { %v2991_v37 = vmul.f32 %v6780_v36, %v6776_v31  ;;  %v3156_v61 = vpop.permute.xlu0 %3155 }
0x147a   :  { %v3171_v0 = vsel %vm1563_vm4, %v3169_v29, %v3156_v61 }
0x147b   :  { %6267 = vmatmul.mubr.msk.f32.vlgmr.msra.gmra.mrb[34].mxu0 %vm219_vm2, %v2991_v37 }
0x147c   :  { %v6782_v38 = vpop.eup %6781 }
0x147d   :  { %v2992_v39 = vmul.f32 %v6782_v38, %v6778_v32 }
0x147f   :  { %6272 = vmatmul.mubr.msk.f32.vlgmr.msra.gmra.mrb[36].mxu1 %vm219_vm2, %v2992_v39 }
0x1480   :  { %6488 = vmatpush3.bf16.msra.mxu1 %v6485_v41 }
0x1481   :  { %6490 = vmatprep.subr.bf16.mxu1 %v6489_v45 }
0x1484   :  { %6492 = vmatpush3.bf16.msra.mxu1 %v6489_v45 }
0x154e   :  { %v3065_v46 = vpop.f32.mrb[34].mxu0 }
0x154f   :  { %3163 = vrot.lane.b32.xlu0 %v3065_v46, %s6947_s17  ;;  %v6268_v48 = vpop.f32.mrb[35].mxu0 }
0x1550   :  { %v1684_v48 = vsub.s32 6, %v7022_v42 }
0x1552   :  { %v3141_v60 = vpop.f32.mrb[36].mxu1 }
0x1553   :  { %3165 = vrot.lane.b32.xlu1 %v3141_v60, %s6947_s17  ;;  %v6273_v18 = vpop.f32.mrb[37].mxu1  ;;  %v1690_v60 = vsub.s32 7, %v7022_v42 }
0x1554   :  { %v7480_v18 = vld [vmem:[%s7976_s6] sm:$0xff] }
0x1555   :  { %v7483_v52 = vrot.slane %v7480_v18, %v1684_v48  ;;  %v7486_v16 = vrot.slane %v7480_v18, %v1690_v60  ;;  %v5805_v60 = vld [vmem:[%s7972_s2 + $0x50] sm:$0xff] }
0x156e   :  { %1657 = vadd.xlane.f32.xlu0 %v1656_v59 }
0x1572   :  { %1660 = vadd.xlane.f32.xlu0 %v1659_v56 }
0x15c1   :  { %v3164_v2 = vpop.permute.xlu0 %3163 }
0x15c2   :  { %v3173_v3 = vsel %vm1566_vm3, %v3171_v0, %v3164_v2 }
0x15c3   :  { %6282 = vmatprep.mubr.msk.f32.mxu1 %vm33_vm0, %v3173_v3 }
0x15c5   :  { %v3166_v27 = vpop.permute.xlu1 %3165 }
0x15c6   :  { %v3174_v7 = vsel %vm1566_vm3, %v3172_v6, %v3166_v27 }
0x15c7   :  { %6283 = vmatmul.mubr.msk.f32.vlgmr.msra.gmra.mrb[38].mxu1 %vm33_vm0, %v3174_v7 }
0x15fb   :  { %v1658_v8 = vpop.xlane.xlu0 %1657 }
0x15fc   :  { %v1662_v58 = vmul.f32 0.03125, %v1658_v8 }
0x15fe   :  { %v1664_v17 = vsub.f32 %v1654_v53, %v1662_v58 }
0x15ff   :  { %v1661_v10 = vpop.xlane.xlu0 %1660 }
0x1600   :  { %v1663_v19 = vmul.f32 0.03125, %v1661_v10  ;;  %v1666_v26 = vmul.f32 %v1664_v17, %v1664_v17 }
0x1602   :  { %v1665_v25 = vsub.f32 %v1655_v54, %v1663_v19  ;;  %v1668_v28 = vsel %vm33_vm0, %v1666_v26, 0.0 }
0x1604   :  { %v1667_v31 = vmul.f32 %v1665_v25, %v1665_v25 }
0x1606   :  { %v1671_v9 = vsel %vm33_vm0, %v1667_v31, 0.0 }
0x169a   :  { %v6284_v15 = vpop.f32.mrb[38].mxu1 }
0x169b   :  { %v3257_v20 = vadd.f32 %v6284_v15, %v5802_v13  ;;  %v3251_v21 = vpop.f32.mrb[39].mxu1 }
0x169c   :  { %v3252_v62 = vadd.f32 %v5802_v13, %v3251_v21 }
0x169d   :  { %v3261_v23 = vadd.f32 %v6905_v22, %v3257_v20 }
0x169e   :  { %v3260_v24 = vadd.f32 %v6906_v5, %v3252_v62 }
0x169f   :  { %v3265_v14 = vsel %vm33_vm0, %v3261_v23, 0.0 }
0x16a0   :  { %3266 = vadd.xlane.f32.xlu0 %v3265_v14  ;;  %v3262_v51 = vsel %vm33_vm0, %v3260_v24, 0.0 }
0x16a1   :  { %3263 = vadd.xlane.f32.xlu1 %v3262_v51 }
0x16a4   :  { %1669 = vadd.xlane.f32.xlu0 %v1668_v28 }
0x16a8   :  { %1672 = vadd.xlane.f32.xlu0 %v1671_v9 }
0x172d   :  { %v3267_v32 = vpop.xlane.xlu0 %3266 }
0x172e   :  { %v3269_v33 = vmul.f32 0.03125, %v3267_v32  ;;  %v3264_v34 = vpop.xlane.xlu1 %3263 }
0x172f   :  { %v3268_v35 = vmul.f32 0.03125, %v3264_v34 }
0x1730   :  { %v3271_v12 = vsub.f32 %v3261_v23, %v3269_v33 }
0x1731   :  { %v3270_v36 = vsub.f32 %v3260_v24, %v3268_v35  ;;  %v1670_v37 = vpop.xlane.xlu0 %1669 }
0x1732   :  { %v1674_v38 = vmul.f32 0.03125, %v1670_v37  ;;  %v3273_v43 = vmul.f32 %v3271_v12, %v3271_v12 }
0x1733   :  { %v3272_v39 = vmul.f32 %v3270_v36, %v3270_v36 }
0x1734   :  { %v1676_v11 = vadd.f32 1e-05, %v1674_v38  ;;  %v3277_v46 = vsel %vm33_vm0, %v3273_v43, 0.0 }
0x1735   :  { %v1673_v40 = vpop.xlane.xlu0 %1672  ;;  %v3274_v41 = vsel %vm33_vm0, %v3272_v39, 0.0 }
0x1736   :  { %6783 = vrsqrt.f32 %v1676_v11  ;;  %v1675_v44 = vmul.f32 0.03125, %v1673_v40  ;;  %3275 = vadd.xlane.f32.xlu1 %v3274_v41  ;;  %v3346_v11 = vsub.s32 4, %v7022_v42  ;;  %v3354_v40 = vsub.s32 5, %v7022_v42 }
0x1738   :  { %v1677_v45 = vadd.f32 1e-05, %v1675_v44  ;;  %v3347_v41 = vrot.slane %v7480_v18, %v3346_v11 }
0x173a   :  { %6785 = vrsqrt.f32 %v1677_v45  ;;  %3278 = vadd.xlane.f32.xlu1 %v3277_v46  ;;  %v3355_v45 = vrot.slane %v7480_v18, %v3354_v40  ;;  %v5808_v18 = vld [vmem:[%s7972_s2 + $0x68] sm:$0xff] }
0x1740   :  { %v6784_v55 = vpop.eup %6783 }
0x1741   :  { %v1680_v49 = vmul.f32 %v6784_v55, %v1664_v17  ;;  %v5806_v55 = vld [vmem:[%s7972_s2 + $0x58] sm:$0xff] }
0x1743   :  { %v1686_v53 = vmul.f32 %v7483_v52, %v1680_v49  ;;  %v6493_v49 = vpack.c.bf16 %v5806_v55, %v5805_v60 }
0x1744   :  { %v6786_v59 = vpop.eup %6785 }
0x1745   :  { %v7490_v1 = vadd.f32 %v7486_v16, %v1686_v53  ;;  %v1681_v54 = vmul.f32 %v6786_v59, %v1665_v25  ;;  %6494 = vmatprep.subr.bf16.mxu1 %v6493_v49  ;;  %v5807_v53 = vld [vmem:[%s7972_s2 + $0x60] sm:$0xff] }
0x1746   :  { %6496 = vmatpush3.bf16.msra.mxu1 %v6493_v49  ;;  %v6497_v59 = vpack.c.bf16 %v5808_v18, %v5807_v53 }
0x1747   :  { %v3292_v56 = vsel %vm33_vm0, %v7490_v1, 0.0  ;;  %v1687_v57 = vmul.f32 %v7483_v52, %v1681_v54 }
0x1748   :  { %3293 = vadd.xlane.f32.xlu0 %v3292_v56  ;;  %6498 = vmatprep.subr.bf16.mxu1 %v6497_v59 }
0x1749   :  { %v7496_v30 = vadd.f32 %v7486_v16, %v1687_v57 }
0x174a   :  { %6500 = vmatpush3.bf16.msra.mxu1 %v6497_v59 }
0x174b   :  { %v3298_v61 = vsel %vm33_vm0, %v7496_v30, 0.0 }
0x174c   :  { %3299 = vadd.xlane.f32.xlu0 %v3298_v61 }
0x17c3   :  { %v3276_v29 = vpop.xlane.xlu1 %3275 }
0x17c4   :  { %v3280_v63 = vmul.f32 0.03125, %v3276_v29 }
0x17c6   :  { %v3282_v0 = vadd.f32 1e-05, %v3280_v63 }
0x17c7   :  { %v3279_v2 = vpop.xlane.xlu1 %3278 }
0x17c8   :  { %6787 = vrsqrt.f32 %v3282_v0  ;;  %v3281_v3 = vmul.f32 0.03125, %v3279_v2 }
0x17ca   :  { %v3283_v4 = vadd.f32 1e-05, %v3281_v3 }
0x17cc   :  { %6789 = vrsqrt.f32 %v3283_v4 }
0x17d2   :  { %v6788_v6 = vpop.eup %6787 }
0x17d3   :  { %v3286_v27 = vmul.f32 %v6788_v6, %v3270_v36 }
0x17d5   :  { %v3294_v7 = vpop.xlane.xlu0 %3293  ;;  %v3288_v8 = vmul.f32 %v3286_v27, %v7483_v52 }
0x17d6   :  { %v6790_v58 = vpop.eup %6789  ;;  %v3304_v10 = vmul.f32 0.03125, %v3294_v7 }
0x17d7   :  { %v7502_v13 = vadd.f32 %v3288_v8, %v7486_v16  ;;  %v3287_v15 = vmul.f32 %v6790_v58, %v3271_v12 }
0x17d8   :  { %v3308_v17 = vsub.f32 %v7490_v1, %v3304_v10 }
0x17d9   :  { %v3300_v19 = vpop.xlane.xlu0 %3299  ;;  %v3295_v20 = vsel %vm33_vm0, %v7502_v13, 0.0  ;;  %v3289_v21 = vmul.f32 %v3287_v15, %v7483_v52 }
0x17da   :  { %v3306_v62 = vmul.f32 0.03125, %v3300_v19  ;;  %3296 = vadd.xlane.f32.xlu1 %v3295_v20  ;;  %v3312_v22 = vmul.f32 %v3308_v17, %v3308_v17 }
0x17db   :  { %v7509_v23 = vadd.f32 %v3289_v21, %v7486_v16 }
0x17dc   :  { %v3310_v5 = vsub.f32 %v7496_v30, %v3306_v62  ;;  %v3316_v24 = vsel %vm33_vm0, %v3312_v22, 0.0  ;;  %v5815_v62 = vld [vmem:[%s7972_s2 + $0x70] ss:$0 sm:$0xff] }
0x17dd   :  { %3317 = vadd.xlane.f32.xlu0 %v3316_v24  ;;  %v3301_v25 = vsel %vm33_vm0, %v7509_v23, 0.0 }
0x17de   :  { %3302 = vadd.xlane.f32.xlu1 %v3301_v25  ;;  %v3314_v14 = vmul.f32 %v3310_v5, %v3310_v5 }
0x17e0   :  { %v3322_v26 = vsel %vm33_vm0, %v3314_v14, 0.0 }
0x17e1   :  { %3323 = vadd.xlane.f32.xlu0 %v3322_v26 }
0x1867   :  { %v3297_v51 = vpop.xlane.xlu1 %3296 }
0x1868   :  { %v3305_v28 = vmul.f32 0.03125, %v3297_v51 }
0x186a   :  { %v3309_v31 = vsub.f32 %v7502_v13, %v3305_v28  ;;  %v3318_v9 = vpop.xlane.xlu0 %3317 }
0x186b   :  { %v3328_v32 = vmul.f32 0.03125, %v3318_v9  ;;  %v3303_v33 = vpop.xlane.xlu1 %3302 }
0x186c   :  { %v3307_v34 = vmul.f32 0.03125, %v3303_v33  ;;  %v3313_v35 = vmul.f32 %v3309_v31, %v3309_v31 }
0x186d   :  { %v3332_v12 = vadd.f32 1e-05, %v3328_v32 }
0x186e   :  { %v3311_v36 = vsub.f32 %v7509_v23, %v3307_v34  ;;  %v3319_v37 = vsel %vm33_vm0, %v3313_v35, 0.0  ;;  %v3324_v54 = vpop.xlane.xlu0 %3323 }
0x186f   :  { %6791 = vrsqrt.f32 %v3332_v12  ;;  %3320 = vadd.xlane.f32.xlu1 %v3319_v37  ;;  %v3330_v56 = vmul.f32 0.03125, %v3324_v54 }
0x1870   :  { %v3315_v38 = vmul.f32 %v3311_v36, %v3311_v36 }
0x1871   :  { %v3334_v57 = vadd.f32 1e-05, %v3330_v56 }
0x1872   :  { %v3325_v39 = vsel %vm33_vm0, %v3315_v38, 0.0 }
0x1873   :  { %3326 = vadd.xlane.f32.xlu1 %v3325_v39  ;;  %6793 = vrsqrt.f32 %v3334_v57 }
0x1879   :  { %v6792_v43 = vpop.eup %6791 }
0x187a   :  { %v3340_v44 = vmul.f32 %v6792_v43, %v3308_v17 }
0x187c   :  { %v3348_v46 = vmul.f32 %v3347_v41, %v3340_v44 }
0x187d   :  { %v6794_v4 = vpop.eup %6793 }
0x187e   :  { %v3356_v48 = vadd.f32 %v3355_v45, %v3348_v46  ;;  %v3342_v6 = vmul.f32 %v6794_v4, %v3310_v5 }
0x1880   :  { %6293 = vmatprep.mubr.msk.f32.mxu1 %vm33_vm0, %v3356_v48  ;;  %v3350_v8 = vmul.f32 %v3347_v41, %v3342_v6 }
0x1882   :  { %v3358_v19 = vadd.f32 %v3355_v45, %v3350_v8 }
0x18fc   :  { %v3321_v61 = vpop.xlane.xlu1 %3320 }
0x18fd   :  { %v3329_v29 = vmul.f32 0.03125, %v3321_v61 }
0x18ff   :  { %v3333_v63 = vadd.f32 1e-05, %v3329_v29 }
0x1900   :  { %v3327_v0 = vpop.xlane.xlu1 %3326 }
0x1901   :  { %6795 = vrsqrt.f32 %v3333_v63  ;;  %v3331_v2 = vmul.f32 0.03125, %v3327_v0 }
0x1903   :  { %v3335_v3 = vadd.f32 1e-05, %v3331_v2 }
0x1905   :  { %6797 = vrsqrt.f32 %v3335_v3 }
0x190b   :  { %v6796_v27 = vpop.eup %6795 }
0x190c   :  { %v3341_v7 = vmul.f32 %v6796_v27, %v3309_v31 }
0x190e   :  { %v3349_v58 = vmul.f32 %v3347_v41, %v3341_v7 }
0x190f   :  { %v6798_v10 = vpop.eup %6797 }
0x1910   :  { %v3357_v15 = vadd.f32 %v3355_v45, %v3349_v58  ;;  %v3343_v17 = vmul.f32 %v6798_v10, %v3311_v36 }
0x1912   :  { %6294 = vmatmul.mubr.msk.f32.vlgmr.msra.gmra.mrb[40].mxu1 %vm33_vm0, %v3357_v15  ;;  %v3351_v20 = vmul.f32 %v3347_v41, %v3343_v17 }
0x1913   :  { %6296 = vmatprep.mubr.msk.f32.mxu1 %vm33_vm0, %v3358_v19 }
0x1914   :  { %v3359_v21 = vadd.f32 %v3355_v45, %v3351_v20 }
0x1916   :  { %6297 = vmatmul.mubr.msk.f32.gmra.mrb[42].mxu1 %vm33_vm0, %v3359_v21 }
0x19e5   :  { %v6295_v22 = vpop.f32.mrb[40].mxu1 }
0x19e6   :  { %v3460_v5 = vadd.f32 %v6295_v22, %v5815_v62  ;;  %v3454_v24 = vpop.f32.mrb[41].mxu1 }
0x19e7   :  { %v3455_v25 = vadd.f32 %v5815_v62, %v3454_v24 }
0x19e8   :  { %v7573_v41 = vmul.f32 0.35355338, %v3460_v5 }
0x19e9   :  { %v6298_v14 = vpop.f32.mrb[42].mxu1  ;;  %v7543_v26 = vpack.i.bf16 %v3460_v5, %v3455_v25  ;;  %v7545_v51 = vmul.f32 0.35355338, %v3455_v25 }
0x19ea   :  { %v3470_v28 = vadd.f32 %v6298_v14, %v5815_v62  ;;  %v3464_v31 = vpop.f32.mrb[43].mxu1 }
0x19eb   :  { %v3465_v9 = vadd.f32 %v5815_v62, %v3464_v31  ;;  %6632 = vrot.lane.b32.xlu0 %v7543_v26, %s6934_s21  ;;  %6303 = vmatprep.mubr.msk.f32.mxu0 %vm219_vm2, %v7545_v51 }
0x19ec   :  { %v7577_v43 = vmul.f32 0.35355338, %v3470_v28 }
0x19ed   :  { %v7551_v32 = vpack.i.bf16 %v3470_v28, %v3465_v9  ;;  %v7553_v33 = vmul.f32 0.35355338, %v3465_v9 }
0x19ef   :  { %6637 = vrot.lane.b32.xlu1 %v7551_v32, %s6934_s21  ;;  %6310 = vmatprep.mubr.msk.f32.mxu1 %vm219_vm2, %v7553_v33 }
0x1a5d   :  { %v6633_v34 = vpop.permute.xlu0 %6632 }
0x1a5e   :  { %v6635_v35 = vunpack.i.h.bf16 %v6633_v34  ;;  %v6634_v12 = vunpack.i.l.bf16 %v6633_v34 }
0x1a60   :  { %v6501_v37 = vpack.c.bf16 %v6635_v35, %v6634_v12 }
0x1a61   :  { %v6638_v38 = vpop.permute.xlu1 %6637 }
0x1a62   :  { %v6640_v39 = vunpack.i.h.bf16 %v6638_v38  ;;  %v6639_v11 = vunpack.i.l.bf16 %v6638_v38  ;;  %6503 = vmatprep.subr.msk.bf16.mxu0 %vm7561_vm5, %v6501_v37 }
0x1a63   :  { %6506 = vmatpush3.bf16.xpose.msk.msra.mxu0 %vm7561_vm5, %v6501_v37 }
0x1a64   :  { %v6507_v40 = vpack.c.bf16 %v6640_v39, %v6639_v11 }
0x1a66   :  { %6509 = vmatprep.subr.msk.bf16.mxu1 %vm7561_vm5, %v6507_v40 }
0x1a67   :  { %6512 = vmatpush3.bf16.xpose.msk.msra.mxu1 %vm7561_vm5, %v6507_v40 }
0x1a6a   :  { %6304 = vmatmul.mubr.msk.f32.vlgmr.msra.gmra.mrb[36].mxu0 %vm219_vm2, %v7573_v41 }
0x1a6e   :  { %6311 = vmatmul.mubr.msk.f32.vlgmr.msra.gmra.mrb[44].mxu1 %vm219_vm2, %v7577_v43 }
0x1b3d   :  { %v6305_v44 = vpop.f32.mrb[36].mxu0 }
0x1b3e   :  { %v3559_v45 = vpop.f32.mrb[37].mxu0  ;;  %v3662_v46 = vsel %vm1563_vm4, %v6305_v44, -inf }
0x1b3f   :  { %3663 = vmax.xlane.f32.xlu0 %v3662_v46  ;;  %v3659_v48 = vsel %vm1563_vm4, %v3559_v45, -inf }
0x1b40   :  { %3660 = vmax.xlane.f32.xlu1 %v3659_v48 }
0x1b41   :  { %v6312_v60 = vpop.f32.mrb[44].mxu1 }
0x1b42   :  { %v3650_v55 = vpop.f32.mrb[45].mxu1  ;;  %v3668_v49 = vsel %vm1563_vm4, %v6312_v60, -inf }
0x1b43   :  { %v3665_v53 = vsel %vm1563_vm4, %v3650_v55, -inf }
0x1b44   :  { %3666 = vmax.xlane.f32.xlu0 %v3665_v53  ;;  %3669 = vmax.xlane.f32.xlu1 %v3668_v49 }
0x1b55   :  { %6647 = vrot.lane.b32.xlu1 %v7551_v32, %s6937_s24 }
0x1b59   :  { %6652 = vrot.lane.b32.xlu1 %v7543_v26, %s6935_s22 }
0x1b5a   :  { %6642 = vrot.lane.b32.xlu0 %v7543_v26, %s6937_s24 }
0x1b5d   :  { %6657 = vrot.lane.b32.xlu1 %v7551_v32, %s6935_s22 }
0x1bcc   :  { %v3664_v18 = vpop.xlane.xlu0 %3663 }
0x1bcd   :  { %v3672_v59 = vsub.f32 %v6305_v44, %v3664_v18  ;;  %v3661_v54 = vpop.xlane.xlu1 %3660 }
0x1bce   :  { %v3671_v56 = vsub.f32 %v3559_v45, %v3661_v54 }
0x1bcf   :  { %v3677_v57 = vmul.f32 1.442695, %v3672_v59 }
0x1bd0   :  { %v3675_v61 = vmul.f32 1.442695, %v3671_v56 }
0x1bd1   :  { %6799 = vpow2.f32 %v3677_v57  ;;  %v3667_v29 = vpop.xlane.xlu0 %3666  ;;  %v3670_v63 = vpop.xlane.xlu1 %3669 }
0x1bd2   :  { %6801 = vpow2.f32 %v3675_v61  ;;  %v3673_v0 = vsub.f32 %v3650_v55, %v3667_v29  ;;  %v3674_v2 = vsub.f32 %v6312_v60, %v3670_v63 }
0x1bd4   :  { %v3679_v3 = vmul.f32 1.442695, %v3673_v0  ;;  %v3681_v4 = vmul.f32 1.442695, %v3674_v2 }
0x1bd5   :  { %v6643_v6 = vpop.permute.xlu0 %6642  ;;  %v6648_v27 = vpop.permute.xlu1 %6647 }
0x1bd6   :  { %6803 = vpow2.f32 %v3679_v3  ;;  %v6645_v7 = vunpack.i.h.bf16 %v6643_v6  ;;  %v6644_v8 = vunpack.i.l.bf16 %v6643_v6  ;;  %v6650_v58 = vunpack.i.h.bf16 %v6648_v27 }
0x1bd7   :  { %6805 = vpow2.f32 %v3681_v4  ;;  %v6649_v10 = vunpack.i.l.bf16 %v6648_v27 }
0x1bd8   :  { %v6513_v15 = vpack.c.bf16 %v6645_v7, %v6644_v8 }
0x1bd9   :  { %v6517_v17 = vpack.c.bf16 %v6650_v58, %v6649_v10  ;;  %v6653_v19 = vpop.permute.xlu1 %6652 }
0x1bda   :  { %v6655_v20 = vunpack.i.h.bf16 %v6653_v19  ;;  %v6654_v21 = vunpack.i.l.bf16 %v6653_v19  ;;  %6514 = vmatprep.subr.bf16.mxu0 %v6513_v15 }
0x1bdb   :  { %v6800_v62 = vpop.eup %6799  ;;  %6518 = vmatprep.subr.bf16.mxu1 %v6517_v17  ;;  %6516 = vmatpush3.bf16.msra.mxu0 %v6513_v15 }
0x1bdc   :  { %v6802_v22 = vpop.eup %6801  ;;  %v6521_v5 = vpack.c.bf16 %v6655_v20, %v6654_v21  ;;  %6520 = vmatpush3.bf16.msra.mxu1 %v6517_v17  ;;  %v3686_v24 = vsel %vm1563_vm4, %v6800_v62, 0.0 }
0x1bdd   :  { %3687 = vadd.xlane.f32.xlu1 %v3686_v24  ;;  %v6658_v25 = vpop.permute.xlu1 %6657  ;;  %v3683_v14 = vsel %vm1563_vm4, %v6802_v22, 0.0 }
0x1bde   :  { %v6660_v28 = vunpack.i.h.bf16 %v6658_v25  ;;  %v6659_v31 = vunpack.i.l.bf16 %v6658_v25  ;;  %3684 = vadd.xlane.f32.xlu0 %v3683_v14  ;;  %6523 = vmatprep.subr.msk.bf16.mxu0 %vm7561_vm5, %v6521_v5 }
0x1be0   :  { %v6804_v9 = vpop.eup %6803  ;;  %v6527_v34 = vpack.c.bf16 %v6660_v28, %v6659_v31 }
0x1be1   :  { %v6806_v35 = vpop.eup %6805  ;;  %v3689_v12 = vsel %vm1563_vm4, %v6804_v9, 0.0 }
0x1be2   :  { %3690 = vadd.xlane.f32.xlu0 %v3689_v12  ;;  %v3692_v37 = vsel %vm1563_vm4, %v6806_v35, 0.0  ;;  %6529 = vmatprep.subr.msk.bf16.mxu1 %vm7561_vm5, %v6527_v34 }
0x1be3   :  { %3693 = vadd.xlane.f32.xlu1 %v3692_v37 }
0x1bf4   :  { %3879 = vrot.lane.b32.xlu1 %v7573_v41, %s6936_s23 }
0x1bf8   :  { %3970 = vrot.lane.b32.xlu1 %v7577_v43, %s6936_s23  ;;  %3877 = vrot.lane.b32.xlu0 %v7545_v51, %s6936_s23 }
0x1bfc   :  { %3968 = vrot.lane.b32.xlu0 %v7553_v33, %s6936_s23 }
0x1c6a   :  { %v3688_v38 = vpop.xlane.xlu1 %3687 }
0x1c6b   :  { %6807 = vrcp.f32 %v3688_v38  ;;  %v3685_v39 = vpop.xlane.xlu0 %3684 }
0x1c6c   :  { %6809 = vrcp.f32 %v3685_v39 }
0x1c6f   :  { %v3691_v11 = vpop.xlane.xlu0 %3690 }
0x1c70   :  { %6811 = vrcp.f32 %v3691_v11  ;;  %v3694_v40 = vpop.xlane.xlu1 %3693 }
0x1c71   :  { %6813 = vrcp.f32 %v3694_v40 }
0x1c73   :  { %v3878_v60 = vpop.permute.xlu0 %3877 }
0x1c74   :  { %v3880_v54 = vpop.permute.xlu1 %3879 }
0x1c75   :  { %v6808_v44 = vpop.eup %6807 }
0x1c76   :  { %v6810_v45 = vpop.eup %6809  ;;  %v3700_v48 = vmul.f32 %v6808_v44, %v6800_v62 }
0x1c77   :  { %v3699_v46 = vmul.f32 %v6810_v45, %v6802_v22  ;;  %v3969_v59 = vpop.permute.xlu0 %3968 }
0x1c78   :  { %v3971_v56 = vpop.permute.xlu1 %3970 }
0x1c79   :  { %6317 = vmatprep.mubr.msk.f32.mxu0 %vm1563_vm4, %v3699_v46 }
0x1c7a   :  { %v6812_v55 = vpop.eup %6811  ;;  %6318 = vmatmul.mubr.msk.f32.vlgmr.msra.gmra.mrb[38].mxu0 %vm1563_vm4, %v3700_v48 }
0x1c7b   :  { %v6814_v49 = vpop.eup %6813  ;;  %6526 = vmatpush3.bf16.xpose.msk.msra.mxu0 %vm7561_vm5, %v6521_v5  ;;  %6331 = vmatprep.mubr.msk.f32.mxu0 %vm219_vm2, %v3878_v60  ;;  %v3701_v53 = vmul.f32 %v6812_v55, %v6804_v9 }
0x1c7c   :  { %v3702_v18 = vmul.f32 %v6814_v49, %v6806_v35 }
0x1c7d   :  { %6324 = vmatprep.mubr.msk.f32.mxu1 %vm1563_vm4, %v3701_v53 }
0x1c7e   :  { %6325 = vmatmul.mubr.msk.f32.vlgmr.msra.gmra.mrb[46].mxu1 %vm1563_vm4, %v3702_v18 }
0x1c7f   :  { %6532 = vmatpush3.bf16.xpose.msk.msra.mxu1 %vm7561_vm5, %v6527_v34  ;;  %6338 = vmatprep.mubr.msk.f32.mxu1 %vm219_vm2, %v3969_v59 }
0x1c82   :  { %6332 = vmatmul.mubr.msk.f32.vlgmr.msra.gmra.mrb[40].mxu0 %vm219_vm2, %v3880_v54 }
0x1c86   :  { %6339 = vmatmul.mubr.msk.f32.vlgmr.msra.gmra.mrb[48].mxu1 %vm219_vm2, %v3971_v56 }
0x1d4d   :  { %v7621_v57 = vpop.f32.mrb[38].mxu0 }
0x1d4e   :  { %v7623_v61 = vpop.f32.mrb[39].mxu0 }
0x1d51   :  { %v7625_v29 = vpop.f32.mrb[46].mxu1 }
0x1d52   :  { %v7627_v63 = vpop.f32.mrb[47].mxu1 }
0x1d55   :  { %v6333_v0 = vpop.f32.mrb[40].mxu0 }
0x1d56   :  { %v3959_v2 = vpop.f32.mrb[41].mxu0  ;;  %v4062_v3 = vsel %vm1563_vm4, %v6333_v0, -inf }
0x1d57   :  { %4063 = vmax.xlane.f32.xlu1 %v4062_v3  ;;  %v4059_v4 = vsel %vm1563_vm4, %v3959_v2, -inf }
0x1d58   :  { %4060 = vmax.xlane.f32.xlu0 %v4059_v4 }
0x1d59   :  { %v6340_v6 = vpop.f32.mrb[48].mxu1 }
0x1d5a   :  { %v4050_v27 = vpop.f32.mrb[49].mxu1  ;;  %v4068_v8 = vsel %vm1563_vm4, %v6340_v6, -inf }
0x1d5b   :  { %v4065_v7 = vsel %vm1563_vm4, %v4050_v27, -inf }
0x1d5c   :  { %4066 = vmax.xlane.f32.xlu0 %v4065_v7 }
0x1d60   :  { %4069 = vmax.xlane.f32.xlu0 %v4068_v8 }
0x1d68   :  { %6667 = vrot.lane.b32.xlu1 %v7551_v32, %s6940_s27 }
0x1d6c   :  { %6672 = vrot.lane.b32.xlu1 %v7543_v26, %s6938_s25 }
0x1d70   :  { %6677 = vrot.lane.b32.xlu1 %v7551_v32, %s6938_s25 }
0x1d76   :  { %6662 = vrot.lane.b32.xlu0 %v7543_v26, %s6940_s27 }
0x1de4   :  { %v4064_v58 = vpop.xlane.xlu1 %4063 }
0x1de5   :  { %v4072_v10 = vsub.f32 %v6333_v0, %v4064_v58  ;;  %v4061_v15 = vpop.xlane.xlu0 %4060 }
0x1de6   :  { %v4071_v17 = vsub.f32 %v3959_v2, %v4061_v15 }
0x1de7   :  { %v4077_v19 = vmul.f32 1.442695, %v4072_v10 }
0x1de8   :  { %v4075_v20 = vmul.f32 1.442695, %v4071_v17  ;;  %v6668_v21 = vpop.permute.xlu1 %6667 }
0x1de9   :  { %6815 = vpow2.f32 %v4077_v19  ;;  %v6670_v62 = vunpack.i.h.bf16 %v6668_v21  ;;  %v6669_v22 = vunpack.i.l.bf16 %v6668_v21  ;;  %v4067_v5 = vpop.xlane.xlu0 %4066 }
0x1dea   :  { %6817 = vpow2.f32 %v4075_v20  ;;  %v4073_v24 = vsub.f32 %v4050_v27, %v4067_v5 }
0x1deb   :  { %v6537_v25 = vpack.c.bf16 %v6670_v62, %v6669_v22 }
0x1dec   :  { %v4079_v14 = vmul.f32 1.442695, %v4073_v24  ;;  %v6673_v28 = vpop.permute.xlu1 %6672 }
0x1ded   :  { %6538 = vmatprep.subr.bf16.mxu1 %v6537_v25  ;;  %v4070_v31 = vpop.xlane.xlu0 %4069  ;;  %v6675_v12 = vunpack.i.h.bf16 %v6673_v28  ;;  %v6674_v11 = vunpack.i.l.bf16 %v6673_v28 }
0x1dee   :  { %6819 = vpow2.f32 %v4079_v14  ;;  %v4074_v9 = vsub.f32 %v6340_v6, %v4070_v31  ;;  %6540 = vmatpush3.bf16.msra.mxu1 %v6537_v25 }
0x1def   :  { %v6541_v53 = vpack.c.bf16 %v6675_v12, %v6674_v11 }
0x1df0   :  { %v4081_v34 = vmul.f32 1.442695, %v4074_v9  ;;  %v6678_v35 = vpop.permute.xlu1 %6677 }
0x1df1   :  { %v6680_v37 = vunpack.i.h.bf16 %v6678_v35  ;;  %v6679_v38 = vunpack.i.l.bf16 %v6678_v35  ;;  %v6663_v39 = vpop.permute.xlu0 %6662 }
0x1df2   :  { %6821 = vpow2.f32 %v4081_v34  ;;  %v6665_v40 = vunpack.i.h.bf16 %v6663_v39  ;;  %v6664_v44 = vunpack.i.l.bf16 %v6663_v39 }
0x1df3   :  { %v6816_v45 = vpop.eup %6815  ;;  %v6547_v46 = vpack.c.bf16 %v6680_v37, %v6679_v38 }
0x1df4   :  { %v6818_v48 = vpop.eup %6817  ;;  %v6533_v60 = vpack.c.bf16 %v6665_v40, %v6664_v44  ;;  %v4086_v55 = vsel %vm1563_vm4, %v6816_v45, 0.0 }
0x1df5   :  { %4087 = vadd.xlane.f32.xlu1 %v4086_v55  ;;  %6549 = vmatprep.subr.msk.bf16.mxu1 %vm7561_vm5, %v6547_v46  ;;  %v4083_v49 = vsel %vm1563_vm4, %v6818_v48, 0.0 }
0x1df6   :  { %4084 = vadd.xlane.f32.xlu0 %v4083_v49  ;;  %6534 = vmatprep.subr.bf16.mxu0 %v6533_v60 }
0x1df7   :  { %6536 = vmatpush3.bf16.msra.mxu0 %v6533_v60 }
0x1df8   :  { %v6820_v18 = vpop.eup %6819  ;;  %6543 = vmatprep.subr.msk.bf16.mxu0 %vm7561_vm5, %v6541_v53 }
0x1df9   :  { %v4089_v59 = vsel %vm1563_vm4, %v6820_v18, 0.0 }
0x1dfa   :  { %4090 = vadd.xlane.f32.xlu0 %v4089_v59 }
0x1dfc   :  { %v6822_v54 = vpop.eup %6821 }
0x1dfd   :  { %v4092_v56 = vsel %vm1563_vm4, %v6822_v54, 0.0 }
0x1dfe   :  { %4093 = vadd.xlane.f32.xlu1 %v4092_v56 }
0x1e0f   :  { %4279 = vrot.lane.b32.xlu1 %v7573_v41, %s6939_s26 }
0x1e10   :  { %4277 = vrot.lane.b32.xlu0 %v7545_v51, %s6939_s26 }
0x1e13   :  { %4370 = vrot.lane.b32.xlu1 %v7577_v43, %s6939_s26 }
0x1e14   :  { %4368 = vrot.lane.b32.xlu0 %v7553_v33, %s6939_s26 }
0x1e82   :  { %v4088_v0 = vpop.xlane.xlu1 %4087 }
0x1e83   :  { %6823 = vrcp.f32 %v4088_v0  ;;  %v4085_v2 = vpop.xlane.xlu0 %4084 }
0x1e84   :  { %6825 = vrcp.f32 %v4085_v2 }
0x1e87   :  { %v4091_v3 = vpop.xlane.xlu0 %4090 }
0x1e88   :  { %6827 = vrcp.f32 %v4091_v3 }
0x1e8b   :  { %v4094_v4 = vpop.xlane.xlu1 %4093  ;;  %v4278_v10 = vpop.permute.xlu0 %4277 }
0x1e8c   :  { %6829 = vrcp.f32 %v4094_v4 }
0x1e8d   :  { %v6824_v6 = vpop.eup %6823 }
0x1e8e   :  { %v6826_v27 = vpop.eup %6825  ;;  %v4100_v8 = vmul.f32 %v6824_v6, %v6816_v45 }
0x1e8f   :  { %v4099_v7 = vmul.f32 %v6826_v27, %v6818_v48  ;;  %v4280_v20 = vpop.permute.xlu1 %4279  ;;  %v4369_v21 = vpop.permute.xlu0 %4368 }
0x1e91   :  { %6345 = vmatprep.mubr.msk.f32.mxu0 %vm1563_vm4, %v4099_v7 }
0x1e92   :  { %v6828_v58 = vpop.eup %6827  ;;  %6346 = vmatmul.mubr.msk.f32.vlgmr.msra.gmra.mrb[42].mxu0 %vm1563_vm4, %v4100_v8 }
0x1e93   :  { %6546 = vmatpush3.bf16.xpose.msk.msra.mxu0 %vm7561_vm5, %v6541_v53  ;;  %6359 = vmatprep.mubr.msk.f32.mxu0 %vm219_vm2, %v4278_v10  ;;  %v4101_v15 = vmul.f32 %v6828_v58, %v6820_v18  ;;  %v4371_v62 = vpop.permute.xlu1 %4370 }
0x1e95   :  { %6352 = vmatprep.mubr.msk.f32.mxu1 %vm1563_vm4, %v4101_v15 }
0x1e96   :  { %v6830_v17 = vpop.eup %6829 }
0x1e97   :  { %v4102_v19 = vmul.f32 %v6830_v17, %v6822_v54 }
0x1e99   :  { %6353 = vmatmul.mubr.msk.f32.vlgmr.msra.gmra.mrb[50].mxu1 %vm1563_vm4, %v4102_v19 }
0x1e9a   :  { %6360 = vmatmul.mubr.msk.f32.vlgmr.msra.gmra.mrb[44].mxu0 %vm219_vm2, %v4280_v20  ;;  %6552 = vmatpush3.bf16.xpose.msk.msra.mxu1 %vm7561_vm5, %v6547_v46 }
0x1e9b   :  { %6366 = vmatprep.mubr.msk.f32.mxu1 %vm219_vm2, %v4369_v21 }
0x1ea1   :  { %6367 = vmatmul.mubr.msk.f32.vlgmr.msra.gmra.mrb[52].mxu1 %vm219_vm2, %v4371_v62 }
0x1f65   :  { %v7669_v22 = vpop.f32.mrb[42].mxu0 }
0x1f66   :  { %v7671_v5 = vpop.f32.mrb[43].mxu0 }
0x1f6c   :  { %v7673_v24 = vpop.f32.mrb[50].mxu1 }
0x1f6d   :  { %v6361_v25 = vpop.f32.mrb[44].mxu0  ;;  %v7675_v14 = vpop.f32.mrb[51].mxu1 }
0x1f6e   :  { %v4359_v28 = vpop.f32.mrb[45].mxu0  ;;  %v4462_v31 = vsel %vm1563_vm4, %v6361_v25, -inf }
0x1f6f   :  { %4463 = vmax.xlane.f32.xlu1 %v4462_v31  ;;  %v4459_v9 = vsel %vm1563_vm4, %v4359_v28, -inf }
0x1f70   :  { %4460 = vmax.xlane.f32.xlu0 %v4459_v9 }
0x1f74   :  { %v6368_v34 = vpop.f32.mrb[52].mxu1 }
0x1f75   :  { %v4450_v35 = vpop.f32.mrb[53].mxu1  ;;  %v4468_v37 = vsel %vm1563_vm4, %v6368_v34, -inf }
0x1f76   :  { %v4465_v12 = vsel %vm1563_vm4, %v4450_v35, -inf }
0x1f77   :  { %4466 = vmax.xlane.f32.xlu0 %v4465_v12 }
0x1f7b   :  { %4469 = vmax.xlane.f32.xlu0 %v4468_v37 }
0x1f80   :  { %6687 = vrot.lane.b32.xlu1 %v7551_v32, %s6943_s30 }
0x1f84   :  { %6692 = vrot.lane.b32.xlu1 %v7543_v26, %s6941_s28 }
0x1f88   :  { %6697 = vrot.lane.b32.xlu1 %v7551_v32, %s6941_s28 }
0x1f91   :  { %6682 = vrot.lane.b32.xlu0 %v7543_v26, %s6943_s30 }
0x1ffc   :  { %v4464_v38 = vpop.xlane.xlu1 %4463 }
0x1ffd   :  { %v4472_v39 = vsub.f32 %v6361_v25, %v4464_v38  ;;  %v4461_v11 = vpop.xlane.xlu0 %4460 }
0x1ffe   :  { %v4471_v40 = vsub.f32 %v4359_v28, %v4461_v11 }
0x1fff   :  { %v4477_v44 = vmul.f32 1.442695, %v4472_v39 }
0x2000   :  { %v4475_v45 = vmul.f32 1.442695, %v4471_v40  ;;  %v6688_v46 = vpop.permute.xlu1 %6687 }
0x2001   :  { %6831 = vpow2.f32 %v4477_v44  ;;  %v6690_v48 = vunpack.i.h.bf16 %v6688_v46  ;;  %v6689_v60 = vunpack.i.l.bf16 %v6688_v46 }
0x2002   :  { %6833 = vpow2.f32 %v4475_v45 }
0x2003   :  { %v6557_v55 = vpack.c.bf16 %v6690_v48, %v6689_v60 }
0x2004   :  { %v6693_v49 = vpop.permute.xlu1 %6692  ;;  %v4467_v53 = vpop.xlane.xlu0 %4466 }
0x2005   :  { %v4473_v18 = vsub.f32 %v4450_v35, %v4467_v53  ;;  %6558 = vmatprep.subr.bf16.mxu1 %v6557_v55  ;;  %v6695_v8 = vunpack.i.h.bf16 %v6693_v49  ;;  %v6694_v58 = vunpack.i.l.bf16 %v6693_v49 }
0x2006   :  { %6560 = vmatpush3.bf16.msra.mxu1 %v6557_v55 }
0x2007   :  { %v4479_v59 = vmul.f32 1.442695, %v4473_v18  ;;  %v6561_v62 = vpack.c.bf16 %v6695_v8, %v6694_v58 }
0x2008   :  { %v6698_v54 = vpop.permute.xlu1 %6697  ;;  %v4470_v56 = vpop.xlane.xlu0 %4469 }
0x2009   :  { %6835 = vpow2.f32 %v4479_v59  ;;  %v6700_v0 = vunpack.i.h.bf16 %v6698_v54  ;;  %v6699_v2 = vunpack.i.l.bf16 %v6698_v54  ;;  %v4474_v3 = vsub.f32 %v6368_v34, %v4470_v56 }
0x200b   :  { %v6832_v4 = vpop.eup %6831  ;;  %v6567_v6 = vpack.c.bf16 %v6700_v0, %v6699_v2  ;;  %v4481_v27 = vmul.f32 1.442695, %v4474_v3 }
0x200c   :  { %v6834_v7 = vpop.eup %6833  ;;  %v6683_v10 = vpop.permute.xlu0 %6682  ;;  %v4486_v15 = vsel %vm1563_vm4, %v6832_v4, 0.0 }
0x200d   :  { %6837 = vpow2.f32 %v4481_v27  ;;  %v6685_v17 = vunpack.i.h.bf16 %v6683_v10  ;;  %v6684_v19 = vunpack.i.l.bf16 %v6683_v10  ;;  %4487 = vadd.xlane.f32.xlu1 %v4486_v15  ;;  %6569 = vmatprep.subr.msk.bf16.mxu1 %vm7561_vm5, %v6567_v6  ;;  %v4483_v20 = vsel %vm1563_vm4, %v6834_v7, 0.0 }
0x200e   :  { %4484 = vadd.xlane.f32.xlu0 %v4483_v20 }
0x200f   :  { %v6553_v21 = vpack.c.bf16 %v6685_v17, %v6684_v19 }
0x2011   :  { %6554 = vmatprep.subr.bf16.mxu0 %v6553_v21 }
0x2012   :  { %6556 = vmatpush3.bf16.msra.mxu0 %v6553_v21 }
0x2013   :  { %v6836_v25 = vpop.eup %6835  ;;  %6563 = vmatprep.subr.msk.bf16.mxu0 %vm7561_vm5, %v6561_v62 }
0x2014   :  { %v4489_v28 = vsel %vm1563_vm4, %v6836_v25, 0.0 }
0x2015   :  { %4490 = vadd.xlane.f32.xlu0 %v4489_v28 }
0x2017   :  { %v6838_v31 = vpop.eup %6837 }
0x2018   :  { %v4492_v9 = vsel %vm1563_vm4, %v6838_v31, 0.0 }
0x2019   :  { %4493 = vadd.xlane.f32.xlu1 %v4492_v9 }
0x202a   :  { %4679 = vrot.lane.b32.xlu1 %v7573_v41, %s6942_s29 }
0x202b   :  { %4677 = vrot.lane.b32.xlu0 %v7545_v51, %s6942_s29 }
0x202e   :  { %4770 = vrot.lane.b32.xlu1 %v7577_v43, %s6942_s29 }
0x202f   :  { %4768 = vrot.lane.b32.xlu0 %v7553_v33, %s6942_s29 }
0x209a   :  { %v4488_v34 = vpop.xlane.xlu1 %4487 }
0x209b   :  { %6839 = vrcp.f32 %v4488_v34  ;;  %v4485_v35 = vpop.xlane.xlu0 %4484 }
0x209c   :  { %6841 = vrcp.f32 %v4485_v35 }
0x20a2   :  { %v4491_v12 = vpop.xlane.xlu0 %4490 }
0x20a3   :  { %6843 = vrcp.f32 %v4491_v12 }
0x20a5   :  { %v6840_v37 = vpop.eup %6839 }
0x20a6   :  { %v6842_v38 = vpop.eup %6841  ;;  %v4494_v39 = vpop.xlane.xlu1 %4493  ;;  %v4500_v11 = vmul.f32 %v6840_v37, %v6832_v4 }
0x20a7   :  { %6845 = vrcp.f32 %v4494_v39  ;;  %v4499_v41 = vmul.f32 %v6842_v38, %v6834_v7  ;;  %v4678_v51 = vpop.permute.xlu0 %4677 }
0x20a9   :  { %6373 = vmatprep.mubr.msk.f32.mxu0 %vm1563_vm4, %v4499_v41 }
0x20aa   :  { %6374 = vmatmul.mubr.msk.f32.vlgmr.msra.gmra.mrb[46].mxu0 %vm1563_vm4, %v4500_v11  ;;  %v4680_v44 = vpop.permute.xlu1 %4679 }
0x20ab   :  { %6566 = vmatpush3.bf16.xpose.msk.msra.mxu0 %vm7561_vm5, %v6561_v62  ;;  %6387 = vmatprep.mubr.msk.f32.mxu0 %vm219_vm2, %v4678_v51  ;;  %v4769_v46 = vpop.permute.xlu0 %4768 }
0x20ad   :  { %v6844_v33 = vpop.eup %6843 }
0x20ae   :  { %v4501_v43 = vmul.f32 %v6844_v33, %v6836_v25  ;;  %v4771_v48 = vpop.permute.xlu1 %4770 }
0x20b0   :  { %6380 = vmatprep.mubr.msk.f32.mxu1 %vm1563_vm4, %v4501_v43 }
0x20b1   :  { %v6846_v40 = vpop.eup %6845 }
0x20b2   :  { %v4502_v45 = vmul.f32 %v6846_v40, %v6838_v31  ;;  %6388 = vmatmul.mubr.msk.f32.vlgmr.msra.gmra.mrb[48].mxu0 %vm219_vm2, %v4680_v44 }
0x20b4   :  { %6381 = vmatmul.mubr.msk.f32.vlgmr.msra.gmra.mrb[54].mxu1 %vm1563_vm4, %v4502_v45 }
0x20b5   :  { %6572 = vmatpush3.bf16.xpose.msk.msra.mxu1 %vm7561_vm5, %v6567_v6  ;;  %6394 = vmatprep.mubr.msk.f32.mxu1 %vm219_vm2, %v4769_v46 }
0x20bc   :  { %6395 = vmatmul.mubr.msk.f32.vlgmr.msra.gmra.mrb[56].mxu1 %vm219_vm2, %v4771_v48 }
0x217d   :  { %v6375_v60 = vpop.f32.mrb[46].mxu0 }
0x217e   :  { %v4581_v55 = vpop.f32.mrb[47].mxu0 }
0x2185   :  { %v6389_v49 = vpop.f32.mrb[48].mxu0 }
0x2186   :  { %v4759_v53 = vpop.f32.mrb[49].mxu0  ;;  %v4862_v18 = vsel %vm1563_vm4, %v6389_v49, -inf }
0x2187   :  { %4863 = vmax.xlane.f32.xlu1 %v4862_v18  ;;  %v6382_v59 = vpop.f32.mrb[54].mxu1  ;;  %v4859_v54 = vsel %vm1563_vm4, %v4759_v53, -inf }
0x2188   :  { %4860 = vmax.xlane.f32.xlu0 %v4859_v54  ;;  %v4668_v56 = vpop.f32.mrb[55].mxu1 }
0x218f   :  { %v6396_v0 = vpop.f32.mrb[56].mxu1 }
0x2190   :  { %v4850_v36 = vpop.f32.mrb[57].mxu1  ;;  %v4868_v3 = vsel %vm1563_vm4, %v6396_v0, -inf }
0x2191   :  { %v4865_v2 = vsel %vm1563_vm4, %v4850_v36, -inf }
0x2192   :  { %4866 = vmax.xlane.f32.xlu0 %v4865_v2 }
0x2196   :  { %4869 = vmax.xlane.f32.xlu0 %v4868_v3 }
0x2214   :  { %v4864_v4 = vpop.xlane.xlu1 %4863 }
0x2215   :  { %v4872_v6 = vsub.f32 %v6389_v49, %v4864_v4  ;;  %v4861_v27 = vpop.xlane.xlu0 %4860  ;;  %v5811_v49 = vld [vmem:[%s7973_s3 + $0x58] sm:$0xff] }
0x2216   :  { %v4871_v7 = vsub.f32 %v4759_v53, %v4861_v27  ;;  %v5812_v53 = vld [vmem:[%s7973_s3 + $0x60] sm:$0xff] }
0x2217   :  { %v4877_v8 = vmul.f32 1.442695, %v4872_v6 }
0x2218   :  { %v4875_v58 = vmul.f32 1.442695, %v4871_v7 }
0x2219   :  { %6847 = vpow2.f32 %v4877_v8 }
0x221a   :  { %6849 = vpow2.f32 %v4875_v58 }
0x221f   :  { %v4867_v10 = vpop.xlane.xlu0 %4866 }
0x2220   :  { %v4873_v15 = vsub.f32 %v4850_v36, %v4867_v10 }
0x2222   :  { %v4879_v17 = vmul.f32 1.442695, %v4873_v15 }
0x2223   :  { %v6848_v19 = vpop.eup %6847  ;;  %v4870_v20 = vpop.xlane.xlu0 %4869 }
0x2224   :  { %v6850_v21 = vpop.eup %6849  ;;  %6851 = vpow2.f32 %v4879_v17  ;;  %v4874_v62 = vsub.f32 %v6396_v0, %v4870_v20  ;;  %v4886_v25 = vsel %vm1563_vm4, %v6848_v19, 0.0 }
0x2225   :  { %4887 = vadd.xlane.f32.xlu1 %v4886_v25  ;;  %v4883_v28 = vsel %vm1563_vm4, %v6850_v21, 0.0 }
0x2226   :  { %v4881_v31 = vmul.f32 1.442695, %v4874_v62  ;;  %4884 = vadd.xlane.f32.xlu0 %v4883_v28 }
0x2228   :  { %6853 = vpow2.f32 %v4881_v31 }
0x222e   :  { %v6852_v9 = vpop.eup %6851 }
0x222f   :  { %v4889_v34 = vsel %vm1563_vm4, %v6852_v9, 0.0 }
0x2230   :  { %4890 = vadd.xlane.f32.xlu0 %v4889_v34 }
0x2232   :  { %v6854_v35 = vpop.eup %6853 }
0x2233   :  { %v4892_v12 = vsel %vm1563_vm4, %v6854_v35, 0.0 }
0x2234   :  { %4893 = vadd.xlane.f32.xlu1 %v4892_v12 }
0x2245   :  { %6707 = vrot.lane.b32.xlu1 %v7551_v32, %s6944_s8 }
0x2246   :  { %6702 = vrot.lane.b32.xlu0 %v7543_v26, %s6944_s8 }
0x2249   :  { %5081 = vrot.lane.b32.xlu1 %v7671_v5, %s6945_s9 }
0x224a   :  { %5097 = vrot.lane.b32.xlu0 %v4581_v55, %s6946_s10  ;;  %v5810_v55 = vld [vmem:[%s7973_s3 + $0x50] sm:$0xff] }
0x224b   :  { %v6581_v18 = vpack.c.bf16 %v5811_v49, %v5810_v55 }
0x224d   :  { %5083 = vrot.lane.b32.xlu1 %v7669_v22, %s6945_s9 }
0x224e   :  { %5085 = vrot.lane.b32.xlu0 %v7675_v14, %s6945_s9 }
0x2251   :  { %5099 = vrot.lane.b32.xlu1 %v6375_v60, %s6946_s10 }
0x2252   :  { %5101 = vrot.lane.b32.xlu0 %v4668_v56, %s6946_s10 }
0x2255   :  { %5087 = vrot.lane.b32.xlu1 %v7673_v24, %s6945_s9 }
0x2259   :  { %5103 = vrot.lane.b32.xlu1 %v6382_v59, %s6946_s10  ;;  %v5813_v59 = vld [vmem:[%s7973_s3 + $0x68] sm:$0xff] }
0x225a   :  { %v6585_v54 = vpack.c.bf16 %v5813_v59, %v5812_v53 }
0x22b2   :  { %v4888_v32 = vpop.xlane.xlu1 %4887 }
0x22b3   :  { %v4885_v26 = vpop.xlane.xlu0 %4884 }
0x22b4   :  { %6855 = vrcp.f32 %v4885_v26 }
0x22b5   :  { %6857 = vrcp.f32 %v4888_v32 }
0x22bd   :  { %v4891_v5 = vpop.xlane.xlu0 %4890 }
0x22be   :  { %v6856_v37 = vpop.eup %6855  ;;  %6859 = vrcp.f32 %v4891_v5 }
0x22bf   :  { %v4899_v22 = vmul.f32 %v6856_v37, %v6850_v21  ;;  %v6858_v51 = vpop.eup %6857 }
0x22c0   :  { %v4900_v44 = vmul.f32 %v6858_v51, %v6848_v19 }
0x22c1   :  { %v4894_v38 = vpop.xlane.xlu1 %4893  ;;  %6401 = vmatprep.mubr.msk.f32.mxu0 %vm1563_vm4, %v4899_v22  ;;  %v6703_v14 = vpop.permute.xlu0 %6702 }
0x22c2   :  { %6861 = vrcp.f32 %v4894_v38  ;;  %v6705_v39 = vunpack.i.h.bf16 %v6703_v14  ;;  %v6704_v41 = vunpack.i.l.bf16 %v6703_v14 }
0x22c4   :  { %v6573_v11 = vpack.c.bf16 %v6705_v39, %v6704_v41 }
0x22c5   :  { %v6708_v24 = vpop.permute.xlu1 %6707  ;;  %v5098_v27 = vpop.permute.xlu0 %5097 }
0x22c6   :  { %v6710_v33 = vunpack.i.h.bf16 %v6708_v24  ;;  %v6709_v43 = vunpack.i.l.bf16 %v6708_v24  ;;  %6574 = vmatprep.subr.bf16.mxu0 %v6573_v11 }
0x22c7   :  { %6576 = vmatpush3.bf16.msra.mxu0 %v6573_v11 }
0x22c8   :  { %v6860_v40 = vpop.eup %6859  ;;  %v6577_v45 = vpack.c.bf16 %v6710_v33, %v6709_v43  ;;  %6582 = vmatprep.subr.bf16.mxu0 %v6581_v18 }
0x22c9   :  { %v4901_v46 = vmul.f32 %v6860_v40, %v6852_v9  ;;  %v5082_v3 = vpop.permute.xlu1 %5081  ;;  %v5086_v8 = vpop.permute.xlu0 %5085 }
0x22ca   :  { %6402 = vmatmul.mubr.msk.f32.vlgmr.msra.gmra.mrb[50].mxu0 %vm1563_vm4, %v4900_v44  ;;  %6578 = vmatprep.subr.bf16.mxu1 %v6577_v45  ;;  %v5125_v15 = vsel %vm219_vm2, %v7623_v61, %v5082_v3  ;;  %v5127_v61 = vsel %vm219_vm2, %v7627_v63, %v5086_v8  ;;  %v5868_v63 = vld [vmem:[%s7973_s3 + $0x70] ss:$0 sm:$0xff] }
0x22cb   :  { %6580 = vmatpush3.bf16.msra.mxu1 %v6577_v45  ;;  %6408 = vmatprep.mubr.msk.f32.mxu1 %vm1563_vm4, %v4901_v46  ;;  %v5129_v20 = vsel %vm1563_vm4, %v5125_v15, %v5098_v27 }
0x22cc   :  { %v6862_v48 = vpop.eup %6861  ;;  %6584 = vmatpush3.bf16.msra.mxu0 %v6581_v18 }
0x22cd   :  { %v4902_v60 = vmul.f32 %v6862_v48, %v6854_v35  ;;  %6586 = vmatprep.subr.bf16.mxu0 %v6585_v54  ;;  %v5084_v4 = vpop.permute.xlu1 %5083  ;;  %v5102_v10 = vpop.permute.xlu0 %5101 }
0x22ce   :  { %v5126_v19 = vsel %vm219_vm2, %v7621_v57, %v5084_v4  ;;  %v5131_v9 = vsel %vm1563_vm4, %v5127_v61, %v5102_v10 }
0x22cf   :  { %6409 = vmatmul.mubr.msk.f32.vlgmr.msra.gmra.mrb[58].mxu1 %vm1563_vm4, %v4902_v60 }
0x22d0   :  { %6588 = vmatpush3.bf16.msra.mxu0 %v6585_v54 }
0x22d1   :  { %v5100_v6 = vpop.permute.xlu1 %5099 }
0x22d2   :  { %v5130_v62 = vsel %vm1563_vm4, %v5126_v19, %v5100_v6 }
0x22d5   :  { %v5088_v7 = vpop.permute.xlu1 %5087 }
0x22d6   :  { %v5128_v57 = vsel %vm219_vm2, %v7625_v29, %v5088_v7 }
0x22d9   :  { %v5104_v58 = vpop.permute.xlu1 %5103 }
0x22da   :  { %v5132_v35 = vsel %vm1563_vm4, %v5128_v57, %v5104_v58 }
0x239d   :  { %v6403_v56 = vpop.f32.mrb[50].mxu0 }
0x239e   :  { %5115 = vrot.lane.b32.xlu1 %v6403_v56, %s6947_s17  ;;  %v4981_v0 = vpop.f32.mrb[51].mxu0 }
0x239f   :  { %5113 = vrot.lane.b32.xlu0 %v4981_v0, %s6947_s17 }
0x23a2   :  { %v6410_v36 = vpop.f32.mrb[58].mxu1 }
0x23a3   :  { %v5068_v2 = vpop.f32.mrb[59].mxu1  ;;  %5119 = vrot.lane.b32.xlu1 %v6410_v36, %s6947_s17 }
0x23a4   :  { %5117 = vrot.lane.b32.xlu0 %v5068_v2, %s6947_s17 }
0x2410   :  { %v5116_v17 = vpop.permute.xlu1 %5115 }
0x2411   :  { %v5114_v21 = vpop.permute.xlu0 %5113  ;;  %v5134_v28 = vsel %vm1566_vm3, %v5130_v62, %v5116_v17 }
0x2412   :  { %v5133_v25 = vsel %vm1566_vm3, %v5129_v20, %v5114_v21 }
0x2413   :  { %6419 = vmatprep.mubr.msk.f32.mxu0 %vm33_vm0, %v5133_v25 }
0x2414   :  { %6420 = vmatmul.mubr.msk.f32.vlgmr.msra.gmra.mrb[52].mxu0 %vm33_vm0, %v5134_v28 }
0x2415   :  { %v5120_v31 = vpop.permute.xlu1 %5119 }
0x2416   :  { %v5118_v34 = vpop.permute.xlu0 %5117  ;;  %v5136_v26 = vsel %vm1566_vm3, %v5132_v35, %v5120_v31 }
0x2417   :  { %v5135_v12 = vsel %vm1566_vm3, %v5131_v9, %v5118_v34 }
0x2418   :  { %6422 = vmatprep.mubr.msk.f32.mxu0 %vm33_vm0, %v5135_v12 }
0x2419   :  { %6423 = vmatmul.mubr.msk.f32.gmra.mrb[54].mxu0 %vm33_vm0, %v5136_v26 }
0x24e7   :  { %v6421_v32 = vpop.f32.mrb[52].mxu0 }
0x24e8   :  { %v5225_v5 = vadd.f32 %v6421_v32, %v5868_v63  ;;  %v5219_v37 = vpop.f32.mrb[53].mxu0 }
0x24e9   :  { %v5220_v22 = vadd.f32 %v5868_v63, %v5219_v37 }
0x24ea   :  { %v5239_v29 = vadd.f32 %v5225_v5, %v7502_v13 }
0x24eb   :  { %v5238_v38 = vadd.f32 %v5220_v22, %v7490_v1 }
0x24ec   :  { %v6424_v14 = vpop.f32.mrb[54].mxu0  ;;  %v5245_v39 = vsel %vm33_vm0, %v5239_v29, 0.0 }
0x24ed   :  { %5246 = vadd.xlane.f32.xlu1 %v5245_v39  ;;  %v5229_v41 = vpop.f32.mrb[55].mxu0  ;;  %v5242_v11 = vsel %vm33_vm0, %v5238_v38, 0.0  ;;  %v5235_v51 = vadd.f32 %v6424_v14, %v5868_v63 }
0x24ee   :  { %v5230_v24 = vadd.f32 %v5868_v63, %v5229_v41  ;;  %5243 = vadd.xlane.f32.xlu0 %v5242_v11 }
0x24ef   :  { %v5241_v43 = vadd.f32 %v5235_v51, %v7509_v23 }
0x24f0   :  { %v5240_v33 = vadd.f32 %v5230_v24, %v7496_v30 }
0x24f1   :  { %v5251_v13 = vsel %vm33_vm0, %v5241_v43, 0.0 }
0x24f2   :  { %v5248_v40 = vsel %vm33_vm0, %v5240_v33, 0.0 }
0x24f3   :  { %5249 = vadd.xlane.f32.xlu0 %v5248_v40 }
0x24f7   :  { %5252 = vadd.xlane.f32.xlu0 %v5251_v13 }
0x257a   :  { %v5247_v1 = vpop.xlane.xlu1 %5246 }
0x257b   :  { %v5255_v44 = vmul.f32 0.03125, %v5247_v1  ;;  %v5244_v45 = vpop.xlane.xlu0 %5243 }
0x257c   :  { %v5254_v46 = vmul.f32 0.03125, %v5244_v45 }
0x257d   :  { %v5259_v48 = vsub.f32 %v5239_v29, %v5255_v44 }
0x257e   :  { %v5258_v60 = vsub.f32 %v5238_v38, %v5254_v46 }
0x257f   :  { %v5263_v55 = vmul.f32 %v5259_v48, %v5259_v48 }
0x2580   :  { %v5250_v49 = vpop.xlane.xlu0 %5249  ;;  %v5262_v53 = vmul.f32 %v5258_v60, %v5258_v60 }
0x2581   :  { %v5256_v18 = vmul.f32 0.03125, %v5250_v49  ;;  %v5269_v30 = vsel %vm33_vm0, %v5263_v55, 0.0 }
0x2582   :  { %5270 = vadd.xlane.f32.xlu1 %v5269_v30  ;;  %v5266_v23 = vsel %vm33_vm0, %v5262_v53, 0.0 }
0x2583   :  { %v5260_v59 = vsub.f32 %v5240_v33, %v5256_v18  ;;  %5267 = vadd.xlane.f32.xlu0 %v5266_v23  ;;  %v5302_v23 = vld [vmem:[%s7974_s4] sm:$0xff] }
0x2584   :  { %v5253_v54 = vpop.xlane.xlu0 %5252 }
0x2585   :  { %v5257_v56 = vmul.f32 0.03125, %v5253_v54  ;;  %v5264_v0 = vmul.f32 %v5260_v59, %v5260_v59 }
0x2587   :  { %v5261_v36 = vsub.f32 %v5241_v43, %v5257_v56  ;;  %v5272_v2 = vsel %vm33_vm0, %v5264_v0, 0.0  ;;  %v5304_v56 = vld [vmem:[%s7974_s4 + $0x10] sm:$0xff]  ;;  %v5305_v0 = vld [vmem:[%s7974_s4 + $0x18] sm:$0xff] }
0x2588   :  { %5273 = vadd.xlane.f32.xlu0 %v5272_v2  ;;  %v5307_v2 = vld [vmem:[%s7975_s5] sm:$0xff] }
0x2589   :  { %v5265_v3 = vmul.f32 %v5261_v36, %v5261_v36 }
0x258b   :  { %v5275_v4 = vsel %vm33_vm0, %v5265_v3, 0.0  ;;  %v5308_v3 = vld [vmem:[%s7975_s5 + $0x8] sm:$0xff] }
0x258c   :  { %5276 = vadd.xlane.f32.xlu1 %v5275_v4  ;;  %v5309_v4 = vld [vmem:[%s7975_s5 + $0x10] sm:$0xff] }
0x260f   :  { %v5271_v6 = vpop.xlane.xlu1 %5270 }
0x2610   :  { %v5279_v27 = vmul.f32 0.03125, %v5271_v6  ;;  %v5268_v7 = vpop.xlane.xlu0 %5267  ;;  %v6597_v6 = vpack.c.bf16 %v5308_v3, %v5307_v2 }
0x2611   :  { %v5278_v8 = vmul.f32 0.03125, %v5268_v7 }
0x2612   :  { %v5283_v58 = vadd.f32 1e-05, %v5279_v27  ;;  %v5310_v27 = vld [vmem:[%s7975_s5 + $0x18] sm:$0xff]  ;;  %6598 = vmatprep.subr.bf16.mxu0 %v6597_v6 }
0x2613   :  { %v5282_v10 = vadd.f32 1e-05, %v5278_v8  ;;  %v6601_v7 = vpack.c.bf16 %v5310_v27, %v5309_v4  ;;  %v5311_v8 = vld [vmem:[%s7975_s5 + $0x20] sm:$0xff]  ;;  %6600 = vmatpush3.bf16.msra.mxu0 %v6597_v6  ;;  %v5314_v4 = vld [vmem:[%s7975_s5 + $0x38] sm:$0xff] }
0x2614   :  { %6863 = vrsqrt.f32 %v5283_v58  ;;  %v5312_v58 = vld [vmem:[%s7975_s5 + $0x28] sm:$0xff] }
0x2615   :  { %6865 = vrsqrt.f32 %v5282_v10  ;;  %v5274_v15 = vpop.xlane.xlu0 %5273  ;;  %6602 = vmatprep.subr.bf16.mxu0 %v6601_v7  ;;  %v6605_v10 = vpack.c.bf16 %v5312_v58, %v5311_v8 }
0x2616   :  { %v5280_v17 = vmul.f32 0.03125, %v5274_v15 }
0x2617   :  { %6604 = vmatpush3.bf16.msra.mxu0 %v6601_v7 }
0x2618   :  { %v5284_v19 = vadd.f32 1e-05, %v5280_v17  ;;  %6606 = vmatprep.subr.bf16.mxu0 %v6605_v10 }
0x2619   :  { %v5277_v20 = vpop.xlane.xlu1 %5276 }
0x261a   :  { %6867 = vrsqrt.f32 %v5284_v19  ;;  %v5281_v21 = vmul.f32 0.03125, %v5277_v20 }
0x261b   :  { %6608 = vmatpush3.bf16.msra.mxu0 %v6605_v10 }
0x261c   :  { %v5285_v62 = vadd.f32 1e-05, %v5281_v21 }
0x261e   :  { %v6864_v25 = vpop.eup %6863  ;;  %6869 = vrsqrt.f32 %v5285_v62 }
0x261f   :  { %v6866_v28 = vpop.eup %6865  ;;  %v5291_v61 = vmul.f32 %v6864_v25, %v5259_v48 }
0x2620   :  { %v5290_v31 = vmul.f32 %v6866_v28, %v5258_v60 }
0x2621   :  { %v5295_v9 = vmul.f32 %v5291_v61, %v7483_v52 }
0x2622   :  { %v5294_v57 = vmul.f32 %v5290_v31, %v7483_v52 }
0x2623   :  { %v7799_v34 = vadd.f32 %v5295_v9, %v7486_v16 }
0x2624   :  { %v6868_v35 = vpop.eup %6867  ;;  %v7802_v12 = vadd.f32 %v5294_v57, %v7486_v16 }
0x2625   :  { %v5319_v26 = vsel %vm33_vm0, %v7799_v34, 0.0  ;;  %v5292_v63 = vmul.f32 %v6868_v35, %v5260_v59  ;;  %v5303_v59 = vld [vmem:[%s7974_s4 + $0x8] sm:$0xff] }
0x2626   :  { %5320 = vadd.xlane.f32.xlu1 %v5319_v26  ;;  %v5316_v32 = vsel %vm33_vm0, %v7802_v12, 0.0  ;;  %v6589_v54 = vpack.c.bf16 %v5303_v59, %v5302_v23 }
0x2627   :  { %5317 = vadd.xlane.f32.xlu0 %v5316_v32  ;;  %v5296_v5 = vmul.f32 %v5292_v63, %v7483_v52 }
0x2628   :  { %v6870_v37 = vpop.eup %6869  ;;  %6590 = vmatprep.subr.bf16.mxu1 %v6589_v54 }
0x2629   :  { %v7810_v22 = vadd.f32 %v5296_v5, %v7486_v16  ;;  %v5293_v29 = vmul.f32 %v6870_v37, %v5261_v36  ;;  %v6593_v36 = vpack.c.bf16 %v5305_v0, %v5304_v56  ;;  %6592 = vmatpush3.bf16.msra.mxu1 %v6589_v54 }
0x262b   :  { %v5322_v38 = vsel %vm33_vm0, %v7810_v22, 0.0  ;;  %v5297_v14 = vmul.f32 %v5293_v29, %v7483_v52  ;;  %6594 = vmatprep.subr.bf16.mxu1 %v6593_v36 }
0x262c   :  { %5323 = vadd.xlane.f32.xlu0 %v5322_v38 }
0x262d   :  { %v7816_v39 = vadd.f32 %v5297_v14, %v7486_v16  ;;  %6596 = vmatpush3.bf16.msra.mxu1 %v6593_v36 }
0x262f   :  { %v5325_v41 = vsel %vm33_vm0, %v7816_v39, 0.0 }
0x2630   :  { %5326 = vadd.xlane.f32.xlu1 %v5325_v41 }
0x26b3   :  { %v5321_v11 = vpop.xlane.xlu1 %5320 }
0x26b4   :  { %v5329_v51 = vmul.f32 0.03125, %v5321_v11  ;;  %v5318_v24 = vpop.xlane.xlu0 %5317 }
0x26b5   :  { %v5328_v33 = vmul.f32 0.03125, %v5318_v24 }
0x26b6   :  { %v7821_v43 = vsub.f32 %v7799_v34, %v5329_v51 }
0x26b7   :  { %v7824_v40 = vsub.f32 %v7802_v12, %v5328_v33 }
0x26b8   :  { %v5337_v52 = vmul.f32 %v7821_v43, %v7821_v43 }
0x26b9   :  { %v5324_v13 = vpop.xlane.xlu0 %5323  ;;  %v5336_v16 = vmul.f32 %v7824_v40, %v7824_v40 }
0x26ba   :  { %v5330_v1 = vmul.f32 0.03125, %v5324_v13  ;;  %v5343_v44 = vsel %vm33_vm0, %v5337_v52, 0.0 }
0x26bb   :  { %5344 = vadd.xlane.f32.xlu1 %v5343_v44  ;;  %v5340_v45 = vsel %vm33_vm0, %v5336_v16, 0.0 }
0x26bc   :  { %v7833_v46 = vsub.f32 %v7810_v22, %v5330_v1  ;;  %5341 = vadd.xlane.f32.xlu0 %v5340_v45  ;;  %v28_v1 = vld [vmem:[%s7976_s6 + $0x8] sm:$0x3] }
0x26bd   :  { %v5327_v48 = vpop.xlane.xlu1 %5326 }
0x26be   :  { %v5331_v60 = vmul.f32 0.03125, %v5327_v48  ;;  %v5338_v55 = vmul.f32 %v7833_v46, %v7833_v46 }
0x26c0   :  { %v7838_v49 = vsub.f32 %v7816_v39, %v5331_v60  ;;  %v5346_v53 = vsel %vm33_vm0, %v5338_v55, 0.0  ;;  %v7879_v60 = vrot.slane %v28_v1, %v63_v47 }
0x26c1   :  { %5347 = vadd.xlane.f32.xlu0 %v5346_v53 }
0x26c2   :  { %v5339_v18 = vmul.f32 %v7838_v49, %v7838_v49 }
0x26c4   :  { %v5349_v30 = vsel %vm33_vm0, %v5339_v18, 0.0 }
0x26c5   :  { %5350 = vadd.xlane.f32.xlu1 %v5349_v30  ;;  %v7884_v30 = vrot.slane %v28_v1, %v69_v50 }
0x2748   :  { %v5345_v15 = vpop.xlane.xlu1 %5344 }
0x2749   :  { %v5353_v17 = vmul.f32 0.032258064, %v5345_v15  ;;  %v5342_v19 = vpop.xlane.xlu0 %5341 }
0x274a   :  { %v5352_v20 = vmul.f32 0.032258064, %v5342_v19 }
0x274b   :  { %6871 = vrsqrt.f32 %v5353_v17  ;;  %vm5365_vm6 = vcmp.eq.f32.partialorder %v5353_v17, inf  ;;  %v5368_v57 = vand.u32 2147483648, %v5353_v17  ;;  %vm5367_vm7 = vcmp.eq.f32.partialorder %v5353_v17, 0.0 }
0x274c   :  { %6873 = vrsqrt.f32 %v5352_v20  ;;  %vm5358_vm8 = vcmp.eq.f32.partialorder %v5352_v20, inf  ;;  %v5361_v63 = vand.u32 2147483648, %v5352_v20  ;;  %vm5360_vm9 = vcmp.eq.f32.partialorder %v5352_v20, 0.0 }
0x274e   :  { %v5348_v21 = vpop.xlane.xlu0 %5347 }
0x274f   :  { %v5354_v62 = vmul.f32 0.032258064, %v5348_v21 }
0x2751   :  { %6875 = vrsqrt.f32 %v5354_v62  ;;  %vm5372_vm10 = vcmp.eq.f32.partialorder %v5354_v62, inf  ;;  %v5375_v11 = vand.u32 2147483648, %v5354_v62  ;;  %vm5374_vm11 = vcmp.eq.f32.partialorder %v5354_v62, 0.0 }
0x2752   :  { %v5351_v25 = vpop.xlane.xlu1 %5350 }
0x2753   :  { %v5355_v28 = vmul.f32 0.032258064, %v5351_v25 }
0x2755   :  { %v6872_v61 = vpop.eup %6871  ;;  %6877 = vrsqrt.f32 %v5355_v28  ;;  %vm5379_vm12 = vcmp.eq.f32.partialorder %v5355_v28, inf  ;;  %v5382_v16 = vand.u32 2147483648, %v5355_v28  ;;  %vm5381_vm13 = vcmp.eq.f32.partialorder %v5355_v28, 0.0 }
0x2756   :  { %v6874_v31 = vpop.eup %6873  ;;  %v5364_v9 = vmul.f32 %v6872_v61, %v5353_v17 }
0x2757   :  { %v5357_v35 = vmul.f32 %v6874_v31, %v5352_v20 }
0x2758   :  { %v5366_v26 = vsel %vm5365_vm6, %v5353_v17, %v5364_v9 }
0x2759   :  { %v5369_v32 = vsel %vm5367_vm7, %v5368_v57, %v5366_v26  ;;  %v5359_v5 = vsel %vm5358_vm8, %v5352_v20, %v5357_v35 }
0x275a   :  { %v5385_v37 = vadd.f32 1e-06, %v5369_v32  ;;  %v5362_v29 = vsel %vm5360_vm9, %v5361_v63, %v5359_v5 }
0x275b   :  { %v6876_v38 = vpop.eup %6875  ;;  %v5384_v14 = vadd.f32 1e-06, %v5362_v29 }
0x275c   :  { %6879 = vrcp.f32 %v5385_v37  ;;  %v5371_v41 = vmul.f32 %v6876_v38, %v5354_v62 }
0x275d   :  { %6881 = vrcp.f32 %v5384_v14 }
0x275e   :  { %v5373_v51 = vsel %vm5372_vm10, %v5354_v62, %v5371_v41 }
0x275f   :  { %v6878_v24 = vpop.eup %6877  ;;  %v5376_v33 = vsel %vm5374_vm11, %v5375_v11, %v5373_v51 }
0x2760   :  { %v5386_v52 = vadd.f32 1e-06, %v5376_v33  ;;  %v5378_v13 = vmul.f32 %v6878_v24, %v5355_v28 }
0x2762   :  { %6883 = vrcp.f32 %v5386_v52  ;;  %v5380_v44 = vsel %vm5379_vm12, %v5355_v28, %v5378_v13  ;;  %v5878_v28 = vld [vmem:[%s7975_s5 + $0x40] ss:$0 sm:$0xff] }
0x2763   :  { %v5383_v45 = vsel %vm5381_vm13, %v5382_v16, %v5380_v44 }
0x2764   :  { %v5387_v48 = vadd.f32 1e-06, %v5383_v45 }
0x2766   :  { %v6880_v55 = vpop.eup %6879  ;;  %6885 = vrcp.f32 %v5387_v48 }
0x2767   :  { %v6882_v53 = vpop.eup %6881  ;;  %v5391_v18 = vmul.f32 %v6880_v55, %v7821_v43 }
0x2768   :  { %v5389_v23 = vmul.f32 %v6882_v53, %v7824_v40 }
0x2769   :  { %v5401_v59 = vmul.f32 %v7879_v60, %v5391_v18 }
0x276a   :  { %v5400_v54 = vmul.f32 %v7879_v60, %v5389_v23 }
0x276b   :  { %v5409_v47 = vadd.f32 %v7884_v30, %v5401_v59 }
0x276c   :  { %v6884_v56 = vpop.eup %6883  ;;  %v5408_v0 = vadd.f32 %v7884_v30, %v5400_v54 }
0x276d   :  { %v5393_v36 = vmul.f32 %v6884_v56, %v7833_v46  ;;  %v5313_v46 = vld [vmem:[%s7975_s5 + $0x30] sm:$0xff] }
0x276e   :  { %6433 = vmatprep.mubr.msk.f32.mxu1 %vm33_vm0, %v5408_v0  ;;  %v6609_v6 = vpack.c.bf16 %v5314_v4, %v5313_v46 }
0x276f   :  { %6434 = vmatmul.mubr.msk.f32.vlgmr.msra.gmra.mrb[60].mxu1 %vm33_vm0, %v5409_v47  ;;  %v5402_v42 = vmul.f32 %v7879_v60, %v5393_v36 }
0x2770   :  { %v6886_v50 = vpop.eup %6885  ;;  %6610 = vmatprep.subr.bf16.mxu0 %v6609_v6 }
0x2771   :  { %v5410_v43 = vadd.f32 %v7884_v30, %v5402_v42  ;;  %v5395_v40 = vmul.f32 %v6886_v50, %v7838_v49  ;;  %6612 = vmatpush3.bf16.msra.mxu0 %v6609_v6  ;;  %v5873_v49 = vld [vmem:[%s7974_s4 + $0x20] ss:$0 sm:$0xff]  ;;  %s6948_s4 = smov [#allocation2]  }
0x2772   :  { %s5720_s5 = sshll.u32 %s6948_s4, 4  ;;  %s5721_s5 = int_to_ptr.vmem [resolvable:$true] %s5720_s5 }
0x2773   :  { %6436 = vmatprep.mubr.msk.f32.mxu1 %vm33_vm0, %v5410_v43  ;;  %v5403_v2 = vmul.f32 %v7879_v60, %v5395_v40  ;;  %s6908_s10 = scalar_lea.vmem %s5721_s5, 512  ;;  %p6913_p1 = scmp.lt.s32.totalorder %s5721_s5, %s5721_s5 }
0x2774   :  { %p6909_p0 = scmp.ne.s32.totalorder %s5721_s5, %s6908_s10  ;;  %p6914_p2 = scmp.lt.s32.totalorder %s6908_s10, %s6908_s10 }
0x2775   :  { %v5411_v3 = vadd.f32 %v7884_v30, %v5403_v2 }
0x2776   :  { %p6915_p3 = por %p6914_p2, %p6913_p1 }
0x2777   :  { %6437 = vmatmul.mubr.msk.f32.gmra.mrb[62].mxu1 %vm33_vm0, %v5411_v3 }
0x2778   :  { %p6916_p4 = pnand %p6915_p3, %p6909_p0 }
0x2842   :  { %v6435_v27 = vpop.f32.mrb[60].mxu1 }
0x2843   :  { %v5500_v7 = vadd.f32 %v6435_v27, %v5873_v49  ;;  %v5494_v8 = vpop.f32.mrb[61].mxu1 }
0x2844   :  { %v5495_v58 = vadd.f32 %v5873_v49, %v5494_v8 }
0x2845   :  { %v5514_v15 = vmax.f32 %v5500_v7, 0.0 }
0x2846   :  { %v5513_v10 = vmax.f32 %v5495_v58, 0.0 }
0x2848   :  { %6455 = vmatprep.mubr.msk.f32.mxu0 %vm5521_vm14, %v5513_v10 }
0x2849   :  { %6456 = vmatmul.mubr.msk.f32.vlgmr.msra.gmra.mrb[56].mxu0 %vm5521_vm14, %v5514_v15 }
0x284a   :  { %v6438_v17 = vpop.f32.mrb[62].mxu1 }
0x284b   :  { %v5510_v19 = vadd.f32 %v6438_v17, %v5873_v49  ;;  %v5504_v20 = vpop.f32.mrb[63].mxu1 }
0x284c   :  { %v5505_v21 = vadd.f32 %v5873_v49, %v5504_v20 }
0x284d   :  { %v5516_v25 = vmax.f32 %v5510_v19, 0.0 }
0x284e   :  { %v5515_v62 = vmax.f32 %v5505_v21, 0.0 }
0x2850   :  { %6458 = vmatprep.mubr.msk.f32.mxu0 %vm5521_vm14, %v5515_v62 }
0x2851   :  { %6459 = vmatmul.mubr.msk.f32.gmra.mrb[58].mxu0 %vm5521_vm14, %v5516_v25 }
0x291c   :  { %v6457_v61 = vpop.f32.mrb[56].mxu0 }
0x291d   :  { %v5606_v31 = vadd.f32 %v6457_v61, %v5878_v28  ;;  %v5600_v9 = vpop.f32.mrb[57].mxu0 }
0x291e   :  { %v5601_v57 = vadd.f32 %v5878_v28, %v5600_v9 }
0x291f   :  { %v5620_v35 = vadd.f32 %v5606_v31, %v7799_v34 }
0x2920   :  { %v5619_v26 = vadd.f32 %v5601_v57, %v7802_v12 }
0x2921   :  { %v5626_v63 = vsel %vm33_vm0, %v5620_v35, 0.0 }
0x2922   :  { %5627 = vadd.xlane.f32.xlu1 %v5626_v63  ;;  %v5623_v32 = vsel %vm33_vm0, %v5619_v26, 0.0 }
0x2923   :  { %5624 = vadd.xlane.f32.xlu0 %v5623_v32 }
0x2924   :  { %v6460_v5 = vpop.f32.mrb[58].mxu0 }
0x2925   :  { %v5616_v37 = vadd.f32 %v6460_v5, %v5878_v28  ;;  %v5610_v29 = vpop.f32.mrb[59].mxu0 }
0x2926   :  { %v5611_v38 = vadd.f32 %v5878_v28, %v5610_v29 }
0x2927   :  { %v5622_v14 = vadd.f32 %v5616_v37, %v7816_v39 }
0x2928   :  { %v5621_v41 = vadd.f32 %v5611_v38, %v7810_v22 }
0x2929   :  { %v5632_v11 = vsel %vm33_vm0, %v5622_v14, 0.0 }
0x292a   :  { %5633 = vadd.xlane.f32.xlu1 %v5632_v11  ;;  %v5629_v34 = vsel %vm33_vm0, %v5621_v41, 0.0 }
0x292b   :  { %5630 = vadd.xlane.f32.xlu0 %v5629_v34 }
0x29af   :  { %v5628_v12 = vpop.xlane.xlu1 %5627 }
0x29b0   :  { %v5636_v51 = vmul.f32 0.03125, %v5628_v12  ;;  %v5625_v24 = vpop.xlane.xlu0 %5624 }
0x29b1   :  { %v5635_v33 = vmul.f32 0.03125, %v5625_v24 }
0x29b2   :  { %v7921_v52 = vsub.f32 %v5620_v35, %v5636_v51 }
0x29b3   :  { %v7923_v13 = vsub.f32 %v5619_v26, %v5635_v33 }
0x29b4   :  { %v5644_v16 = vmul.f32 %v7921_v52, %v7921_v52 }
0x29b5   :  { %v5643_v22 = vmul.f32 %v7923_v13, %v7923_v13 }
0x29b6   :  { %v5650_v39 = vsel %vm33_vm0, %v5644_v16, 0.0 }
0x29b7   :  { %5651 = vadd.xlane.f32.xlu1 %v5650_v39  ;;  %v5634_v1 = vpop.xlane.xlu1 %5633  ;;  %v5647_v44 = vsel %vm33_vm0, %v5643_v22, 0.0 }
0x29b8   :  { %v5638_v45 = vmul.f32 0.03125, %v5634_v1  ;;  %5648 = vadd.xlane.f32.xlu0 %v5647_v44  ;;  %v5631_v48 = vpop.xlane.xlu0 %5630 }
0x29b9   :  { %v5637_v55 = vmul.f32 0.03125, %v5631_v48 }
0x29ba   :  { %v7931_v53 = vsub.f32 %v5622_v14, %v5638_v45 }
0x29bb   :  { %v7933_v18 = vsub.f32 %v5621_v41, %v5637_v55 }
0x29bc   :  { %v5646_v23 = vmul.f32 %v7931_v53, %v7931_v53 }
0x29bd   :  { %v5645_v59 = vmul.f32 %v7933_v18, %v7933_v18 }
0x29be   :  { %v5656_v54 = vsel %vm33_vm0, %v5646_v23, 0.0 }
0x29bf   :  { %5657 = vadd.xlane.f32.xlu1 %v5656_v54  ;;  %v5653_v56 = vsel %vm33_vm0, %v5645_v59, 0.0 }
0x29c0   :  { %5654 = vadd.xlane.f32.xlu0 %v5653_v56 }
0x2a44   :  { %v5652_v0 = vpop.xlane.xlu1 %5651 }
0x2a45   :  { %v5660_v47 = vmul.f32 0.032258064, %v5652_v0  ;;  %v5649_v36 = vpop.xlane.xlu0 %5648 }
0x2a46   :  { %v5659_v42 = vmul.f32 0.032258064, %v5649_v36 }
0x2a47   :  { %6887 = vrsqrt.f32 %v5660_v47  ;;  %vm5672_vm15 = vcmp.eq.f32.partialorder %v5660_v47, inf  ;;  %v5675_v6 = vand.u32 2147483648, %v5660_v47  ;;  %vm5674_vm1 = vcmp.eq.f32.partialorder %v5660_v47, 0.0 }
0x2a48   :  { %6889 = vrsqrt.f32 %v5659_v42  ;;  %vm5665_vm2 = vcmp.eq.f32.partialorder %v5659_v42, inf  ;;  %v5668_v7 = vand.u32 2147483648, %v5659_v42  ;;  %vm5667_vm3 = vcmp.eq.f32.partialorder %v5659_v42, 0.0 }
0x2a4c   :  { %v5658_v50 = vpop.xlane.xlu1 %5657 }
0x2a4d   :  { %v5662_v43 = vmul.f32 0.032258064, %v5658_v50  ;;  %v5655_v40 = vpop.xlane.xlu0 %5654 }
0x2a4e   :  { %v5661_v2 = vmul.f32 0.032258064, %v5655_v40 }
0x2a4f   :  { %6891 = vrsqrt.f32 %v5662_v43  ;;  %vm5686_vm4 = vcmp.eq.f32.partialorder %v5662_v43, inf  ;;  %v5689_v62 = vand.u32 2147483648, %v5662_v43  ;;  %vm5688_vm5 = vcmp.eq.f32.partialorder %v5662_v43, 0.0 }
0x2a50   :  { %6893 = vrsqrt.f32 %v5661_v2  ;;  %vm5679_vm6 = vcmp.eq.f32.partialorder %v5661_v2, inf  ;;  %v5682_v61 = vand.u32 2147483648, %v5661_v2  ;;  %vm5681_vm7 = vcmp.eq.f32.partialorder %v5661_v2, 0.0 }
0x2a51   :  { %v6888_v3 = vpop.eup %6887 }
0x2a52   :  { %v6890_v46 = vpop.eup %6889  ;;  %v5671_v4 = vmul.f32 %v6888_v3, %v5660_v47 }
0x2a53   :  { %v5664_v49 = vmul.f32 %v6890_v46, %v5659_v42 }
0x2a54   :  { %v5673_v27 = vsel %vm5672_vm15, %v5660_v47, %v5671_v4 }
0x2a55   :  { %v5676_v8 = vsel %vm5674_vm1, %v5675_v6, %v5673_v27  ;;  %v5666_v58 = vsel %vm5665_vm2, %v5659_v42, %v5664_v49 }
0x2a56   :  { %v5692_v10 = vadd.f32 1e-06, %v5676_v8  ;;  %v5669_v15 = vsel %vm5667_vm3, %v5668_v7, %v5666_v58 }
0x2a57   :  { %v5691_v17 = vadd.f32 1e-06, %v5669_v15 }
0x2a58   :  { %6895 = vrcp.f32 %v5692_v10 }
0x2a59   :  { %v6892_v19 = vpop.eup %6891  ;;  %6897 = vrcp.f32 %v5691_v17 }
0x2a5a   :  { %v6894_v20 = vpop.eup %6893  ;;  %v5685_v21 = vmul.f32 %v6892_v19, %v5662_v43 }
0x2a5b   :  { %v5678_v25 = vmul.f32 %v6894_v20, %v5661_v2 }
0x2a5c   :  { %v5687_v28 = vsel %vm5686_vm4, %v5662_v43, %v5685_v21 }
0x2a5d   :  { %v5690_v31 = vsel %vm5688_vm5, %v5689_v62, %v5687_v28  ;;  %v5680_v9 = vsel %vm5679_vm6, %v5661_v2, %v5678_v25 }
0x2a5e   :  { %v5694_v57 = vadd.f32 1e-06, %v5690_v31  ;;  %v5683_v35 = vsel %vm5681_vm7, %v5682_v61, %v5680_v9 }
0x2a5f   :  { %v5693_v26 = vadd.f32 1e-06, %v5683_v35 }
0x2a60   :  { %6899 = vrcp.f32 %v5694_v57 }
0x2a61   :  { %6901 = vrcp.f32 %v5693_v26 }
0x2a62   :  { %v6896_v63 = vpop.eup %6895 }
0x2a63   :  { %v6898_v32 = vpop.eup %6897  ;;  %v5698_v5 = vmul.f32 %v6896_v63, %v7921_v52 }
0x2a64   :  { %v5696_v37 = vmul.f32 %v6898_v32, %v7923_v13 }
0x2a65   :  { %v5704_v29 = vmul.f32 %v5698_v5, %v7879_v60 }
0x2a66   :  { %v5703_v38 = vmul.f32 %v5696_v37, %v7879_v60 }
0x2a67   :  { %v5708_v14 = vadd.f32 %v5704_v29, %v7884_v30 }
0x2a68   :  { %v5707_v41 = vadd.f32 %v5703_v38, %v7884_v30 }
0x2a69   :  { %5712 = vst.msk [vmem:[#allocation2 + $0x8] sm:$0xff] %vm33_vm0, %v5708_v14 }
0x2a6a   :  { %v6900_v11 = vpop.eup %6899  ;;  %5711 = vst.msk [vmem:[#allocation2] sm:$0xff] %vm33_vm0, %v5707_v41 }
0x2a6b   :  { %v6902_v34 = vpop.eup %6901  ;;  %v5702_v12 = vmul.f32 %v6900_v11, %v7931_v53 }
0x2a6c   :  { %v5700_v51 = vmul.f32 %v6902_v34, %v7933_v18 }
0x2a6d   :  { %v5706_v24 = vmul.f32 %v5702_v12, %v7879_v60 }
0x2a6e   :  { %v5705_v33 = vmul.f32 %v5700_v51, %v7879_v60 }
0x2a6f   :  { %v5710_v52 = vadd.f32 %v5706_v24, %v7884_v30 }
0x2a70   :  { %v5709_v13 = vadd.f32 %v5705_v33, %v7884_v30 }
0x2a71   :  { %5714 = vst.msk [vmem:[#allocation2 + $0x18] sm:$0xff] %vm33_vm0, %v5710_v52 }
0x2a72   :  { %5713 = vst.msk [vmem:[#allocation2 + $0x10] sm:$0xff] %vm33_vm0, %v5709_v13 }
0x2a73   :  { %6919 = shalt.err (!%p6916_p4)
}
0x2a74   :  { %s6920_s12 = scalar_lea.hbm %s7977_s7, 512 }
0x2a75   :  { %p6921_p5 = scmp.ne.s32.totalorder %s7977_s7, %s6920_s12  ;;  %p6924_p6 = scmp.lt.u32.totalorder %s6920_s12, %s7977_s7 }
0x2a77   :  { %p6926_p7 = pnand %p6924_p6, %p6921_p5 }
0x2a79   :  { %6929 = shalt.err (!%p6926_p7)
}
0x2a7a   :  { %s6949_s16 = smov 128  }
0x2a7b   :  { %5726 = dma.vmem_to_hbm [thread:$0]  %s5721_s5, 512, %s7977_s7, [#allocation3], %s6949_s16, %s6949_s16, %s6945_s9  }
0x2a7c   :  { %6930 = dma.done.wait [#allocation3], 512  }
0x2a7d   :  { %6931 = vsyncadd [#allocation3], 4294966784 }
0x2a7e   :  { %5730 = vsyncpa [#allocation3], 1 }

</bundles_post_ra>
